<compile_context>
chip_gen: v5e
topology: v5e:2x2
jax: 0.10.0
libtpu: 0.0.40
codegen_flags: <defaults>
</compile_context>

<pallas_src>
import jax
import jax.numpy as jnp
from jax.experimental import pallas as pl
from jax.experimental.pallas import tpu as pltpu


# ----------------------------------------------------------------------------
# Plain-JAX glue: trilinear grid_sample on a CHANNELS-LAST volume,
# padding_mode='border', align_corners=True (matches F.grid_sample 5-D NCDHW).
# ----------------------------------------------------------------------------
def grid_sample_3d_cl(vol_cl, pts):
    """vol_cl: (B, D, H, W, C); pts: (B, P, 3) normalized (x, y, z) in [-1, 1].
    Returns (B, P, C) channels-last (no post-hoc transpose needed)."""
    B, D, H, W, C = vol_cl.shape
    x, y, z = pts[..., 0], pts[..., 1], pts[..., 2]

    def unnorm(c, size):
        c = (c + 1.0) * 0.5 * (size - 1)           # align_corners=True
        return jnp.clip(c, 0.0, float(size - 1))   # padding_mode='border'

    ix, iy, iz = unnorm(x, W), unnorm(y, H), unnorm(z, D)
    ix0f, iy0f, iz0f = jnp.floor(ix), jnp.floor(iy), jnp.floor(iz)
    wx, wy, wz = ix - ix0f, iy - iy0f, iz - iz0f
    ix0 = ix0f.astype(jnp.int32)
    iy0 = iy0f.astype(jnp.int32)
    iz0 = iz0f.astype(jnp.int32)
    ix1 = jnp.minimum(ix0 + 1, W - 1)
    iy1 = jnp.minimum(iy0 + 1, H - 1)
    iz1 = jnp.minimum(iz0 + 1, D - 1)

    vol_flat = vol_cl.reshape(B, D * H * W, C)

    def gather(zi, yi, xi):
        flat = (zi * H + yi) * W + xi                                   # (B, P)
        return jnp.take_along_axis(vol_flat, flat[:, :, None], axis=1)  # (B, P, C)

    out = jnp.zeros(pts.shape[:2] + (C,), vol_cl.dtype)
    for zi, wz_ in ((iz0, 1.0 - wz), (iz1, wz)):
        for yi, wy_ in ((iy0, 1.0 - wy), (iy1, wy)):
            for xi, wx_ in ((ix0, 1.0 - wx), (ix1, wx)):
                out = out + (wz_ * wy_ * wx_)[:, :, None] * gather(zi, yi, xi)
    return out


# ----------------------------------------------------------------------------
# Pallas kernel 1: fused shift_delta (1x1 conv) + zero-shift-for-neighbour-0
# (pre-masked weights) + vertex add (tiled-identity matmul).
# Emits the 27 neighbour coordinates directly:  (B, N, 81), k-major xyz-minor.
# ----------------------------------------------------------------------------
def neighbourhood_kernel(feat_ref, vert_ref, wsd_ref, weye_ref, bsd_ref, o_ref):
    # feat_ref: (1, NT, C)   vert_ref: (1, NT, 3)
    # wsd_ref:  (C, 81) masked     weye_ref: (3, 81) tiled identity
    # bsd_ref:  (1, 81) masked     o_ref: (1, NT, 81)
    nb = jnp.dot(feat_ref[0], wsd_ref[...], preferred_element_type=jnp.float32)
    nb += jnp.dot(vert_ref[0], weye_ref[...], preferred_element_type=jnp.float32)
    o_ref[0] = (nb + bsd_ref[...]).astype(o_ref.dtype)


# ----------------------------------------------------------------------------
# Pallas kernel 2: the whole diff / center / sum_neighbourhood stack collapsed
# (at trace time) into one GEMM with K = 27*C (+ a 27*3 coordinate GEMM).
# ----------------------------------------------------------------------------
def fused_sampling_kernel(feat_ref, coord_ref, wf_ref, wc_ref, b_ref, o_ref):
    # feat_ref: (1, NT, 27*C)  coord_ref: (1, NT, 81)
    # wf_ref:   (27*C, C)      wc_ref:    (81, C)      b_ref: (1, C)
    acc = jnp.dot(feat_ref[0], wf_ref[...], preferred_element_type=jnp.float32)
    acc += jnp.dot(coord_ref[0], wc_ref[...], preferred_element_type=jnp.float32)
    o_ref[0] = (acc + b_ref[...]).astype(o_ref.dtype)


def _pick_tile(n):
    for t in (512, 256, 128):
        if n % t == 0:
            return t
    return n  # full-N block (always legal: block dim == full array dim)


# ----------------------------------------------------------------------------
# Wrapper
# ----------------------------------------------------------------------------
def learnt_neighbourhood_sampling(voxel_features, vertices, params):
    f32 = jnp.float32
    B, N, _ = vertices.shape
    C = voxel_features.shape[1]
    K = 27
    nt = _pick_tile(N)
    n_tiles = N // nt

    # Channels-last voxel volume (one small transpose, reused by both samples;
    # avoids transposing the much larger (B, N*27, C) gathered tensors).
    vol_cl = jnp.transpose(voxel_features, (0, 2, 3, 4, 1))

    # --- first grid_sample at vertex centers: (B, N, C) channels-last -------
    feat_c = grid_sample_3d_cl(vol_cl, vertices)

    # --- kernel 1: neighbourhood coordinates ---------------------------------
    # zero the neighbour-0 shift by zeroing weight/bias columns 0:3 (no scatter)
    w_sd_t = params["w_sd"].T.astype(f32)                    # (C, 81)
    w_sd_t = w_sd_t.at[:, 0:3].set(0.0)
    b_sd = params["b_sd"].astype(f32).at[0:3].set(0.0).reshape(1, K * 3)
    w_eye = jnp.tile(jnp.eye(3, dtype=f32), (1, K))          # (3, 81) vertex broadcast

    nb_flat = pl.pallas_call(
        neighbourhood_kernel,
        out_shape=jax.ShapeDtypeStruct((B, N, K * 3), f32),
        grid=(B, n_tiles),
        in_specs=[
            pl.BlockSpec((1, nt, C), lambda b, i: (b, i, 0)),
            pl.BlockSpec((1, nt, 3), lambda b, i: (b, i, 0)),
            pl.BlockSpec((C, K * 3), lambda b, i: (0, 0)),
            pl.BlockSpec((3, K * 3), lambda b, i: (0, 0)),
            pl.BlockSpec((1, K * 3), lambda b, i: (0, 0)),
        ],
        out_specs=pl.BlockSpec((1, nt, K * 3), lambda b, i: (b, i, 0)),
        compiler_params=pltpu.CompilerParams(
            dimension_semantics=("parallel", "parallel")),
    )(feat_c, vertices, w_sd_t, w_eye, b_sd)                 # (B, N, 81)

    # --- second grid_sample at all 27 neighbours (channels-last) ------------
    feat_nb = grid_sample_3d_cl(vol_cl, nb_flat.reshape(B, N * K, 3))  # (B, N*27, C)
    feat_nb = feat_nb.reshape(B, N, K * C)      # k-major / c-minor, pure reshape

    # --- trace-time weight fusion of the purely-linear diff/center paths ----
    wd1_t = params["w_d1"].T.astype(f32)                      # (C+3, C)
    wd2_t = params["w_d2"].T.astype(f32)                      # (C, C)
    wc_fused = params["w_c1"].T.astype(f32) @ params["w_c2"].T.astype(f32)  # (C+3, C)
    wsn = jnp.transpose(params["w_sn"].astype(f32), (2, 1, 0))  # (27, C_in, C_out)
    m = wd1_t @ wd2_t                                         # (C+3, C)
    a_all = jnp.einsum("pc,kco->kpo", m, wsn)                 # (27, C+3, C):  A_k
    s = wsn.sum(axis=0)                                       # (C, C):  sum_k Wsn_k
    # B_0 = A_0 - sum_k A_k + Wc_fused  (absorbs both the "-x0" of the diff and
    # the center path);  B_k = A_k for k >= 1.
    b_all = a_all.at[0].add(wc_fused - m @ s)                 # (27, C+3, C)
    bias_total = ((params["b_d1"] @ wd2_t + params["b_d2"]) @ s
                  + params["b_sn"]
                  + params["b_c1"] @ params["w_c2"].T + params["b_c2"])
    w_feat = b_all[:, :C, :].reshape(K * C, C)                # (27*C, C)
    w_coord = b_all[:, C:, :].reshape(K * 3, C)               # (81, C)
    bias_total = bias_total.astype(f32).reshape(1, C)

    # --- kernel 2: one fused GEMM per (batch, N-tile) ------------------------
    out = pl.pallas_call(
        fused_sampling_kernel,
        out_shape=jax.ShapeDtypeStruct((B, N, C), f32),
        grid=(B, n_tiles),
        in_specs=[
            pl.BlockSpec((1, nt, K * C), lambda b, i: (b, i, 0)),
            pl.BlockSpec((1, nt, K * 3), lambda b, i: (b, i, 0)),
            pl.BlockSpec((K * C, C), lambda b, i: (0, 0)),
            pl.BlockSpec((K * 3, C), lambda b, i: (0, 0)),
            pl.BlockSpec((1, C), lambda b, i: (0, 0)),
        ],
        out_specs=pl.BlockSpec((1, nt, C), lambda b, i: (b, i, 0)),
        compiler_params=pltpu.CompilerParams(
            dimension_semantics=("parallel", "parallel")),
    )(feat_nb, nb_flat, w_feat, w_coord, bias_total)
    # TODO(synk): emit a lane-dense (B, C, N_tile) output (N on the lane axis)
    # once the gathered features are produced channel-major; with C=8 the
    # output bytes are ~3% of the input bytes so it is not the binding cost.
    return out


# ----------------------------------------------------------------------------
# Deterministic parameter init (shapes from the module __init__)
# ----------------------------------------------------------------------------
def init_params(key, C):
    def lin(k, fan_in, shape_w, shape_b):
        bound = fan_in ** -0.5
        kw, kb = jax.random.split(k)
        w = jax.random.uniform(kw, shape_w, jnp.float32, -bound, bound)
        b = jax.random.uniform(kb, shape_b, jnp.float32, -bound, bound)
        return w, b

    ks = jax.random.split(key, 5)
    p = {}
    # sum_neighbourhood: Conv2d(C, C, kernel_size=(1, 27)) -> weight (C, C, 27)
    p["w_sn"], p["b_sn"] = lin(ks[0], C * 27, (C, C, 27), (C,))
    # shift_delta: Conv1d(C, 81, 1) -- the module fills weight & bias with 0
    p["w_sd"] = jnp.zeros((81, C), jnp.float32)
    p["b_sd"] = jnp.zeros((81,), jnp.float32)
    p["w_d1"], p["b_d1"] = lin(ks[1], C + 3, (C, C + 3), (C,))
    p["w_d2"], p["b_d2"] = lin(ks[2], C, (C, C), (C,))
    p["w_c1"], p["b_c1"] = lin(ks[3], C + 3, (C, C + 3), (C,))
    p["w_c2"], p["b_c2"] = lin(ks[4], C, (C, C), (C,))
    return p


# ----------------------------------------------------------------------------
# Pure-JAX reference (un-fused, follows the PyTorch forward step by step)
# ----------------------------------------------------------------------------
def ref_forward(voxel_features, vertices, p):
    B, N, _ = vertices.shape
    C = voxel_features.shape[1]
    vol_cl = jnp.transpose(voxel_features, (0, 2, 3, 4, 1))
    feat_c = grid_sample_3d_cl(vol_cl, vertices)                       # (B, N, C)
    sd = jnp.einsum("bnc,oc->bno", feat_c, p["w_sd"]) + p["b_sd"]      # (B, N, 81)
    sd = sd.reshape(B, N, 27, 3).at[:, :, 0, :].set(0.0)
    nb = vertices[:, :, None, :] + sd                                   # (B, N, 27, 3)
    f = grid_sample_3d_cl(vol_cl, nb.reshape(B, N * 27, 3)).reshape(B, N, 27, C)
    x = jnp.concatenate([f, nb], axis=-1)                               # (B, N, 27, C+3)
    diff = x - x[:, :, 0:1, :]
    h = jnp.einsum("bnkc,oc->bnko", diff, p["w_d1"]) + p["b_d1"]
    h = jnp.einsum("bnkc,oc->bnko", h, p["w_d2"]) + p["b_d2"]
    sn = jnp.einsum("bnkc,ock->bno", h, p["w_sn"]) + p["b_sn"]
    c0 = x[:, :, 0, :]
    c = jnp.einsum("bnc,oc->bno", c0, p["w_c1"]) + p["b_c1"]
    c = jnp.einsum("bnc,oc->bno", c, p["w_c2"]) + p["b_c2"]
    return c + sn


if __name__ == "__main__":
    key = jax.random.PRNGKey(0)
    B, C, D, H, W, N = 2, 8, 16, 16, 16, 1024
    k1, k2, k3, k4, k5 = jax.random.split(key, 5)
    voxel_features = jax.random.normal(k1, (B, C, D, H, W), jnp.float32)
    vertices = jax.random.uniform(k2, (B, N, 3), jnp.float32, -1.0, 1.0)
    params = init_params(k3, C)
    # The module zero-initializes shift_delta; use small random values here so
    # the shift path and the second grid_sample are numerically exercised.
    params["w_sd"] = 0.05 * jax.random.normal(k4, (81, C), jnp.float32)
    params["b_sd"] = 0.05 * jax.random.normal(k5, (81,), jnp.float32)

    out = jax.jit(learnt_neighbourhood_sampling)(voxel_features, vertices, params)
    out = jax.block_until_ready(out)

    ref = ref_forward(voxel_features, vertices, params)
    assert out.shape == (B, N, C), out.shape
    err = float(jnp.max(jnp.abs(out - ref)))
    scale = float(jnp.max(jnp.abs(ref)))
    assert err < 1e-3 * max(1.0, scale), f"max abs err {err} (scale {scale})"
    print("KERNEL_OK")
</pallas_src>

<mosaic_0001>
module attributes {stable_mosaic.version = 11 : i64} {
  func.func @neighbourhood_kernel(%arg0: i32, %arg1: i32, %arg2: memref<1x512x8xf32, #tpu.memory_space<vmem>>, %arg3: memref<1x512x3xf32, #tpu.memory_space<vmem>>, %arg4: memref<8x81xf32, #tpu.memory_space<vmem>>, %arg5: memref<3x81xf32, #tpu.memory_space<vmem>>, %arg6: memref<1x81xf32, #tpu.memory_space<vmem>>, %arg7: memref<1x512x81xf32, #tpu.memory_space<vmem>>) attributes {dimension_semantics = [#tpu.dimension_semantics<parallel>, #tpu.dimension_semantics<parallel>], iteration_bounds = array<i64: 2, 2>, scalar_prefetch = 0 : i64, scratch_operands = 0 : i64, tpu.core_type = #tpu.core_type<tc>, window_params = [{transform_indices = @transform_0, window_bounds = array<i64: 1, 512, 8>}, {transform_indices = @transform_1, window_bounds = array<i64: 1, 512, 3>}, {pipeline_mode = #tpu.pipeline_mode<synchronous>, transform_indices = @transform_2, window_bounds = array<i64: 8, 81>}, {pipeline_mode = #tpu.pipeline_mode<synchronous>, transform_indices = @transform_3, window_bounds = array<i64: 3, 81>}, {pipeline_mode = #tpu.pipeline_mode<synchronous>, transform_indices = @transform_4, window_bounds = array<i64: 1, 81>}, {transform_indices = @transform_5, window_bounds = array<i64: 1, 512, 81>}]} {
    %c0 = arith.constant 0 : index
    %c0_0 = arith.constant 0 : index
    %c0_1 = arith.constant 0 : index
    %0 = vector.load %arg2[%c0, %c0_0, %c0_1] : memref<1x512x8xf32, #tpu.memory_space<vmem>>, vector<1x512x8xf32>
    %1 = vector.shape_cast %0 : vector<1x512x8xf32> to vector<512x8xf32>
    %c0_2 = arith.constant 0 : index
    %c0_3 = arith.constant 0 : index
    %2 = vector.load %arg4[%c0_2, %c0_3] : memref<8x81xf32, #tpu.memory_space<vmem>>, vector<8x81xf32>
    %cst = arith.constant dense<0.000000e+00> : vector<512x81xf32>
    %3 = tpu.matmul %1, %2, %cst {dimension_numbers = #tpu.dot_dimension_numbers<[1], [0], [0], [1], [0, 0, 1, 1], [], []>} : vector<512x8xf32>, vector<8x81xf32>, vector<512x81xf32> -> vector<512x81xf32>
    %c0_4 = arith.constant 0 : index
    %c0_5 = arith.constant 0 : index
    %c0_6 = arith.constant 0 : index
    %4 = vector.load %arg3[%c0_4, %c0_5, %c0_6] : memref<1x512x3xf32, #tpu.memory_space<vmem>>, vector<1x512x3xf32>
    %5 = vector.shape_cast %4 : vector<1x512x3xf32> to vector<512x3xf32>
    %c0_7 = arith.constant 0 : index
    %c0_8 = arith.constant 0 : index
    %6 = vector.load %arg5[%c0_7, %c0_8] : memref<3x81xf32, #tpu.memory_space<vmem>>, vector<3x81xf32>
    %cst_9 = arith.constant dense<0.000000e+00> : vector<512x81xf32>
    %7 = tpu.matmul %5, %6, %cst_9 {dimension_numbers = #tpu.dot_dimension_numbers<[1], [0], [0], [1], [0, 0, 1, 1], [], []>} : vector<512x3xf32>, vector<3x81xf32>, vector<512x81xf32> -> vector<512x81xf32>
    %8 = arith.addf %3, %7 : vector<512x81xf32>
    %c0_10 = arith.constant 0 : index
    %c0_11 = arith.constant 0 : index
    %9 = vector.load %arg6[%c0_10, %c0_11] : memref<1x81xf32, #tpu.memory_space<vmem>>, vector<1x81xf32>
    %10 = vector.broadcast %9 : vector<1x81xf32> to vector<512x81xf32>
    %11 = arith.addf %8, %10 : vector<512x81xf32>
    %c0_12 = arith.constant 0 : index
    %c0_13 = arith.constant 0 : index
    %c0_14 = arith.constant 0 : index
    %12 = vector.load %arg7[%c0_12, %c0_13, %c0_14] : memref<1x512x81xf32, #tpu.memory_space<vmem>>, vector<1x512x81xf32>
    %13 = vector.shape_cast %12 : vector<1x512x81xf32> to vector<512x81xf32>
    %14 = vector.shape_cast %11 : vector<512x81xf32> to vector<1x512x81xf32>
    tpu.vector_store %arg7[%c0_12, %c0_13, %c0_14], %14 {strides = array<i32>} : memref<1x512x81xf32, #tpu.memory_space<vmem>>, vector<1x512x81xf32>,
    return
  }
  func.func @transform_0(%arg0: i32, %arg1: i32) -> (i32, i32, i32) {
    %c0_i32 = arith.constant 0 : i32
    %c0_i32_0 = arith.constant 0 : i32
    return %arg0, %arg1, %c0_i32 : i32, i32, i32
  }
  func.func @transform_1(%arg0: i32, %arg1: i32) -> (i32, i32, i32) {
    %c0_i32 = arith.constant 0 : i32
    %c0_i32_0 = arith.constant 0 : i32
    return %arg0, %arg1, %c0_i32 : i32, i32, i32
  }
  func.func @transform_2(%arg0: i32, %arg1: i32) -> (i32, i32) {
    %c0_i32 = arith.constant 0 : i32
    %c0_i32_0 = arith.constant 0 : i32
    %c0_i32_1 = arith.constant 0 : i32
    return %c0_i32, %c0_i32_0 : i32, i32
  }
  func.func @transform_3(%arg0: i32, %arg1: i32) -> (i32, i32) {
    %c0_i32 = arith.constant 0 : i32
    %c0_i32_0 = arith.constant 0 : i32
    %c0_i32_1 = arith.constant 0 : i32
    return %c0_i32, %c0_i32_0 : i32, i32
  }
  func.func @transform_4(%arg0: i32, %arg1: i32) -> (i32, i32) {
    %c0_i32 = arith.constant 0 : i32
    %c0_i32_0 = arith.constant 0 : i32
    %c0_i32_1 = arith.constant 0 : i32
    return %c0_i32, %c0_i32_0 : i32, i32
  }
  func.func @transform_5(%arg0: i32, %arg1: i32) -> (i32, i32, i32) {
    %c0_i32 = arith.constant 0 : i32
    %c0_i32_0 = arith.constant 0 : i32
    return %arg0, %arg1, %c0_i32 : i32, i32, i32
  }
}

module attributes {stable_mosaic.version = 11 : i64} {
  func.func @fused_sampling_kernel(%arg0: i32, %arg1: i32, %arg2: memref<1x512x216xf32, #tpu.memory_space<vmem>>, %arg3: memref<1x512x81xf32, #tpu.memory_space<vmem>>, %arg4: memref<216x8xf32, #tpu.memory_space<vmem>>, %arg5: memref<81x8xf32, #tpu.memory_space<vmem>>, %arg6: memref<1x8xf32, #tpu.memory_space<vmem>>, %arg7: memref<1x512x8xf32, #tpu.memory_space<vmem>>) attributes {dimension_semantics = [#tpu.dimension_semantics<parallel>, #tpu.dimension_semantics<parallel>], iteration_bounds = array<i64: 2, 2>, scalar_prefetch = 0 : i64, scratch_operands = 0 : i64, tpu.core_type = #tpu.core_type<tc>, window_params = [{transform_indices = @transform_0, window_bounds = array<i64: 1, 512, 216>}, {transform_indices = @transform_1, window_bounds = array<i64: 1, 512, 81>}, {pipeline_mode = #tpu.pipeline_mode<synchronous>, transform_indices = @transform_2, window_bounds = array<i64: 216, 8>}, {pipeline_mode = #tpu.pipeline_mode<synchronous>, transform_indices = @transform_3, window_bounds = array<i64: 81, 8>}, {pipeline_mode = #tpu.pipeline_mode<synchronous>, transform_indices = @transform_4, window_bounds = array<i64: 1, 8>}, {transform_indices = @transform_5, window_bounds = array<i64: 1, 512, 8>}]} {
    %c0 = arith.constant 0 : index
    %c0_0 = arith.constant 0 : index
    %c0_1 = arith.constant 0 : index
    %0 = vector.load %arg2[%c0, %c0_0, %c0_1] : memref<1x512x216xf32, #tpu.memory_space<vmem>>, vector<1x512x216xf32>
    %1 = vector.shape_cast %0 : vector<1x512x216xf32> to vector<512x216xf32>
    %c0_2 = arith.constant 0 : index
    %c0_3 = arith.constant 0 : index
    %2 = vector.load %arg4[%c0_2, %c0_3] : memref<216x8xf32, #tpu.memory_space<vmem>>, vector<216x8xf32>
    %cst = arith.constant dense<0.000000e+00> : vector<512x8xf32>
    %3 = tpu.matmul %1, %2, %cst {dimension_numbers = #tpu.dot_dimension_numbers<[1], [0], [0], [1], [0, 0, 1, 1], [], []>} : vector<512x216xf32>, vector<216x8xf32>, vector<512x8xf32> -> vector<512x8xf32>
    %c0_4 = arith.constant 0 : index
    %c0_5 = arith.constant 0 : index
    %c0_6 = arith.constant 0 : index
    %4 = vector.load %arg3[%c0_4, %c0_5, %c0_6] : memref<1x512x81xf32, #tpu.memory_space<vmem>>, vector<1x512x81xf32>
    %5 = vector.shape_cast %4 : vector<1x512x81xf32> to vector<512x81xf32>
    %c0_7 = arith.constant 0 : index
    %c0_8 = arith.constant 0 : index
    %6 = vector.load %arg5[%c0_7, %c0_8] : memref<81x8xf32, #tpu.memory_space<vmem>>, vector<81x8xf32>
    %cst_9 = arith.constant dense<0.000000e+00> : vector<512x8xf32>
    %7 = tpu.matmul %5, %6, %cst_9 {dimension_numbers = #tpu.dot_dimension_numbers<[1], [0], [0], [1], [0, 0, 1, 1], [], []>} : vector<512x81xf32>, vector<81x8xf32>, vector<512x8xf32> -> vector<512x8xf32>
    %8 = arith.addf %3, %7 : vector<512x8xf32>
    %c0_10 = arith.constant 0 : index
    %c0_11 = arith.constant 0 : index
    %9 = vector.load %arg6[%c0_10, %c0_11] : memref<1x8xf32, #tpu.memory_space<vmem>>, vector<1x8xf32>
    %10 = vector.broadcast %9 : vector<1x8xf32> to vector<512x8xf32>
    %11 = arith.addf %8, %10 : vector<512x8xf32>
    %c0_12 = arith.constant 0 : index
    %c0_13 = arith.constant 0 : index
    %c0_14 = arith.constant 0 : index
    %12 = vector.load %arg7[%c0_12, %c0_13, %c0_14] : memref<1x512x8xf32, #tpu.memory_space<vmem>>, vector<1x512x8xf32>
    %13 = vector.shape_cast %12 : vector<1x512x8xf32> to vector<512x8xf32>
    %14 = vector.shape_cast %11 : vector<512x8xf32> to vector<1x512x8xf32>
    tpu.vector_store %arg7[%c0_12, %c0_13, %c0_14], %14 {strides = array<i32>} : memref<1x512x8xf32, #tpu.memory_space<vmem>>, vector<1x512x8xf32>,
    return
  }
  func.func @transform_0(%arg0: i32, %arg1: i32) -> (i32, i32, i32) {
    %c0_i32 = arith.constant 0 : i32
    %c0_i32_0 = arith.constant 0 : i32
    return %arg0, %arg1, %c0_i32 : i32, i32, i32
  }
  func.func @transform_1(%arg0: i32, %arg1: i32) -> (i32, i32, i32) {
    %c0_i32 = arith.constant 0 : i32
    %c0_i32_0 = arith.constant 0 : i32
    return %arg0, %arg1, %c0_i32 : i32, i32, i32
  }
  func.func @transform_2(%arg0: i32, %arg1: i32) -> (i32, i32) {
    %c0_i32 = arith.constant 0 : i32
    %c0_i32_0 = arith.constant 0 : i32
    %c0_i32_1 = arith.constant 0 : i32
    return %c0_i32, %c0_i32_0 : i32, i32
  }
  func.func @transform_3(%arg0: i32, %arg1: i32) -> (i32, i32) {
    %c0_i32 = arith.constant 0 : i32
    %c0_i32_0 = arith.constant 0 : i32
    %c0_i32_1 = arith.constant 0 : i32
    return %c0_i32, %c0_i32_0 : i32, i32
  }
  func.func @transform_4(%arg0: i32, %arg1: i32) -> (i32, i32) {
    %c0_i32 = arith.constant 0 : i32
    %c0_i32_0 = arith.constant 0 : i32
    %c0_i32_1 = arith.constant 0 : i32
    return %c0_i32, %c0_i32_0 : i32, i32
  }
  func.func @transform_5(%arg0: i32, %arg1: i32) -> (i32, i32, i32) {
    %c0_i32 = arith.constant 0 : i32
    %c0_i32_0 = arith.constant 0 : i32
    return %arg0, %arg1, %c0_i32 : i32, i32, i32
  }
}

</mosaic_0001>

<bundles_post_ra>
// kernel: tile.9
= control target key start
LH: loop header
LB: loop body
LE: loop exit
PB: predicated region body
PF: predicated region fallthrough
CT: control target
= control target key end

     0   :  { %vm5_vm0 = vcmask 1041409   ;;  %vm9_vm1 = vcmask 1042434   ;;  %s489_s20 = smov 78   ;;  %s490_s27 = smov 72   ;;  %vm11_vm2 = vcmask 23552   ;;  %vm25_vm3 = vcmask 663152   ;;  %s825_s0 = inlined_call_operand.vmem [shape: f32[3,27,3], index: 0, kind: input, shape index: {}]   ;;  %s826_s1 = inlined_call_operand.vmem [shape: f32[3,81], index: 1, kind: output, shape index: {}]  }
   0x1   :  { %v385_v0 = vld [vmem:[%s825_s0 + $0x1a] sm:$0x1]   ;;  %v391_v4 = vld [vmem:[%s825_s0 + $0x18] sm:$0x1]   ;;  %v388_v8 = vld [vmem:[%s825_s0 + $0x19] sm:$0x1]  }
   0x2   :  { %v386_v1 = vld [vmem:[%s825_s0 + $0x39] sm:$0x2]   ;;  %v392_v6 = vld [vmem:[%s825_s0 + $0x37] sm:$0x2]   ;;  %v389_v10 = vld [vmem:[%s825_s0 + $0x38] sm:$0x2]  }
   0x3   :  { %v18_v2 = vsel %vm5_vm0, %v386_v1, %v385_v0  ;;  %v387_v3 = vld [vmem:[%s825_s0 + $0x58] sm:$0x4]   ;;  %v393_v7 = vld [vmem:[%s825_s0 + $0x56] sm:$0x4]   ;;  %v46_v9 = vsel %vm5_vm0, %v392_v6, %v391_v4  ;;  %v394_v12 = vld [vmem:[%s825_s0 + $0x17] sm:$0x1]   ;;  %v32_v14 = vsel %vm5_vm0, %v389_v10, %v388_v8 }
   0x4   :  { %v22_v5 = vsel %vm9_vm1, %v387_v3, %v18_v2  ;;  %v50_v11 = vsel %vm9_vm1, %v393_v7, %v46_v9  ;;  %v395_v13 = vld [vmem:[%s825_s0 + $0x36] sm:$0x2]   ;;  %v390_v15 = vld [vmem:[%s825_s0 + $0x57] sm:$0x4]   ;;  %v403_v19 = vld [vmem:[%s825_s0 + $0x14] sm:$0x1]  }
   0x5   :  { %23 = vrot.lane.b32.xlu0 %v22_v5, %s489_s20  ;;  %51 = vrot.lane.b32.xlu1 %v50_v11, %s490_s27  ;;  %v60_v16 = vsel %vm5_vm0, %v395_v13, %v394_v12  ;;  %v396_v17 = vld [vmem:[%s825_s0 + $0x55] sm:$0x4]   ;;  %v36_v18 = vsel %vm9_vm1, %v390_v15, %v32_v14  ;;  %v404_v20 = vld [vmem:[%s825_s0 + $0x33] sm:$0x2]   ;;  %s491_s13 = smov 75   ;;  %s492_s20 = smov 69  }
   0x6   :  { %v397_v21 = vld [vmem:[%s825_s0 + $0x16] sm:$0x1]   ;;  %v64_v22 = vsel %vm9_vm1, %v396_v17, %v60_v16  ;;  %v405_v26 = vld [vmem:[%s825_s0 + $0x52] sm:$0x4]   ;;  %v406_v27 = vld [vmem:[%s825_s0 + $0x13] sm:$0x1]   ;;  %v102_v30 = vsel %vm5_vm0, %v404_v20, %v403_v19 }
   0x7   :  { %v398_v23 = vld [vmem:[%s825_s0 + $0x35] sm:$0x2]   ;;  %v407_v28 = vld [vmem:[%s825_s0 + $0x32] sm:$0x2]   ;;  %s493_s21 = smov 66   ;;  %v106_v37 = vsel %vm9_vm1, %v405_v26, %v102_v30  ;;  %s494_s5 = smov 60  }
   0x8   :  { %v399_v24 = vld [vmem:[%s825_s0 + $0x54] sm:$0x4]   ;;  %v74_v25 = vsel %vm5_vm0, %v398_v23, %v397_v21  ;;  %v400_v31 = vld [vmem:[%s825_s0 + $0x15] sm:$0x1]   ;;  %v116_v33 = vsel %vm5_vm0, %v407_v28, %v406_v27  ;;  %v408_v34 = vld [vmem:[%s825_s0 + $0x51] sm:$0x4]  }
   0x9   :  { %v78_v29 = vsel %vm9_vm1, %v399_v24, %v74_v25  ;;  %v401_v32 = vld [vmem:[%s825_s0 + $0x34] sm:$0x2]   ;;  %v120_v38 = vsel %vm9_vm1, %v408_v34, %v116_v33  ;;  %v412_v39 = vld [vmem:[%s825_s0 + $0x11] sm:$0x1]   ;;  %v415_v42 = vld [vmem:[%s825_s0 + $0x10] sm:$0x1]  }
   0xa   :  { %79 = vrot.lane.b32.xlu2 %v78_v29, %s493_s21  ;;  %v88_v35 = vsel %vm5_vm0, %v401_v32, %v400_v31  ;;  %v402_v36 = vld [vmem:[%s825_s0 + $0x53] sm:$0x4]   ;;  %v413_v40 = vld [vmem:[%s825_s0 + $0x30] sm:$0x2]   ;;  %v416_v43 = vld [vmem:[%s825_s0 + $0x2f] sm:$0x2]  }
   0xb   :  { %v92_v41 = vsel %vm9_vm1, %v402_v36, %v88_v35  ;;  %v409_v44 = vld [vmem:[%s825_s0 + $0x12] sm:$0x1]   ;;  %s495_s14 = smov 57   ;;  %v144_v46 = vsel %vm5_vm0, %v413_v40, %v412_v39  ;;  %v414_v47 = vld [vmem:[%s825_s0 + $0x4f] sm:$0x4]   ;;  %s496_s17 = smov 63   ;;  %v158_v48 = vsel %vm5_vm0, %v416_v43, %v415_v42 }
   0xc   :  { %v410_v45 = vld [vmem:[%s825_s0 + $0x31] sm:$0x2]   ;;  %v417_v49 = vld [vmem:[%s825_s0 + $0x4e] sm:$0x4]   ;;  %v148_v52 = vsel %vm9_vm1, %v414_v47, %v144_v46  ;;  %v421_v54 = vld [vmem:[%s825_s0 + $0xe] sm:$0x1]  }
   0xd   :  { %37 = vrot.lane.b32.xlu0 %v36_v18, %s491_s13  ;;  %65 = vrot.lane.b32.xlu1 %v64_v22, %s492_s20  ;;  %v130_v50 = vsel %vm5_vm0, %v410_v45, %v409_v44  ;;  %v411_v51 = vld [vmem:[%s825_s0 + $0x50] sm:$0x4]   ;;  %v162_v53 = vsel %vm9_vm1, %v417_v49, %v158_v48  ;;  %v422_v55 = vld [vmem:[%s825_s0 + $0x2d] sm:$0x2]   ;;  %s497_s26 = smov 51   ;;  %s498_s6 = smov 48  }
   0xe   :  { %v134_v56 = vsel %vm9_vm1, %v411_v51, %v130_v50  ;;  %v424_v57 = vld [vmem:[%s825_s0 + $0xd] sm:$0x1]   ;;  %v418_v59 = vld [vmem:[%s825_s0 + $0xf] sm:$0x1]   ;;  %v186_v61 = vsel %vm5_vm0, %v422_v55, %v421_v54  ;;  %v423_v62 = vld [vmem:[%s825_s0 + $0x4c] sm:$0x4]  }
   0xf   :  { %v425_v58 = vld [vmem:[%s825_s0 + $0x2c] sm:$0x2]   ;;  %v419_v60 = vld [vmem:[%s825_s0 + $0x2e] sm:$0x2]   ;;  %s499_s9 = smov 54   ;;  %v190_v3 = vsel %vm9_vm1, %v423_v62, %v186_v61  ;;  %s500_s18 = smov 42  }
  0x10   :  { %v200_v63 = vsel %vm5_vm0, %v425_v58, %v424_v57  ;;  %v426_v0 = vld [vmem:[%s825_s0 + $0x4b] sm:$0x4]   ;;  %v172_v1 = vsel %vm5_vm0, %v419_v60, %v418_v59  ;;  %v420_v2 = vld [vmem:[%s825_s0 + $0x4d] sm:$0x4]   ;;  %v430_v5 = vld [vmem:[%s825_s0 + $0xb] sm:$0x1]  }
  0x11   :  { %v204_v4 = vsel %vm9_vm1, %v426_v0, %v200_v63  ;;  %v431_v6 = vld [vmem:[%s825_s0 + $0x2a] sm:$0x2]   ;;  %v176_v7 = vsel %vm9_vm1, %v420_v2, %v172_v1  ;;  %v433_v8 = vld [vmem:[%s825_s0 + $0xa] sm:$0x1]   ;;  %v427_v10 = vld [vmem:[%s825_s0 + $0xc] sm:$0x1]  }
  0x12   :  { %93 = vrot.lane.b32.xlu2 %v92_v41, %s496_s17  ;;  %v434_v9 = vld [vmem:[%s825_s0 + $0x29] sm:$0x2]   ;;  %v428_v11 = vld [vmem:[%s825_s0 + $0x2b] sm:$0x2]   ;;  %s501_s27 = smov 39   ;;  %v228_v12 = vsel %vm5_vm0, %v431_v6, %v430_v5  ;;  %s502_s30 = smov 45  }
  0x13   :  { %v432_v13 = vld [vmem:[%s825_s0 + $0x49] sm:$0x4]   ;;  %v242_v14 = vsel %vm5_vm0, %v434_v9, %v433_v8  ;;  %v435_v15 = vld [vmem:[%s825_s0 + $0x48] sm:$0x4]   ;;  %v214_v16 = vsel %vm5_vm0, %v428_v11, %v427_v10  ;;  %v429_v17 = vld [vmem:[%s825_s0 + $0x4a] sm:$0x4]  }
  0x14   :  { %v232_v18 = vsel %vm9_vm1, %v432_v13, %v228_v12  ;;  %v246_v19 = vsel %vm9_vm1, %v435_v15, %v242_v14  ;;  %v439_v20 = vld [vmem:[%s825_s0 + $0x8] sm:$0x1]   ;;  %v218_v22 = vsel %vm9_vm1, %v429_v17, %v214_v16  ;;  %s503_s10 = smov 33   ;;  %v442_v23 = vld [vmem:[%s825_s0 + $0x7] sm:$0x1]   ;;  %s504_s19 = smov 30  }
  0x15   :  { %107 = vrot.lane.b32.xlu0 %v106_v37, %s494_s5  ;;  %121 = vrot.lane.b32.xlu1 %v120_v38, %s495_s14  ;;  %v440_v21 = vld [vmem:[%s825_s0 + $0x27] sm:$0x2]   ;;  %v443_v24 = vld [vmem:[%s825_s0 + $0x26] sm:$0x2]   ;;  %s505_s22 = smov 36   ;;  %s506_s2 = smov 24  }
  0x16   :  { %v436_v25 = vld [vmem:[%s825_s0 + $0x9] sm:$0x1]   ;;  %v270_v27 = vsel %vm5_vm0, %v440_v21, %v439_v20  ;;  %v441_v28 = vld [vmem:[%s825_s0 + $0x46] sm:$0x4]   ;;  %v284_v29 = vsel %vm5_vm0, %v443_v24, %v442_v23  ;;  %v444_v30 = vld [vmem:[%s825_s0 + $0x45] sm:$0x4]  }
  0x17   :  { %v437_v26 = vld [vmem:[%s825_s0 + $0x28] sm:$0x2]   ;;  %v274_v33 = vsel %vm9_vm1, %v441_v28, %v270_v27  ;;  %v288_v34 = vsel %vm9_vm1, %v444_v30, %v284_v29  ;;  %v448_v35 = vld [vmem:[%s825_s0 + $0x5] sm:$0x1]   ;;  %v451_v38 = vld [vmem:[%s825_s0 + $0x4] sm:$0x1]  }
  0x18   :  { %v256_v31 = vsel %vm5_vm0, %v437_v26, %v436_v25  ;;  %v438_v32 = vld [vmem:[%s825_s0 + $0x47] sm:$0x4]   ;;  %v449_v36 = vld [vmem:[%s825_s0 + $0x24] sm:$0x2]   ;;  %v452_v39 = vld [vmem:[%s825_s0 + $0x23] sm:$0x2]  }
  0x19   :  { %v260_v37 = vsel %vm9_vm1, %v438_v32, %v256_v31  ;;  %v445_v40 = vld [vmem:[%s825_s0 + $0x6] sm:$0x1]   ;;  %s507_s11 = smov 21   ;;  %v312_v42 = vsel %vm5_vm0, %v449_v36, %v448_v35  ;;  %v450_v43 = vld [vmem:[%s825_s0 + $0x43] sm:$0x4]   ;;  %s508_s14 = smov 27   ;;  %v326_v44 = vsel %vm5_vm0, %v452_v39, %v451_v38 }
  0x1a   :  { %135 = vrot.lane.b32.xlu2 %v134_v56, %s499_s9  ;;  %v446_v41 = vld [vmem:[%s825_s0 + $0x25] sm:$0x2]   ;;  %v453_v45 = vld [vmem:[%s825_s0 + $0x42] sm:$0x4]   ;;  %v316_v48 = vsel %vm9_vm1, %v450_v43, %v312_v42  ;;  %v457_v50 = vld [vmem:[%s825_s0 + $0x2] sm:$0x1]  }
  0x1b   :  { %v298_v46 = vsel %vm5_vm0, %v446_v41, %v445_v40  ;;  %v447_v47 = vld [vmem:[%s825_s0 + $0x44] sm:$0x4]   ;;  %v330_v49 = vsel %vm9_vm1, %v453_v45, %v326_v44  ;;  %v458_v51 = vld [vmem:[%s825_s0 + $0x21] sm:$0x2]   ;;  %s509_s23 = smov 15   ;;  %s510_s3 = smov 12  }
  0x1c   :  { %v461_v54 = vld [vmem:[%s825_s0 + $0x20] sm:$0x2]   ;;  %v454_v55 = vld [vmem:[%s825_s0 + $0x3] sm:$0x1]   ;;  %v354_v57 = vsel %vm5_vm0, %v458_v51, %v457_v50  ;;  %v459_v58 = vld [vmem:[%s825_s0 + $0x40] sm:$0x4]  }
  0x1d   :  { %149 = vrot.lane.b32.xlu0 %v148_v52, %s497_s26  ;;  %163 = vrot.lane.b32.xlu1 %v162_v53, %s498_s6  ;;  %v302_v52 = vsel %vm9_vm1, %v447_v47, %v298_v46  ;;  %v460_v53 = vld [vmem:[%s825_s0 + $0x1] sm:$0x1]   ;;  %v455_v56 = vld [vmem:[%s825_s0 + $0x22] sm:$0x2]   ;;  %s511_s6 = smov 18   ;;  %v358_v63 = vsel %vm9_vm1, %v459_v58, %v354_v57  ;;  %s513_s12 = smov 3  }
  0x1e   :  { %v368_v59 = vsel %vm5_vm0, %v461_v54, %v460_v53  ;;  %v462_v60 = vld [vmem:[%s825_s0 + $0x3f] sm:$0x4]   ;;  %v340_v61 = vsel %vm5_vm0, %v455_v56, %v454_v55  ;;  %v456_v62 = vld [vmem:[%s825_s0 + $0x41] sm:$0x4]   ;;  %s514_s13 = smov 9   ;;  %vm39_vm4 = vcmask 638552  }
  0x1f   :  { %v372_v0 = vsel %vm9_vm1, %v462_v60, %v368_v59  ;;  %v344_v1 = vsel %vm9_vm1, %v456_v62, %v340_v61  ;;  %v384_v2 = vld [vmem:[%s825_s0 + $0x3e] sm:$0x4]   ;;  %vm53_vm5 = vcmask 613952   ;;  %vm67_vm6 = vcmask 589352  }
  0x20   :  { %vm81_vm7 = vcmask 564752   ;;  %vm95_vm8 = vcmask 540152   ;;  %vm109_vm9 = vcmask 515552   ;;  %vm123_vm10 = vcmask 490952  }
  0x21   :  { %vm137_vm11 = vcmask 466352   ;;  %vm151_vm12 = vcmask 441752   ;;  %vm165_vm13 = vcmask 417152   ;;  %vm179_vm14 = vcmask 392552  }
  0x22   :  { %177 = vrot.lane.b32.xlu2 %v176_v7, %s502_s30  ;;  %vm193_vm15 = vcmask 367952  }
  0x25   :  { %191 = vrot.lane.b32.xlu0 %v190_v3, %s500_s18  ;;  %205 = vrot.lane.b32.xlu1 %v204_v4, %s501_s27  ;;  %v2_v3 = vld [vmem:[%s825_s0] sm:$0x1]  }
  0x26   :  { %v383_v4 = vld [vmem:[%s825_s0 + $0x1f] sm:$0x2]  }
  0x27   :  { %v6_v5 = vsel %vm5_vm0, %v383_v4, %v2_v3  ;;  %vm207_vm0 = vcmask 343352  }
  0x28   :  { %v10_v6 = vsel %vm9_vm1, %v384_v2, %v6_v5  ;;  %vm221_vm1 = vcmask 318752  }
  0x29   :  { %12 = vst.msk [vmem:[#allocation0] sm:$0x7] %vm11_vm2, %v10_v6   ;;  %vm235_vm2 = vcmask 294152  }
  0x2a   :  { %219 = vrot.lane.b32.xlu2 %v218_v22, %s505_s22 }
  0x2d   :  { %233 = vrot.lane.b32.xlu0 %v232_v18, %s503_s10  ;;  %247 = vrot.lane.b32.xlu1 %v246_v19, %s504_s19 }
  0x32   :  { %261 = vrot.lane.b32.xlu2 %v260_v37, %s508_s14 }
  0x35   :  { %275 = vrot.lane.b32.xlu0 %v274_v33, %s506_s2  ;;  %289 = vrot.lane.b32.xlu1 %v288_v34, %s507_s11  ;;  %s512_s11 = smov 6  }
  0x3a   :  { %303 = vrot.lane.b32.xlu2 %v302_v52, %s511_s6 }
  0x3d   :  { %317 = vrot.lane.b32.xlu0 %v316_v48, %s509_s23  ;;  %331 = vrot.lane.b32.xlu1 %v330_v49, %s510_s3 }
  0x42   :  { %345 = vrot.lane.b32.xlu2 %v344_v1, %s514_s13 }
  0x45   :  { %359 = vrot.lane.b32.xlu0 %v358_v63, %s512_s11  ;;  %373 = vrot.lane.b32.xlu1 %v372_v0, %s513_s12 }
  0x64   :  { %v80_v7 = vpop.permute.xlu2 %79  }
  0x6c   :  { %v94_v8 = vpop.permute.xlu2 %93  }
  0x74   :  { %v136_v11 = vpop.permute.xlu2 %135  }
  0x77   :  { %v24_v9 = vpop.permute.xlu0 %23   ;;  %v52_v10 = vpop.permute.xlu1 %51  }
  0x78   :  { %26 = vst.msk [vmem:[#allocation0] sm:$0x7] %vm25_vm3, %v24_v9   ;;  %vm249_vm3 = vcmask 269552  }
  0x7c   :  { %v178_v14 = vpop.permute.xlu2 %177  }
  0x7f   :  { %v38_v12 = vpop.permute.xlu0 %37   ;;  %v66_v13 = vpop.permute.xlu1 %65  }
  0x80   :  { %40 = vst.msk [vmem:[#allocation0] sm:$0x7] %vm39_vm4, %v38_v12   ;;  %vm263_vm4 = vcmask 244952  }
  0x81   :  { %54 = vst.msk [vmem:[#allocation0] sm:$0x7] %vm53_vm5, %v52_v10   ;;  %vm277_vm5 = vcmask 220352  }
  0x82   :  { %68 = vst.msk [vmem:[#allocation0] sm:$0x7] %vm67_vm6, %v66_v13   ;;  %vm291_vm6 = vcmask 195752  }
  0x83   :  { %82 = vst.msk [vmem:[#allocation0] sm:$0x7] %vm81_vm7, %v80_v7   ;;  %vm305_vm7 = vcmask 171152  }
  0x84   :  { %96 = vst.msk [vmem:[#allocation0] sm:$0x7] %vm95_vm8, %v94_v8   ;;  %v220_v17 = vpop.permute.xlu2 %219   ;;  %vm319_vm8 = vcmask 146552  }
  0x87   :  { %v108_v15 = vpop.permute.xlu0 %107   ;;  %v122_v16 = vpop.permute.xlu1 %121  }
  0x88   :  { %110 = vst.msk [vmem:[#allocation0] sm:$0x7] %vm109_vm9, %v108_v15   ;;  %vm333_vm9 = vcmask 121952  }
  0x89   :  { %124 = vst.msk [vmem:[#allocation0] sm:$0x7] %vm123_vm10, %v122_v16   ;;  %vm347_vm10 = vcmask 97352  }
  0x8a   :  { %138 = vst.msk [vmem:[#allocation0] sm:$0x7] %vm137_vm11, %v136_v11   ;;  %vm361_vm11 = vcmask 72752  }
  0x8c   :  { %v262_v20 = vpop.permute.xlu2 %261  }
  0x8f   :  { %v150_v18 = vpop.permute.xlu0 %149   ;;  %v164_v19 = vpop.permute.xlu1 %163  }
  0x90   :  { %152 = vst.msk [vmem:[#allocation0] sm:$0x7] %vm151_vm12, %v150_v18   ;;  %vm375_vm12 = vcmask 48152  }
  0x91   :  { %166 = vst.msk [vmem:[#allocation0] sm:$0x7] %vm165_vm13, %v164_v19  }
  0x92   :  { %180 = vst.msk [vmem:[#allocation0] sm:$0x7] %vm179_vm14, %v178_v14  }
  0x94   :  { %v304_v23 = vpop.permute.xlu2 %303  }
  0x97   :  { %v192_v21 = vpop.permute.xlu0 %191   ;;  %v206_v22 = vpop.permute.xlu1 %205  }
  0x98   :  { %194 = vst.msk [vmem:[#allocation0] sm:$0x7] %vm193_vm15, %v192_v21  }
  0x99   :  { %208 = vst.msk [vmem:[#allocation0] sm:$0x7] %vm207_vm0, %v206_v22  }
  0x9a   :  { %222 = vst.msk [vmem:[#allocation0] sm:$0x7] %vm221_vm1, %v220_v17  }
  0x9c   :  { %v346_v26 = vpop.permute.xlu2 %345  }
  0x9f   :  { %v234_v24 = vpop.permute.xlu0 %233   ;;  %v248_v25 = vpop.permute.xlu1 %247  }
  0xa0   :  { %236 = vst.msk [vmem:[#allocation0] sm:$0x7] %vm235_vm2, %v234_v24  }
  0xa1   :  { %250 = vst.msk [vmem:[#allocation0] sm:$0x7] %vm249_vm3, %v248_v25  }
  0xa2   :  { %264 = vst.msk [vmem:[#allocation0] sm:$0x7] %vm263_vm4, %v262_v20  }
  0xa7   :  { %v276_v27 = vpop.permute.xlu0 %275   ;;  %v290_v28 = vpop.permute.xlu1 %289  }
  0xa8   :  { %278 = vst.msk [vmem:[#allocation0] sm:$0x7] %vm277_vm5, %v276_v27  }
  0xa9   :  { %292 = vst.msk [vmem:[#allocation0] sm:$0x7] %vm291_vm6, %v290_v28  }
  0xaa   :  { %306 = vst.msk [vmem:[#allocation0] sm:$0x7] %vm305_vm7, %v304_v23  }
  0xaf   :  { %v318_v29 = vpop.permute.xlu0 %317   ;;  %v332_v30 = vpop.permute.xlu1 %331  }
  0xb0   :  { %320 = vst.msk [vmem:[#allocation0] sm:$0x7] %vm319_vm8, %v318_v29  }
  0xb1   :  { %334 = vst.msk [vmem:[#allocation0] sm:$0x7] %vm333_vm9, %v332_v30  }
  0xb2   :  { %348 = vst.msk [vmem:[#allocation0] sm:$0x7] %vm347_vm10, %v346_v26  }
  0xb7   :  { %v360_v31 = vpop.permute.xlu0 %359   ;;  %v374_v32 = vpop.permute.xlu1 %373  }
  0xb8   :  { %362 = vst.msk [vmem:[#allocation0] sm:$0x7] %vm361_vm11, %v360_v31  }
  0xb9   :  { %376 = vst.msk [vmem:[#allocation0] sm:$0x7] %vm375_vm12, %v374_v32  }
  0xc0   :  { %v379_v33 = vld [vmem:[#allocation0] sm:$0xf] }
  0xc1   :  { %382 = vst [vmem:[%s826_s1] sm:$0xf] %v379_v33 }

// kernel: learnt_neighbourhood_sampling.2
= control target key start
LH: loop header
LB: loop body
LE: loop exit
PB: predicated region body
PF: predicated region fallthrough
CT: control target
= control target key end

     0   :  { %s1737_s18 = smov 0   ;;  %s1739_s19 = smov 0   ;;  %s2261_s0 = inlined_call_operand.vmem [shape: f32[2,1024,8], index: 0, kind: input, shape index: {}]   ;;  %s2262_s1 = inlined_call_operand.vmem [shape: f32[2,1024,3], index: 1, kind: input, shape index: {}]   ;;  %s2263_s2 = inlined_call_operand.vmem [shape: f32[8,81], index: 2, kind: input, shape index: {}]   ;;  %s2264_s3 = inlined_call_operand.vmem [shape: f32[3,81], index: 3, kind: input, shape index: {}]   ;;  %s2265_s4 = inlined_call_operand.vmem [shape: f32[1,81], index: 4, kind: input, shape index: {}]   ;;  %s2266_s5 = inlined_call_operand.vmem [shape: f32[2,1024,81], index: 5, kind: output, shape index: {}]  }
   0x1   :  { %s1741_s20 = smov 0   ;;  %s1743_s21 = smov 0  }
   0x2   :  { %s1745_s22 = smov 0  }
   0x3 LB: > { %s24_s23 = sadd.s32 1, %s1697_s20  ;;  %s27_s24 = sadd.s32 1, %s1701_s21  ;;  %s1705_s22 = sphi %s1745_s22, %s15_s22   ;;  %s1701_s21 = sphi %s1743_s21, %s2270_s21   ;;  %s1697_s20 = sphi %s1741_s20, %s2269_s20   ;;  %s1693_s19 = sphi %s1739_s19, %s2268_s19   ;;  %s1689_s18 = sphi %s1737_s18, %s2267_s18  }
   0x4   : > { %p25_p0 = scmp.ge.s32.totalorder %s24_s23, 2  ;;  %p1483_p1 = scmp.ge.s32.totalorder %s1705_s22, 1 }
   0x5   : > { %p225_p2 = scmp.lt.s32.totalorder %s1705_s22, 5 }
   0x6   : > { %s2272_s23 = smov (%p25_p0, %s24_s23), 0  ;;  %s2274_s24 = smov (!%p25_p0, %s27_s24), %s1701_s21 }
   0x7   : > { %p226_p3 = pnand %p1483_p1, %p225_p2  ;;  %p29_p4 = scmp.ge.s32.totalorder %s2274_s24, 2 }
   0x8   : > { %s1484_s29 = sshll.u32 (!%p226_p3), %s1689_s18, 6  ;;  %p271_p5 = scmp.lt.s32.totalorder (!%p226_p3), %s1693_s19, 1 }
   0x9   : > { %s2276_s24 = smov (%p29_p4, %s2274_s24), 0  ;;  %229 = sbr.rel (%p226_p3) target bundleno = 407 (0x197), region = 40 }
   0xa   : > { %p273_p6 = scmp.lt.s32.totalorder (!%p226_p3), %s1484_s29, 127 }
   0xe   : > { %v429_v0 = vld [vmem:[%s2264_s3] sm:$0x7]  ;;  %vm623_vm0 = vcmask 1042432   ;;  %s2278_s19 = smov (!%p271_p5, %s1693_s19), 1  ;;  %s2280_s29 = smov (!%p273_p6, %s1484_s29), 127  ;;  %vm430_vm1 = vcmask 23552  }
   0xf   : > { %v364_v1 = vld [vmem:[%s2263_s2] sm:$0xff]  ;;  %1624 = vmatpush.msk.msra.mxu2 %vm623_vm0, %v429_v0  ;;  %1493 = vmatpush.msk.msra.mxu0 %vm623_vm0, %v429_v0  ;;  %s1485_s30 = sshll.u32 %s2278_s19, 7  ;;  %vm836_vm2 = vcmask 64512   ;;  %vm1306_vm3 = vcmask 662528  }
  0x10   : > { %1625 = vmatpush.msra.mxu3 %v364_v1  ;;  %1044 = vmatpush.msra.mxu1 %v364_v1  ;;  %s276_s6 = sadd.s32 %s1485_s30, %s2280_s29 }
  0x11   : > { %s1773_s7 = sshll.u32 %s276_s6, 3 }
  0x12   : > { %s1779_s10 = scalar_lea.vmem %s2262_s1, %s1773_s7  ;;  %s1786_s13 = scalar_lea.vmem %s2261_s0, %s1773_s7 }
  0x13   : > { %v397_v2 = vld [vmem:[%s1779_s10 + $0x100] sm:$0xff]  ;;  %v398_v6 = vld [vmem:[%s1779_s10 + $0x108] sm:$0xff]  ;;  %v399_v10 = vld [vmem:[%s1779_s10 + $0x110] sm:$0xff]  ;;  %s1928_s18 = scalar_lea.vmem %s2266_s5, %s1773_s7 }
  0x14   : > { %v365_v3 = vld [vmem:[%s1779_s10] sm:$0xff]  ;;  %1526 = vmatmul.msk.f32.vlgmr.msra.gmra.mxu2 %vm430_vm1, %v397_v2  ;;  %v366_v7 = vld [vmem:[%s1779_s10 + $0x8] sm:$0xff]  ;;  %v367_v11 = vld [vmem:[%s1779_s10 + $0x10] sm:$0xff] }
  0x15   : > { %v332_v4 = vld [vmem:[%s1786_s13 + $0x100] sm:$0xff]  ;;  %1494 = vmatmul.msk.f32.vlgmr.msra.gmra.mxu0 %vm430_vm1, %v365_v3  ;;  %v333_v8 = vld [vmem:[%s1786_s13 + $0x108] sm:$0xff]  ;;  %v334_v12 = vld [vmem:[%s1786_s13 + $0x110] sm:$0xff] }
  0x16   : > { %v300_v5 = vld [vmem:[%s1786_s13] sm:$0xff]  ;;  %1590 = vmatmul.msk.f32.vlgmr.msra.gmra.mxu3 %vm836_vm2, %v332_v4  ;;  %v301_v9 = vld [vmem:[%s1786_s13 + $0x8] sm:$0xff]  ;;  %v302_v13 = vld [vmem:[%s1786_s13 + $0x10] sm:$0xff] }
  0x17   : > { %1558 = vmatmul.msk.f32.vlgmr.msra.gmra.mxu1 %vm836_vm2, %v300_v5  ;;  %v400_v14 = vld [vmem:[%s1779_s10 + $0x118] sm:$0xff]  ;;  %v401_v18 = vld [vmem:[%s1779_s10 + $0x120] sm:$0xff]  ;;  %v402_v22 = vld [vmem:[%s1779_s10 + $0x128] sm:$0xff] }
  0x18   : > { %v368_v15 = vld [vmem:[%s1779_s10 + $0x18] sm:$0xff]  ;;  %v369_v19 = vld [vmem:[%s1779_s10 + $0x20] sm:$0xff]  ;;  %v370_v23 = vld [vmem:[%s1779_s10 + $0x28] sm:$0xff] }
  0x19   : > { %v335_v16 = vld [vmem:[%s1786_s13 + $0x118] sm:$0xff]  ;;  %v336_v20 = vld [vmem:[%s1786_s13 + $0x120] sm:$0xff]  ;;  %v337_v24 = vld [vmem:[%s1786_s13 + $0x128] sm:$0xff] }
  0x1a   : > { %v303_v17 = vld [vmem:[%s1786_s13 + $0x18] sm:$0xff]  ;;  %v304_v21 = vld [vmem:[%s1786_s13 + $0x20] sm:$0xff]  ;;  %v305_v25 = vld [vmem:[%s1786_s13 + $0x28] sm:$0xff] }
  0x1b   : > { %v403_v26 = vld [vmem:[%s1779_s10 + $0x130] sm:$0xff]  ;;  %v404_v30 = vld [vmem:[%s1779_s10 + $0x138] sm:$0xff]  ;;  %v405_v34 = vld [vmem:[%s1779_s10 + $0x140] sm:$0xff] }
  0x1c   : > { %1527 = vmatmul.msk.f32.gmra.mxu2 %vm430_vm1, %v398_v6  ;;  %v371_v27 = vld [vmem:[%s1779_s10 + $0x30] sm:$0xff]  ;;  %v372_v31 = vld [vmem:[%s1779_s10 + $0x38] sm:$0xff]  ;;  %v373_v35 = vld [vmem:[%s1779_s10 + $0x40] sm:$0xff] }
  0x1d   : > { %1495 = vmatmul.msk.f32.gmra.mxu0 %vm430_vm1, %v366_v7  ;;  %v338_v28 = vld [vmem:[%s1786_s13 + $0x130] sm:$0xff]  ;;  %v339_v32 = vld [vmem:[%s1786_s13 + $0x138] sm:$0xff]  ;;  %v340_v36 = vld [vmem:[%s1786_s13 + $0x140] sm:$0xff] }
  0x1e   : > { %1591 = vmatmul.msk.f32.gmra.mxu3 %vm836_vm2, %v333_v8  ;;  %v306_v29 = vld [vmem:[%s1786_s13 + $0x30] sm:$0xff]  ;;  %v307_v33 = vld [vmem:[%s1786_s13 + $0x38] sm:$0xff]  ;;  %v308_v37 = vld [vmem:[%s1786_s13 + $0x40] sm:$0xff] }
  0x1f   : > { %1559 = vmatmul.msk.f32.gmra.mxu1 %vm836_vm2, %v301_v9  ;;  %v406_v38 = vld [vmem:[%s1779_s10 + $0x148] sm:$0xff]  ;;  %v407_v42 = vld [vmem:[%s1779_s10 + $0x150] sm:$0xff]  ;;  %v408_v46 = vld [vmem:[%s1779_s10 + $0x158] sm:$0xff] }
  0x20   : > { %v374_v39 = vld [vmem:[%s1779_s10 + $0x48] sm:$0xff]  ;;  %v375_v43 = vld [vmem:[%s1779_s10 + $0x50] sm:$0xff]  ;;  %v376_v47 = vld [vmem:[%s1779_s10 + $0x58] sm:$0xff] }
  0x21   : > { %v341_v40 = vld [vmem:[%s1786_s13 + $0x148] sm:$0xff]  ;;  %v342_v44 = vld [vmem:[%s1786_s13 + $0x150] sm:$0xff]  ;;  %v343_v48 = vld [vmem:[%s1786_s13 + $0x158] sm:$0xff] }
  0x22   : > { %v309_v41 = vld [vmem:[%s1786_s13 + $0x48] sm:$0xff]  ;;  %v310_v45 = vld [vmem:[%s1786_s13 + $0x50] sm:$0xff]  ;;  %v311_v49 = vld [vmem:[%s1786_s13 + $0x58] sm:$0xff] }
  0x23   : > { %v409_v50 = vld [vmem:[%s1779_s10 + $0x160] sm:$0xff]  ;;  %v410_v54 = vld [vmem:[%s1779_s10 + $0x168] sm:$0xff]  ;;  %v411_v58 = vld [vmem:[%s1779_s10 + $0x170] sm:$0xff] }
  0x24   : > { %1528 = vmatmul.msk.f32.gmra.mxu2 %vm430_vm1, %v399_v10  ;;  %v377_v51 = vld [vmem:[%s1779_s10 + $0x60] sm:$0xff]  ;;  %v378_v55 = vld [vmem:[%s1779_s10 + $0x68] sm:$0xff]  ;;  %v379_v59 = vld [vmem:[%s1779_s10 + $0x70] sm:$0xff] }
  0x25   : > { %1496 = vmatmul.msk.f32.gmra.mxu0 %vm430_vm1, %v367_v11  ;;  %v344_v52 = vld [vmem:[%s1786_s13 + $0x160] sm:$0xff]  ;;  %v345_v56 = vld [vmem:[%s1786_s13 + $0x168] sm:$0xff]  ;;  %v346_v60 = vld [vmem:[%s1786_s13 + $0x170] sm:$0xff] }
  0x26   : > { %1592 = vmatmul.msk.f32.gmra.mxu3 %vm836_vm2, %v334_v12  ;;  %v312_v53 = vld [vmem:[%s1786_s13 + $0x60] sm:$0xff]  ;;  %v313_v57 = vld [vmem:[%s1786_s13 + $0x68] sm:$0xff]  ;;  %v314_v61 = vld [vmem:[%s1786_s13 + $0x70] sm:$0xff] }
  0x27   : > { %1560 = vmatmul.msk.f32.gmra.mxu1 %vm836_vm2, %v302_v13  ;;  %v412_v62 = vld [vmem:[%s1779_s10 + $0x178] sm:$0xff]  ;;  %v413_v2 = vld [vmem:[%s1779_s10 + $0x180] sm:$0xff] }
  0x28   : > { %v380_v63 = vld [vmem:[%s1779_s10 + $0x78] sm:$0xff]  ;;  %v1919_v4 = vld [vmem:[%s2265_s4] ss:$0 sm:$0xff] }
  0x29   : > { %v347_v0 = vld [vmem:[%s1786_s13 + $0x178] sm:$0xff]  ;;  %v381_v5 = vld [vmem:[%s1779_s10 + $0x80] sm:$0xff] }
  0x2a   : > { %v315_v1 = vld [vmem:[%s1786_s13 + $0x78] sm:$0xff]  ;;  %v348_v6 = vld [vmem:[%s1786_s13 + $0x180] sm:$0xff] }
  0x2b   : > { %v316_v8 = vld [vmem:[%s1786_s13 + $0x80] sm:$0xff] }
  0x2c   : > { %1529 = vmatmul.msk.f32.gmra.mxu2 %vm430_vm1, %v400_v14  ;;  %v414_v14 = vld [vmem:[%s1779_s10 + $0x188] sm:$0xff] }
  0x2d   : > { %1497 = vmatmul.msk.f32.gmra.mxu0 %vm430_vm1, %v368_v15 }
  0x2e   : > { %1593 = vmatmul.msk.f32.gmra.mxu3 %vm836_vm2, %v335_v16  ;;  %v382_v16 = vld [vmem:[%s1779_s10 + $0x88] sm:$0xff] }
  0x2f   : > { %1561 = vmatmul.msk.f32.gmra.mxu1 %vm836_vm2, %v303_v17  ;;  %v349_v17 = vld [vmem:[%s1786_s13 + $0x188] sm:$0xff] }
  0x34   : > { %1530 = vmatmul.msk.f32.gmra.mxu2 %vm430_vm1, %v401_v18 }
  0x35   : > { %1498 = vmatmul.msk.f32.gmra.mxu0 %vm430_vm1, %v369_v19  ;;  %v317_v19 = vld [vmem:[%s1786_s13 + $0x88] sm:$0xff] }
  0x36   : > { %1594 = vmatmul.msk.f32.gmra.mxu3 %vm836_vm2, %v336_v20 }
  0x37   : > { %1562 = vmatmul.msk.f32.gmra.mxu1 %vm836_vm2, %v304_v21 }
  0x3c   : > { %1531 = vmatmul.msk.f32.gmra.mxu2 %vm430_vm1, %v402_v22 }
  0x3d   : > { %1499 = vmatmul.msk.f32.gmra.mxu0 %vm430_vm1, %v370_v23 }
  0x3e   : > { %1595 = vmatmul.msk.f32.gmra.mxu3 %vm836_vm2, %v337_v24 }
  0x3f   : > { %1563 = vmatmul.msk.f32.gmra.mxu1 %vm836_vm2, %v305_v25 }
  0x44   : > { %1532 = vmatmul.msk.f32.gmra.mxu2 %vm430_vm1, %v403_v26  ;;  %v415_v26 = vld [vmem:[%s1779_s10 + $0x190] sm:$0xff] }
  0x45   : > { %1500 = vmatmul.msk.f32.gmra.mxu0 %vm430_vm1, %v371_v27 }
  0x46   : > { %1596 = vmatmul.msk.f32.gmra.mxu3 %vm836_vm2, %v338_v28  ;;  %v383_v28 = vld [vmem:[%s1779_s10 + $0x90] sm:$0xff] }
  0x47   : > { %1564 = vmatmul.msk.f32.gmra.mxu1 %vm836_vm2, %v306_v29  ;;  %v350_v29 = vld [vmem:[%s1786_s13 + $0x190] sm:$0xff] }
  0x4c   : > { %1533 = vmatmul.msk.f32.gmra.mxu2 %vm430_vm1, %v404_v30 }
  0x4d   : > { %1501 = vmatmul.msk.f32.gmra.mxu0 %vm430_vm1, %v372_v31  ;;  %v318_v31 = vld [vmem:[%s1786_s13 + $0x90] sm:$0xff] }
  0x4e   : > { %1597 = vmatmul.msk.f32.gmra.mxu3 %vm836_vm2, %v339_v32 }
  0x4f   : > { %1565 = vmatmul.msk.f32.gmra.mxu1 %vm836_vm2, %v307_v33 }
  0x54   : > { %1534 = vmatmul.msk.f32.gmra.mxu2 %vm430_vm1, %v405_v34 }
  0x55   : > { %1502 = vmatmul.msk.f32.gmra.mxu0 %vm430_vm1, %v373_v35 }
  0x56   : > { %1598 = vmatmul.msk.f32.gmra.mxu3 %vm836_vm2, %v340_v36 }
  0x57   : > { %1566 = vmatmul.msk.f32.gmra.mxu1 %vm836_vm2, %v308_v37 }
  0x5c   : > { %1535 = vmatmul.msk.f32.gmra.mxu2 %vm430_vm1, %v406_v38  ;;  %v416_v38 = vld [vmem:[%s1779_s10 + $0x198] sm:$0xff] }
  0x5d   : > { %1503 = vmatmul.msk.f32.gmra.mxu0 %vm430_vm1, %v374_v39 }
  0x5e   : > { %1599 = vmatmul.msk.f32.gmra.mxu3 %vm836_vm2, %v341_v40  ;;  %v384_v40 = vld [vmem:[%s1779_s10 + $0x98] sm:$0xff] }
  0x5f   : > { %1567 = vmatmul.msk.f32.gmra.mxu1 %vm836_vm2, %v309_v41  ;;  %v351_v41 = vld [vmem:[%s1786_s13 + $0x198] sm:$0xff] }
  0x64   : > { %1536 = vmatmul.msk.f32.gmra.mxu2 %vm430_vm1, %v407_v42 }
  0x65   : > { %1504 = vmatmul.msk.f32.gmra.mxu0 %vm430_vm1, %v375_v43  ;;  %v319_v43 = vld [vmem:[%s1786_s13 + $0x98] sm:$0xff] }
  0x66   : > { %1600 = vmatmul.msk.f32.gmra.mxu3 %vm836_vm2, %v342_v44 }
  0x67   : > { %1568 = vmatmul.msk.f32.gmra.mxu1 %vm836_vm2, %v310_v45 }
  0x6c   : > { %1537 = vmatmul.msk.f32.gmra.mxu2 %vm430_vm1, %v408_v46 }
  0x6d   : > { %1505 = vmatmul.msk.f32.gmra.mxu0 %vm430_vm1, %v376_v47 }
  0x6e   : > { %1601 = vmatmul.msk.f32.gmra.mxu3 %vm836_vm2, %v343_v48 }
  0x6f   : > { %1569 = vmatmul.msk.f32.gmra.mxu1 %vm836_vm2, %v311_v49 }
  0x74   : > { %1538 = vmatmul.msk.f32.gmra.mxu2 %vm430_vm1, %v409_v50  ;;  %v417_v50 = vld [vmem:[%s1779_s10 + $0x1a0] sm:$0xff] }
  0x75   : > { %1506 = vmatmul.msk.f32.gmra.mxu0 %vm430_vm1, %v377_v51 }
  0x76   : > { %1602 = vmatmul.msk.f32.gmra.mxu3 %vm836_vm2, %v344_v52  ;;  %v385_v52 = vld [vmem:[%s1779_s10 + $0xa0] sm:$0xff] }
  0x77   : > { %1570 = vmatmul.msk.f32.gmra.mxu1 %vm836_vm2, %v312_v53  ;;  %v352_v53 = vld [vmem:[%s1786_s13 + $0x1a0] sm:$0xff] }
  0x7c   : > { %1539 = vmatmul.msk.f32.gmra.mxu2 %vm430_vm1, %v410_v54 }
  0x7d   : > { %1507 = vmatmul.msk.f32.gmra.mxu0 %vm430_vm1, %v378_v55  ;;  %v320_v55 = vld [vmem:[%s1786_s13 + $0xa0] sm:$0xff] }
  0x7e   : > { %1603 = vmatmul.msk.f32.gmra.mxu3 %vm836_vm2, %v345_v56 }
  0x7f   : > { %1571 = vmatmul.msk.f32.gmra.mxu1 %vm836_vm2, %v313_v57 }
  0x84   : > { %1540 = vmatmul.msk.f32.gmra.mxu2 %vm430_vm1, %v411_v58 }
  0x85   : > { %1508 = vmatmul.msk.f32.gmra.mxu0 %vm430_vm1, %v379_v59 }
  0x86   : > { %1604 = vmatmul.msk.f32.gmra.mxu3 %vm836_vm2, %v346_v60 }
  0x87   : > { %1572 = vmatmul.msk.f32.gmra.mxu1 %vm836_vm2, %v314_v61 }
  0x8c   : > { %1541 = vmatmul.msk.f32.gmra.mxu2 %vm430_vm1, %v412_v62  ;;  %v418_v62 = vld [vmem:[%s1779_s10 + $0x1a8] sm:$0xff] }
  0x8d   : > { %1509 = vmatmul.msk.f32.gmra.mxu0 %vm430_vm1, %v380_v63 }
  0x8e   : > { %1605 = vmatmul.msk.f32.gmra.mxu3 %vm836_vm2, %v347_v0  ;;  %v386_v0 = vld [vmem:[%s1779_s10 + $0xa8] sm:$0xff] }
  0x8f   : > { %1573 = vmatmul.msk.f32.gmra.mxu1 %vm836_vm2, %v315_v1  ;;  %v353_v1 = vld [vmem:[%s1786_s13 + $0x1a8] sm:$0xff] }
  0x92   : > { %v644_v3 = vpop.f32.mrf.mxu0 }
  0x94   : > { %v1046_v7 = vpop.f32.mrf.mxu1  ;;  %1542 = vmatmul.msk.f32.gmra.mxu2 %vm430_vm1, %v413_v2 }
  0x95   : > { %v1047_v9 = vadd.f32 %v1046_v7, %v644_v3  ;;  %1510 = vmatmul.msk.f32.gmra.mxu0 %vm430_vm1, %v381_v5  ;;  %v321_v3 = vld [vmem:[%s1786_s13 + $0xa8] sm:$0xff] }
  0x96   : > { %1606 = vmatmul.msk.f32.gmra.mxu3 %vm836_vm2, %v348_v6 }
  0x97   : > { %v1242_v10 = vadd.f32 %v1919_v4, %v1047_v9  ;;  %1574 = vmatmul.msk.f32.gmra.mxu1 %vm836_vm2, %v316_v8  ;;  %v740_v11 = vpop.f32.mrf.mxu2 }
  0x99   : > { %1307 = vst.msk [vmem:[%s1928_s18] sm:$0xff] %vm1306_vm3, %v1242_v10  ;;  %v1142_v12 = vpop.f32.mrf.mxu3 }
  0x9a   : > { %v1143_v13 = vadd.f32 %v1142_v12, %v740_v11  ;;  %v647_v15 = vpop.f32.mrf.mxu0  ;;  %v419_v11 = vld [vmem:[%s1779_s10 + $0x1b0] sm:$0xff] }
  0x9c   : > { %v1049_v18 = vpop.f32.mrf.mxu1  ;;  %v1274_v20 = vadd.f32 %v1919_v4, %v1143_v13  ;;  %1543 = vmatmul.msk.f32.gmra.mxu2 %vm430_vm1, %v414_v14  ;;  %v387_v13 = vld [vmem:[%s1779_s10 + $0xb0] sm:$0xff] }
  0x9d   : > { %v1050_v21 = vadd.f32 %v1049_v18, %v647_v15  ;;  %1511 = vmatmul.msk.f32.gmra.mxu0 %vm430_vm1, %v382_v16  ;;  %v354_v14 = vld [vmem:[%s1786_s13 + $0x1b0] sm:$0xff] }
  0x9e   : > { %1339 = vst.msk [vmem:[%s1928_s18 + $0x100] sm:$0xff] %vm1306_vm3, %v1274_v20  ;;  %1607 = vmatmul.msk.f32.gmra.mxu3 %vm836_vm2, %v349_v17  ;;  %v322_v16 = vld [vmem:[%s1786_s13 + $0xb0] sm:$0xff] }
  0x9f   : > { %v1243_v22 = vadd.f32 %v1919_v4, %v1050_v21  ;;  %1575 = vmatmul.msk.f32.gmra.mxu1 %vm836_vm2, %v317_v19  ;;  %v743_v23 = vpop.f32.mrf.mxu2 }
  0xa1   : > { %1308 = vst.msk [vmem:[%s1928_s18 + $0x8] sm:$0xff] %vm1306_vm3, %v1243_v22  ;;  %v1145_v24 = vpop.f32.mrf.mxu3 }
  0xa2   : > { %v1146_v25 = vadd.f32 %v1145_v24, %v743_v23  ;;  %v650_v27 = vpop.f32.mrf.mxu0  ;;  %v420_v23 = vld [vmem:[%s1779_s10 + $0x1b8] sm:$0xff] }
  0xa4   : > { %v1052_v30 = vpop.f32.mrf.mxu1  ;;  %v1275_v32 = vadd.f32 %v1919_v4, %v1146_v25  ;;  %1544 = vmatmul.msk.f32.gmra.mxu2 %vm430_vm1, %v415_v26  ;;  %v388_v25 = vld [vmem:[%s1779_s10 + $0xb8] sm:$0xff] }
  0xa5   : > { %v1053_v33 = vadd.f32 %v1052_v30, %v650_v27  ;;  %1512 = vmatmul.msk.f32.gmra.mxu0 %vm430_vm1, %v383_v28  ;;  %v355_v26 = vld [vmem:[%s1786_s13 + $0x1b8] sm:$0xff] }
  0xa6   : > { %1340 = vst.msk [vmem:[%s1928_s18 + $0x108] sm:$0xff] %vm1306_vm3, %v1275_v32  ;;  %1608 = vmatmul.msk.f32.gmra.mxu3 %vm836_vm2, %v350_v29  ;;  %v323_v28 = vld [vmem:[%s1786_s13 + $0xb8] sm:$0xff] }
  0xa7   : > { %v1244_v34 = vadd.f32 %v1919_v4, %v1053_v33  ;;  %1576 = vmatmul.msk.f32.gmra.mxu1 %vm836_vm2, %v318_v31  ;;  %v746_v35 = vpop.f32.mrf.mxu2 }
  0xa9   : > { %1309 = vst.msk [vmem:[%s1928_s18 + $0x10] sm:$0xff] %vm1306_vm3, %v1244_v34  ;;  %v1148_v36 = vpop.f32.mrf.mxu3 }
  0xaa   : > { %v1149_v37 = vadd.f32 %v1148_v36, %v746_v35  ;;  %v653_v39 = vpop.f32.mrf.mxu0  ;;  %v421_v35 = vld [vmem:[%s1779_s10 + $0x1c0] sm:$0xff] }
  0xac   : > { %v1055_v42 = vpop.f32.mrf.mxu1  ;;  %v1276_v44 = vadd.f32 %v1919_v4, %v1149_v37  ;;  %1545 = vmatmul.msk.f32.gmra.mxu2 %vm430_vm1, %v416_v38  ;;  %v389_v37 = vld [vmem:[%s1779_s10 + $0xc0] sm:$0xff] }
  0xad   : > { %v1056_v45 = vadd.f32 %v1055_v42, %v653_v39  ;;  %1513 = vmatmul.msk.f32.gmra.mxu0 %vm430_vm1, %v384_v40  ;;  %v356_v38 = vld [vmem:[%s1786_s13 + $0x1c0] sm:$0xff] }
  0xae   : > { %1341 = vst.msk [vmem:[%s1928_s18 + $0x110] sm:$0xff] %vm1306_vm3, %v1276_v44  ;;  %1609 = vmatmul.msk.f32.gmra.mxu3 %vm836_vm2, %v351_v41  ;;  %v324_v40 = vld [vmem:[%s1786_s13 + $0xc0] sm:$0xff] }
  0xaf   : > { %v1245_v46 = vadd.f32 %v1919_v4, %v1056_v45  ;;  %1577 = vmatmul.msk.f32.gmra.mxu1 %vm836_vm2, %v319_v43  ;;  %v749_v47 = vpop.f32.mrf.mxu2 }
  0xb1   : > { %1310 = vst.msk [vmem:[%s1928_s18 + $0x18] sm:$0xff] %vm1306_vm3, %v1245_v46  ;;  %v1151_v48 = vpop.f32.mrf.mxu3 }
  0xb2   : > { %v1152_v49 = vadd.f32 %v1151_v48, %v749_v47  ;;  %v656_v51 = vpop.f32.mrf.mxu0  ;;  %v422_v47 = vld [vmem:[%s1779_s10 + $0x1c8] sm:$0xff] }
  0xb4   : > { %v1058_v54 = vpop.f32.mrf.mxu1  ;;  %v1277_v56 = vadd.f32 %v1919_v4, %v1152_v49  ;;  %1546 = vmatmul.msk.f32.gmra.mxu2 %vm430_vm1, %v417_v50  ;;  %v390_v49 = vld [vmem:[%s1779_s10 + $0xc8] sm:$0xff] }
  0xb5   : > { %v1059_v57 = vadd.f32 %v1058_v54, %v656_v51  ;;  %1514 = vmatmul.msk.f32.gmra.mxu0 %vm430_vm1, %v385_v52  ;;  %v357_v50 = vld [vmem:[%s1786_s13 + $0x1c8] sm:$0xff] }
  0xb6   : > { %1342 = vst.msk [vmem:[%s1928_s18 + $0x118] sm:$0xff] %vm1306_vm3, %v1277_v56  ;;  %1610 = vmatmul.msk.f32.gmra.mxu3 %vm836_vm2, %v352_v53  ;;  %v325_v52 = vld [vmem:[%s1786_s13 + $0xc8] sm:$0xff] }
  0xb7   : > { %v1246_v58 = vadd.f32 %v1919_v4, %v1059_v57  ;;  %1578 = vmatmul.msk.f32.gmra.mxu1 %vm836_vm2, %v320_v55  ;;  %v752_v59 = vpop.f32.mrf.mxu2 }
  0xb9   : > { %1311 = vst.msk [vmem:[%s1928_s18 + $0x20] sm:$0xff] %vm1306_vm3, %v1246_v58  ;;  %v1154_v60 = vpop.f32.mrf.mxu3 }
  0xba   : > { %v1155_v61 = vadd.f32 %v1154_v60, %v752_v59  ;;  %v659_v63 = vpop.f32.mrf.mxu0  ;;  %v423_v59 = vld [vmem:[%s1779_s10 + $0x1d0] sm:$0xff] }
  0xbc   : > { %v1061_v2 = vpop.f32.mrf.mxu1  ;;  %v1278_v5 = vadd.f32 %v1919_v4, %v1155_v61  ;;  %1547 = vmatmul.msk.f32.gmra.mxu2 %vm430_vm1, %v418_v62  ;;  %v391_v61 = vld [vmem:[%s1779_s10 + $0xd0] sm:$0xff] }
  0xbd   : > { %v1062_v6 = vadd.f32 %v1061_v2, %v659_v63  ;;  %1515 = vmatmul.msk.f32.gmra.mxu0 %vm430_vm1, %v386_v0  ;;  %v358_v62 = vld [vmem:[%s1786_s13 + $0x1d0] sm:$0xff] }
  0xbe   : > { %1343 = vst.msk [vmem:[%s1928_s18 + $0x120] sm:$0xff] %vm1306_vm3, %v1278_v5  ;;  %1611 = vmatmul.msk.f32.gmra.mxu3 %vm836_vm2, %v353_v1  ;;  %v326_v0 = vld [vmem:[%s1786_s13 + $0xd0] sm:$0xff] }
  0xbf   : > { %v1247_v7 = vadd.f32 %v1919_v4, %v1062_v6  ;;  %1579 = vmatmul.msk.f32.gmra.mxu1 %vm836_vm2, %v321_v3  ;;  %v755_v8 = vpop.f32.mrf.mxu2 }
  0xc1   : > { %1312 = vst.msk [vmem:[%s1928_s18 + $0x28] sm:$0xff] %vm1306_vm3, %v1247_v7  ;;  %v1157_v9 = vpop.f32.mrf.mxu3 }
  0xc2   : > { %v1158_v10 = vadd.f32 %v1157_v9, %v755_v8  ;;  %v662_v12 = vpop.f32.mrf.mxu0  ;;  %v424_v8 = vld [vmem:[%s1779_s10 + $0x1d8] sm:$0xff] }
  0xc4   : > { %v1064_v15 = vpop.f32.mrf.mxu1  ;;  %v1279_v17 = vadd.f32 %v1919_v4, %v1158_v10  ;;  %1548 = vmatmul.msk.f32.gmra.mxu2 %vm430_vm1, %v419_v11  ;;  %v392_v10 = vld [vmem:[%s1779_s10 + $0xd8] sm:$0xff] }
  0xc5   : > { %v1065_v18 = vadd.f32 %v1064_v15, %v662_v12  ;;  %1516 = vmatmul.msk.f32.gmra.mxu0 %vm430_vm1, %v387_v13  ;;  %v359_v11 = vld [vmem:[%s1786_s13 + $0x1d8] sm:$0xff] }
  0xc6   : > { %1344 = vst.msk [vmem:[%s1928_s18 + $0x128] sm:$0xff] %vm1306_vm3, %v1279_v17  ;;  %1612 = vmatmul.msk.f32.gmra.mxu3 %vm836_vm2, %v354_v14  ;;  %v327_v13 = vld [vmem:[%s1786_s13 + $0xd8] sm:$0xff] }
  0xc7   : > { %v1248_v19 = vadd.f32 %v1919_v4, %v1065_v18  ;;  %1580 = vmatmul.msk.f32.gmra.mxu1 %vm836_vm2, %v322_v16  ;;  %v758_v20 = vpop.f32.mrf.mxu2 }
  0xc9   : > { %1313 = vst.msk [vmem:[%s1928_s18 + $0x30] sm:$0xff] %vm1306_vm3, %v1248_v19  ;;  %v1160_v21 = vpop.f32.mrf.mxu3 }
  0xca   : > { %v1161_v22 = vadd.f32 %v1160_v21, %v758_v20  ;;  %v665_v24 = vpop.f32.mrf.mxu0  ;;  %v425_v20 = vld [vmem:[%s1779_s10 + $0x1e0] sm:$0xff] }
  0xcc   : > { %v1067_v27 = vpop.f32.mrf.mxu1  ;;  %v1280_v29 = vadd.f32 %v1919_v4, %v1161_v22  ;;  %1549 = vmatmul.msk.f32.gmra.mxu2 %vm430_vm1, %v420_v23  ;;  %v393_v22 = vld [vmem:[%s1779_s10 + $0xe0] sm:$0xff] }
  0xcd   : > { %v1068_v30 = vadd.f32 %v1067_v27, %v665_v24  ;;  %1517 = vmatmul.msk.f32.gmra.mxu0 %vm430_vm1, %v388_v25  ;;  %v360_v23 = vld [vmem:[%s1786_s13 + $0x1e0] sm:$0xff] }
  0xce   : > { %1345 = vst.msk [vmem:[%s1928_s18 + $0x130] sm:$0xff] %vm1306_vm3, %v1280_v29  ;;  %1613 = vmatmul.msk.f32.gmra.mxu3 %vm836_vm2, %v355_v26  ;;  %v328_v25 = vld [vmem:[%s1786_s13 + $0xe0] sm:$0xff] }
  0xcf   : > { %v1249_v31 = vadd.f32 %v1919_v4, %v1068_v30  ;;  %1581 = vmatmul.msk.f32.gmra.mxu1 %vm836_vm2, %v323_v28  ;;  %v761_v32 = vpop.f32.mrf.mxu2 }
  0xd1   : > { %1314 = vst.msk [vmem:[%s1928_s18 + $0x38] sm:$0xff] %vm1306_vm3, %v1249_v31  ;;  %v1163_v33 = vpop.f32.mrf.mxu3 }
  0xd2   : > { %v1164_v34 = vadd.f32 %v1163_v33, %v761_v32  ;;  %v668_v36 = vpop.f32.mrf.mxu0  ;;  %v426_v32 = vld [vmem:[%s1779_s10 + $0x1e8] sm:$0xff] }
  0xd4   : > { %v1070_v39 = vpop.f32.mrf.mxu1  ;;  %v1281_v41 = vadd.f32 %v1919_v4, %v1164_v34  ;;  %1550 = vmatmul.msk.f32.gmra.mxu2 %vm430_vm1, %v421_v35  ;;  %v394_v34 = vld [vmem:[%s1779_s10 + $0xe8] sm:$0xff] }
  0xd5   : > { %v1071_v42 = vadd.f32 %v1070_v39, %v668_v36  ;;  %1518 = vmatmul.msk.f32.gmra.mxu0 %vm430_vm1, %v389_v37  ;;  %v361_v35 = vld [vmem:[%s1786_s13 + $0x1e8] sm:$0xff] }
  0xd6   : > { %1346 = vst.msk [vmem:[%s1928_s18 + $0x138] sm:$0xff] %vm1306_vm3, %v1281_v41  ;;  %1614 = vmatmul.msk.f32.gmra.mxu3 %vm836_vm2, %v356_v38  ;;  %v329_v37 = vld [vmem:[%s1786_s13 + $0xe8] sm:$0xff] }
  0xd7   : > { %v1250_v43 = vadd.f32 %v1919_v4, %v1071_v42  ;;  %1582 = vmatmul.msk.f32.gmra.mxu1 %vm836_vm2, %v324_v40  ;;  %v764_v44 = vpop.f32.mrf.mxu2 }
  0xd9   : > { %1315 = vst.msk [vmem:[%s1928_s18 + $0x40] sm:$0xff] %vm1306_vm3, %v1250_v43  ;;  %v1166_v45 = vpop.f32.mrf.mxu3 }
  0xda   : > { %v1167_v46 = vadd.f32 %v1166_v45, %v764_v44  ;;  %v671_v48 = vpop.f32.mrf.mxu0  ;;  %v427_v44 = vld [vmem:[%s1779_s10 + $0x1f0] sm:$0xff] }
  0xdc   : > { %v1073_v51 = vpop.f32.mrf.mxu1  ;;  %v1282_v53 = vadd.f32 %v1919_v4, %v1167_v46  ;;  %1551 = vmatmul.msk.f32.gmra.mxu2 %vm430_vm1, %v422_v47  ;;  %v395_v46 = vld [vmem:[%s1779_s10 + $0xf0] sm:$0xff] }
  0xdd   : > { %v1074_v54 = vadd.f32 %v1073_v51, %v671_v48  ;;  %1519 = vmatmul.msk.f32.gmra.mxu0 %vm430_vm1, %v390_v49  ;;  %v362_v47 = vld [vmem:[%s1786_s13 + $0x1f0] sm:$0xff] }
  0xde   : > { %1347 = vst.msk [vmem:[%s1928_s18 + $0x140] sm:$0xff] %vm1306_vm3, %v1282_v53  ;;  %1615 = vmatmul.msk.f32.gmra.mxu3 %vm836_vm2, %v357_v50  ;;  %v330_v49 = vld [vmem:[%s1786_s13 + $0xf0] sm:$0xff] }
  0xdf   : > { %v1251_v55 = vadd.f32 %v1919_v4, %v1074_v54  ;;  %1583 = vmatmul.msk.f32.gmra.mxu1 %vm836_vm2, %v325_v52  ;;  %v767_v56 = vpop.f32.mrf.mxu2 }
  0xe1   : > { %1316 = vst.msk [vmem:[%s1928_s18 + $0x48] sm:$0xff] %vm1306_vm3, %v1251_v55  ;;  %v1169_v57 = vpop.f32.mrf.mxu3 }
  0xe2   : > { %v1170_v58 = vadd.f32 %v1169_v57, %v767_v56  ;;  %v674_v60 = vpop.f32.mrf.mxu0  ;;  %v428_v56 = vld [vmem:[%s1779_s10 + $0x1f8] sm:$0xff] }
  0xe4   : > { %v1076_v63 = vpop.f32.mrf.mxu1  ;;  %v1283_v1 = vadd.f32 %v1919_v4, %v1170_v58  ;;  %1552 = vmatmul.msk.f32.gmra.mxu2 %vm430_vm1, %v423_v59  ;;  %v396_v58 = vld [vmem:[%s1779_s10 + $0xf8] sm:$0xff] }
  0xe5   : > { %v1077_v2 = vadd.f32 %v1076_v63, %v674_v60  ;;  %1520 = vmatmul.msk.f32.gmra.mxu0 %vm430_vm1, %v391_v61  ;;  %v363_v59 = vld [vmem:[%s1786_s13 + $0x1f8] sm:$0xff] }
  0xe6   : > { %1348 = vst.msk [vmem:[%s1928_s18 + $0x148] sm:$0xff] %vm1306_vm3, %v1283_v1  ;;  %1616 = vmatmul.msk.f32.gmra.mxu3 %vm836_vm2, %v358_v62  ;;  %v331_v61 = vld [vmem:[%s1786_s13 + $0xf8] sm:$0xff] }
  0xe7   : > { %v1252_v3 = vadd.f32 %v1919_v4, %v1077_v2  ;;  %1584 = vmatmul.msk.f32.gmra.mxu1 %vm836_vm2, %v326_v0  ;;  %v770_v5 = vpop.f32.mrf.mxu2 }
  0xe9   : > { %1317 = vst.msk [vmem:[%s1928_s18 + $0x50] sm:$0xff] %vm1306_vm3, %v1252_v3  ;;  %v1172_v6 = vpop.f32.mrf.mxu3 }
  0xea   : > { %v1173_v7 = vadd.f32 %v1172_v6, %v770_v5  ;;  %v677_v9 = vpop.f32.mrf.mxu0 }
  0xec   : > { %v1079_v12 = vpop.f32.mrf.mxu1  ;;  %v1284_v14 = vadd.f32 %v1919_v4, %v1173_v7  ;;  %1553 = vmatmul.msk.f32.gmra.mxu2 %vm430_vm1, %v424_v8 }
  0xed   : > { %v1080_v15 = vadd.f32 %v1079_v12, %v677_v9  ;;  %1521 = vmatmul.msk.f32.gmra.mxu0 %vm430_vm1, %v392_v10 }
  0xee   : > { %1349 = vst.msk [vmem:[%s1928_s18 + $0x150] sm:$0xff] %vm1306_vm3, %v1284_v14  ;;  %1617 = vmatmul.msk.f32.gmra.mxu3 %vm836_vm2, %v359_v11 }
  0xef   : > { %v1253_v16 = vadd.f32 %v1919_v4, %v1080_v15  ;;  %1585 = vmatmul.msk.f32.gmra.mxu1 %vm836_vm2, %v327_v13  ;;  %v773_v17 = vpop.f32.mrf.mxu2 }
  0xf1   : > { %1318 = vst.msk [vmem:[%s1928_s18 + $0x58] sm:$0xff] %vm1306_vm3, %v1253_v16  ;;  %v1175_v18 = vpop.f32.mrf.mxu3 }
  0xf2   : > { %v1176_v19 = vadd.f32 %v1175_v18, %v773_v17  ;;  %v680_v21 = vpop.f32.mrf.mxu0 }
  0xf4   : > { %v1082_v24 = vpop.f32.mrf.mxu1  ;;  %v1285_v26 = vadd.f32 %v1919_v4, %v1176_v19  ;;  %1554 = vmatmul.msk.f32.gmra.mxu2 %vm430_vm1, %v425_v20 }
  0xf5   : > { %v1083_v27 = vadd.f32 %v1082_v24, %v680_v21  ;;  %1522 = vmatmul.msk.f32.gmra.mxu0 %vm430_vm1, %v393_v22 }
  0xf6   : > { %1350 = vst.msk [vmem:[%s1928_s18 + $0x158] sm:$0xff] %vm1306_vm3, %v1285_v26  ;;  %1618 = vmatmul.msk.f32.gmra.mxu3 %vm836_vm2, %v360_v23 }
  0xf7   : > { %v1254_v28 = vadd.f32 %v1919_v4, %v1083_v27  ;;  %1586 = vmatmul.msk.f32.gmra.mxu1 %vm836_vm2, %v328_v25  ;;  %v776_v29 = vpop.f32.mrf.mxu2 }
  0xf9   : > { %1319 = vst.msk [vmem:[%s1928_s18 + $0x60] sm:$0xff] %vm1306_vm3, %v1254_v28  ;;  %v1178_v30 = vpop.f32.mrf.mxu3 }
  0xfa   : > { %v1179_v31 = vadd.f32 %v1178_v30, %v776_v29  ;;  %v683_v33 = vpop.f32.mrf.mxu0 }
  0xfc   : > { %v1085_v36 = vpop.f32.mrf.mxu1  ;;  %v1286_v38 = vadd.f32 %v1919_v4, %v1179_v31  ;;  %1555 = vmatmul.msk.f32.gmra.mxu2 %vm430_vm1, %v426_v32 }
  0xfd   : > { %v1086_v39 = vadd.f32 %v1085_v36, %v683_v33  ;;  %1523 = vmatmul.msk.f32.gmra.mxu0 %vm430_vm1, %v394_v34 }
  0xfe   : > { %1351 = vst.msk [vmem:[%s1928_s18 + $0x160] sm:$0xff] %vm1306_vm3, %v1286_v38  ;;  %1619 = vmatmul.msk.f32.gmra.mxu3 %vm836_vm2, %v361_v35 }
  0xff   : > { %v1255_v40 = vadd.f32 %v1919_v4, %v1086_v39  ;;  %1587 = vmatmul.msk.f32.gmra.mxu1 %vm836_vm2, %v329_v37  ;;  %v779_v41 = vpop.f32.mrf.mxu2 }
 0x101   : > { %1320 = vst.msk [vmem:[%s1928_s18 + $0x68] sm:$0xff] %vm1306_vm3, %v1255_v40  ;;  %v1181_v42 = vpop.f32.mrf.mxu3 }
 0x102   : > { %v1182_v43 = vadd.f32 %v1181_v42, %v779_v41  ;;  %v686_v45 = vpop.f32.mrf.mxu0 }
 0x104   : > { %v1088_v48 = vpop.f32.mrf.mxu1  ;;  %v1287_v50 = vadd.f32 %v1919_v4, %v1182_v43  ;;  %1556 = vmatmul.msk.f32.gmra.mxu2 %vm430_vm1, %v427_v44 }
 0x105   : > { %v1089_v51 = vadd.f32 %v1088_v48, %v686_v45  ;;  %1524 = vmatmul.msk.f32.gmra.mxu0 %vm430_vm1, %v395_v46 }
 0x106   : > { %1352 = vst.msk [vmem:[%s1928_s18 + $0x168] sm:$0xff] %vm1306_vm3, %v1287_v50  ;;  %1620 = vmatmul.msk.f32.gmra.mxu3 %vm836_vm2, %v362_v47 }
 0x107   : > { %v1256_v52 = vadd.f32 %v1919_v4, %v1089_v51  ;;  %1588 = vmatmul.msk.f32.gmra.mxu1 %vm836_vm2, %v330_v49  ;;  %v782_v53 = vpop.f32.mrf.mxu2 }
 0x109   : > { %1321 = vst.msk [vmem:[%s1928_s18 + $0x70] sm:$0xff] %vm1306_vm3, %v1256_v52  ;;  %v1184_v54 = vpop.f32.mrf.mxu3 }
 0x10a   : > { %v1185_v55 = vadd.f32 %v1184_v54, %v782_v53  ;;  %v689_v57 = vpop.f32.mrf.mxu0 }
 0x10c   : > { %v1091_v60 = vpop.f32.mrf.mxu1  ;;  %v1288_v62 = vadd.f32 %v1919_v4, %v1185_v55  ;;  %1557 = vmatmul.msk.f32.gmra.mxu2 %vm430_vm1, %v428_v56 }
 0x10d   : > { %v1092_v63 = vadd.f32 %v1091_v60, %v689_v57  ;;  %1525 = vmatmul.msk.f32.gmra.mxu0 %vm430_vm1, %v396_v58 }
 0x10e   : > { %1353 = vst.msk [vmem:[%s1928_s18 + $0x170] sm:$0xff] %vm1306_vm3, %v1288_v62  ;;  %1621 = vmatmul.msk.f32.gmra.mxu3 %vm836_vm2, %v363_v59 }
 0x10f   : > { %v1257_v0 = vadd.f32 %v1919_v4, %v1092_v63  ;;  %1589 = vmatmul.msk.f32.gmra.mxu1 %vm836_vm2, %v331_v61  ;;  %v785_v1 = vpop.f32.mrf.mxu2 }
 0x111   : > { %1322 = vst.msk [vmem:[%s1928_s18 + $0x78] sm:$0xff] %vm1306_vm3, %v1257_v0  ;;  %v1187_v2 = vpop.f32.mrf.mxu3 }
 0x112   : > { %v1188_v3 = vadd.f32 %v1187_v2, %v785_v1  ;;  %v692_v5 = vpop.f32.mrf.mxu0 }
 0x114   : > { %v1094_v6 = vpop.f32.mrf.mxu1  ;;  %v1289_v7 = vadd.f32 %v1919_v4, %v1188_v3 }
 0x115   : > { %v1095_v8 = vadd.f32 %v1094_v6, %v692_v5 }
 0x116   : > { %1354 = vst.msk [vmem:[%s1928_s18 + $0x178] sm:$0xff] %vm1306_vm3, %v1289_v7 }
 0x117   : > { %v1258_v9 = vadd.f32 %v1919_v4, %v1095_v8  ;;  %v788_v10 = vpop.f32.mrf.mxu2 }
 0x119   : > { %1323 = vst.msk [vmem:[%s1928_s18 + $0x80] sm:$0xff] %vm1306_vm3, %v1258_v9  ;;  %v1190_v11 = vpop.f32.mrf.mxu3 }
 0x11a   : > { %v1191_v12 = vadd.f32 %v1190_v11, %v788_v10  ;;  %v695_v13 = vpop.f32.mrf.mxu0 }
 0x11c   : > { %v1097_v14 = vpop.f32.mrf.mxu1  ;;  %v1290_v15 = vadd.f32 %v1919_v4, %v1191_v12 }
 0x11d   : > { %v1098_v16 = vadd.f32 %v1097_v14, %v695_v13 }
 0x11e   : > { %1355 = vst.msk [vmem:[%s1928_s18 + $0x180] sm:$0xff] %vm1306_vm3, %v1290_v15 }
 0x11f   : > { %v1259_v17 = vadd.f32 %v1919_v4, %v1098_v16  ;;  %v791_v18 = vpop.f32.mrf.mxu2 }
 0x121   : > { %1324 = vst.msk [vmem:[%s1928_s18 + $0x88] sm:$0xff] %vm1306_vm3, %v1259_v17  ;;  %v1193_v19 = vpop.f32.mrf.mxu3 }
 0x122   : > { %v1194_v20 = vadd.f32 %v1193_v19, %v791_v18  ;;  %v698_v21 = vpop.f32.mrf.mxu0 }
 0x124   : > { %v1100_v22 = vpop.f32.mrf.mxu1  ;;  %v1291_v23 = vadd.f32 %v1919_v4, %v1194_v20 }
 0x125   : > { %v1101_v24 = vadd.f32 %v1100_v22, %v698_v21 }
 0x126   : > { %1356 = vst.msk [vmem:[%s1928_s18 + $0x188] sm:$0xff] %vm1306_vm3, %v1291_v23 }
 0x127   : > { %v1260_v25 = vadd.f32 %v1919_v4, %v1101_v24  ;;  %v794_v26 = vpop.f32.mrf.mxu2 }
 0x129   : > { %1325 = vst.msk [vmem:[%s1928_s18 + $0x90] sm:$0xff] %vm1306_vm3, %v1260_v25  ;;  %v1196_v27 = vpop.f32.mrf.mxu3 }
 0x12a   : > { %v1197_v28 = vadd.f32 %v1196_v27, %v794_v26  ;;  %v701_v29 = vpop.f32.mrf.mxu0 }
 0x12c   : > { %v1103_v30 = vpop.f32.mrf.mxu1  ;;  %v1292_v31 = vadd.f32 %v1919_v4, %v1197_v28 }
 0x12d   : > { %v1104_v32 = vadd.f32 %v1103_v30, %v701_v29 }
 0x12e   : > { %1357 = vst.msk [vmem:[%s1928_s18 + $0x190] sm:$0xff] %vm1306_vm3, %v1292_v31 }
 0x12f   : > { %v1261_v33 = vadd.f32 %v1919_v4, %v1104_v32  ;;  %v797_v34 = vpop.f32.mrf.mxu2 }
 0x131   : > { %1326 = vst.msk [vmem:[%s1928_s18 + $0x98] sm:$0xff] %vm1306_vm3, %v1261_v33  ;;  %v1199_v35 = vpop.f32.mrf.mxu3 }
 0x132   : > { %v1200_v36 = vadd.f32 %v1199_v35, %v797_v34  ;;  %v704_v37 = vpop.f32.mrf.mxu0 }
 0x134   : > { %v1106_v38 = vpop.f32.mrf.mxu1  ;;  %v1293_v39 = vadd.f32 %v1919_v4, %v1200_v36 }
 0x135   : > { %v1107_v40 = vadd.f32 %v1106_v38, %v704_v37 }
 0x136   : > { %1358 = vst.msk [vmem:[%s1928_s18 + $0x198] sm:$0xff] %vm1306_vm3, %v1293_v39 }
 0x137   : > { %v1262_v41 = vadd.f32 %v1919_v4, %v1107_v40  ;;  %v800_v42 = vpop.f32.mrf.mxu2 }
 0x139   : > { %1327 = vst.msk [vmem:[%s1928_s18 + $0xa0] sm:$0xff] %vm1306_vm3, %v1262_v41  ;;  %v1202_v43 = vpop.f32.mrf.mxu3 }
 0x13a   : > { %v1203_v44 = vadd.f32 %v1202_v43, %v800_v42  ;;  %v707_v45 = vpop.f32.mrf.mxu0 }
 0x13c   : > { %v1109_v46 = vpop.f32.mrf.mxu1  ;;  %v1294_v47 = vadd.f32 %v1919_v4, %v1203_v44 }
 0x13d   : > { %v1110_v48 = vadd.f32 %v1109_v46, %v707_v45 }
 0x13e   : > { %1359 = vst.msk [vmem:[%s1928_s18 + $0x1a0] sm:$0xff] %vm1306_vm3, %v1294_v47 }
 0x13f   : > { %v1263_v49 = vadd.f32 %v1919_v4, %v1110_v48  ;;  %v803_v50 = vpop.f32.mrf.mxu2 }
 0x141   : > { %1328 = vst.msk [vmem:[%s1928_s18 + $0xa8] sm:$0xff] %vm1306_vm3, %v1263_v49  ;;  %v1205_v51 = vpop.f32.mrf.mxu3 }
 0x142   : > { %v1206_v52 = vadd.f32 %v1205_v51, %v803_v50  ;;  %v710_v53 = vpop.f32.mrf.mxu0 }
 0x144   : > { %v1112_v54 = vpop.f32.mrf.mxu1  ;;  %v1295_v55 = vadd.f32 %v1919_v4, %v1206_v52 }
 0x145   : > { %v1113_v56 = vadd.f32 %v1112_v54, %v710_v53 }
 0x146   : > { %1360 = vst.msk [vmem:[%s1928_s18 + $0x1a8] sm:$0xff] %vm1306_vm3, %v1295_v55 }
 0x147   : > { %v1264_v57 = vadd.f32 %v1919_v4, %v1113_v56  ;;  %v806_v58 = vpop.f32.mrf.mxu2 }
 0x149   : > { %1329 = vst.msk [vmem:[%s1928_s18 + $0xb0] sm:$0xff] %vm1306_vm3, %v1264_v57  ;;  %v1208_v59 = vpop.f32.mrf.mxu3 }
 0x14a   : > { %v1209_v60 = vadd.f32 %v1208_v59, %v806_v58  ;;  %v713_v61 = vpop.f32.mrf.mxu0 }
 0x14c   : > { %v1115_v62 = vpop.f32.mrf.mxu1  ;;  %v1296_v63 = vadd.f32 %v1919_v4, %v1209_v60 }
 0x14d   : > { %v1116_v0 = vadd.f32 %v1115_v62, %v713_v61 }
 0x14e   : > { %1361 = vst.msk [vmem:[%s1928_s18 + $0x1b0] sm:$0xff] %vm1306_vm3, %v1296_v63 }
 0x14f   : > { %v1265_v1 = vadd.f32 %v1919_v4, %v1116_v0  ;;  %v809_v2 = vpop.f32.mrf.mxu2 }
 0x151   : > { %1330 = vst.msk [vmem:[%s1928_s18 + $0xb8] sm:$0xff] %vm1306_vm3, %v1265_v1  ;;  %v1211_v3 = vpop.f32.mrf.mxu3 }
 0x152   : > { %v1212_v5 = vadd.f32 %v1211_v3, %v809_v2  ;;  %v716_v6 = vpop.f32.mrf.mxu0 }
 0x154   : > { %v1118_v7 = vpop.f32.mrf.mxu1  ;;  %v1297_v8 = vadd.f32 %v1919_v4, %v1212_v5 }
 0x155   : > { %v1119_v9 = vadd.f32 %v1118_v7, %v716_v6 }
 0x156   : > { %1362 = vst.msk [vmem:[%s1928_s18 + $0x1b8] sm:$0xff] %vm1306_vm3, %v1297_v8 }
 0x157   : > { %v1266_v10 = vadd.f32 %v1919_v4, %v1119_v9  ;;  %v812_v11 = vpop.f32.mrf.mxu2 }
 0x159   : > { %1331 = vst.msk [vmem:[%s1928_s18 + $0xc0] sm:$0xff] %vm1306_vm3, %v1266_v10  ;;  %v1214_v12 = vpop.f32.mrf.mxu3 }
 0x15a   : > { %v1215_v13 = vadd.f32 %v1214_v12, %v812_v11  ;;  %v719_v14 = vpop.f32.mrf.mxu0 }
 0x15c   : > { %v1121_v15 = vpop.f32.mrf.mxu1  ;;  %v1298_v16 = vadd.f32 %v1919_v4, %v1215_v13 }
 0x15d   : > { %v1122_v17 = vadd.f32 %v1121_v15, %v719_v14 }
 0x15e   : > { %1363 = vst.msk [vmem:[%s1928_s18 + $0x1c0] sm:$0xff] %vm1306_vm3, %v1298_v16 }
 0x15f   : > { %v1267_v18 = vadd.f32 %v1919_v4, %v1122_v17  ;;  %v815_v19 = vpop.f32.mrf.mxu2 }
 0x161   : > { %1332 = vst.msk [vmem:[%s1928_s18 + $0xc8] sm:$0xff] %vm1306_vm3, %v1267_v18  ;;  %v1217_v20 = vpop.f32.mrf.mxu3 }
 0x162   : > { %v1218_v21 = vadd.f32 %v1217_v20, %v815_v19  ;;  %v722_v22 = vpop.f32.mrf.mxu0 }
 0x164   : > { %v1124_v23 = vpop.f32.mrf.mxu1  ;;  %v1299_v24 = vadd.f32 %v1919_v4, %v1218_v21 }
 0x165   : > { %v1125_v25 = vadd.f32 %v1124_v23, %v722_v22 }
 0x166   : > { %1364 = vst.msk [vmem:[%s1928_s18 + $0x1c8] sm:$0xff] %vm1306_vm3, %v1299_v24 }
 0x167   : > { %v1268_v26 = vadd.f32 %v1919_v4, %v1125_v25  ;;  %v818_v27 = vpop.f32.mrf.mxu2 }
 0x169   : > { %1333 = vst.msk [vmem:[%s1928_s18 + $0xd0] sm:$0xff] %vm1306_vm3, %v1268_v26  ;;  %v1220_v28 = vpop.f32.mrf.mxu3 }
 0x16a   : > { %v1221_v29 = vadd.f32 %v1220_v28, %v818_v27  ;;  %v725_v30 = vpop.f32.mrf.mxu0 }
 0x16c   : > { %v1127_v31 = vpop.f32.mrf.mxu1  ;;  %v1300_v32 = vadd.f32 %v1919_v4, %v1221_v29 }
 0x16d   : > { %v1128_v33 = vadd.f32 %v1127_v31, %v725_v30 }
 0x16e   : > { %1365 = vst.msk [vmem:[%s1928_s18 + $0x1d0] sm:$0xff] %vm1306_vm3, %v1300_v32 }
 0x16f   : > { %v1269_v34 = vadd.f32 %v1919_v4, %v1128_v33  ;;  %v821_v35 = vpop.f32.mrf.mxu2 }
 0x171   : > { %1334 = vst.msk [vmem:[%s1928_s18 + $0xd8] sm:$0xff] %vm1306_vm3, %v1269_v34  ;;  %v1223_v36 = vpop.f32.mrf.mxu3 }
 0x172   : > { %v1224_v37 = vadd.f32 %v1223_v36, %v821_v35  ;;  %v728_v38 = vpop.f32.mrf.mxu0 }
 0x174   : > { %v1130_v39 = vpop.f32.mrf.mxu1  ;;  %v1301_v40 = vadd.f32 %v1919_v4, %v1224_v37 }
 0x175   : > { %v1131_v41 = vadd.f32 %v1130_v39, %v728_v38 }
 0x176   : > { %1366 = vst.msk [vmem:[%s1928_s18 + $0x1d8] sm:$0xff] %vm1306_vm3, %v1301_v40 }
 0x177   : > { %v1270_v42 = vadd.f32 %v1919_v4, %v1131_v41  ;;  %v824_v43 = vpop.f32.mrf.mxu2 }
 0x179   : > { %1335 = vst.msk [vmem:[%s1928_s18 + $0xe0] sm:$0xff] %vm1306_vm3, %v1270_v42  ;;  %v1226_v44 = vpop.f32.mrf.mxu3 }
 0x17a   : > { %v1227_v45 = vadd.f32 %v1226_v44, %v824_v43  ;;  %v731_v46 = vpop.f32.mrf.mxu0 }
 0x17c   : > { %v1133_v47 = vpop.f32.mrf.mxu1  ;;  %v1302_v48 = vadd.f32 %v1919_v4, %v1227_v45 }
 0x17d   : > { %v1134_v49 = vadd.f32 %v1133_v47, %v731_v46 }
 0x17e   : > { %1367 = vst.msk [vmem:[%s1928_s18 + $0x1e0] sm:$0xff] %vm1306_vm3, %v1302_v48 }
 0x17f   : > { %v1271_v50 = vadd.f32 %v1919_v4, %v1134_v49  ;;  %v827_v51 = vpop.f32.mrf.mxu2 }
 0x181   : > { %1336 = vst.msk [vmem:[%s1928_s18 + $0xe8] sm:$0xff] %vm1306_vm3, %v1271_v50  ;;  %v1229_v52 = vpop.f32.mrf.mxu3 }
 0x182   : > { %v1230_v53 = vadd.f32 %v1229_v52, %v827_v51  ;;  %v734_v54 = vpop.f32.mrf.mxu0 }
 0x184   : > { %v1136_v55 = vpop.f32.mrf.mxu1  ;;  %v1303_v56 = vadd.f32 %v1919_v4, %v1230_v53 }
 0x185   : > { %v1137_v57 = vadd.f32 %v1136_v55, %v734_v54 }
 0x186   : > { %1368 = vst.msk [vmem:[%s1928_s18 + $0x1e8] sm:$0xff] %vm1306_vm3, %v1303_v56 }
 0x187   : > { %v1272_v58 = vadd.f32 %v1919_v4, %v1137_v57  ;;  %v830_v59 = vpop.f32.mrf.mxu2 }
 0x189   : > { %1337 = vst.msk [vmem:[%s1928_s18 + $0xf0] sm:$0xff] %vm1306_vm3, %v1272_v58  ;;  %v1232_v60 = vpop.f32.mrf.mxu3 }
 0x18a   : > { %v1233_v61 = vadd.f32 %v1232_v60, %v830_v59  ;;  %v737_v62 = vpop.f32.mrf.mxu0 }
 0x18c   : > { %v1139_v63 = vpop.f32.mrf.mxu1  ;;  %v1304_v0 = vadd.f32 %v1919_v4, %v1233_v61 }
 0x18d   : > { %v1140_v1 = vadd.f32 %v1139_v63, %v737_v62 }
 0x18e   : > { %1369 = vst.msk [vmem:[%s1928_s18 + $0x1f0] sm:$0xff] %vm1306_vm3, %v1304_v0 }
 0x18f   : > { %v1273_v2 = vadd.f32 %v1919_v4, %v1140_v1  ;;  %v833_v3 = vpop.f32.mrf.mxu2 }
 0x191   : > { %1338 = vst.msk [vmem:[%s1928_s18 + $0xf8] sm:$0xff] %vm1306_vm3, %v1273_v2  ;;  %v1235_v5 = vpop.f32.mrf.mxu3 }
 0x192   : > { %v1236_v6 = vadd.f32 %v1235_v5, %v833_v3 }
 0x194   : > { %v1305_v7 = vadd.f32 %v1919_v4, %v1236_v6 }
 0x196   : > { %1370 = vst.msk [vmem:[%s1928_s18 + $0x1f8] sm:$0xff] %vm1306_vm3, %v1305_v7 }
 0x197 PF: > { %s15_s22 = sadd.s32 1, %s1705_s22   ;;  %s2267_s18 = smov %s1697_s20 }
 0x198   : > { %p12_p7 = scmp.ge.s32.totalorder %s15_s22, 6   ;;  %s2268_s19 = smov %s1701_s21 }
 0x199   : > { %s2269_s20 = smov %s2272_s23  ;;  %s2270_s21 = smov %s2276_s24 }
 0x19a   :  { %14 = sbr.rel (!%p12_p7) target bundleno = 3 (0x3), region = 73 }

// kernel: learnt_neighbourhood_sampling.3
= control target key start
LH: loop header
LB: loop body
LE: loop exit
PB: predicated region body
PF: predicated region fallthrough
CT: control target
= control target key end

     0   :  { %s2090_s18 = smov 0   ;;  %s2092_s19 = smov 0   ;;  %s2991_s0 = inlined_call_operand.vmem [shape: f32[2,1024,216], index: 0, kind: input, shape index: {}]   ;;  %s2992_s1 = inlined_call_operand.vmem [shape: f32[2,1024,81], index: 1, kind: input, shape index: {}]   ;;  %s2993_s2 = inlined_call_operand.vmem [shape: f32[216,8], index: 2, kind: input, shape index: {}]   ;;  %s2994_s3 = inlined_call_operand.vmem [shape: f32[81,8], index: 3, kind: input, shape index: {}]   ;;  %s2995_s4 = inlined_call_operand.vmem [shape: f32[1,8], index: 4, kind: input, shape index: {}]   ;;  %s2996_s5 = inlined_call_operand.vmem [shape: f32[2,1024,8], index: 5, kind: output, shape index: {}]  }
   0x1   :  { %s2094_s20 = smov 0   ;;  %s2096_s21 = smov 0  }
   0x2   :  { %s2098_s22 = smov 0  }
   0x3 LB: > { %s24_s23 = sadd.s32 1, %s2050_s20  ;;  %s27_s24 = sadd.s32 1, %s2054_s21  ;;  %s2058_s22 = sphi %s2098_s22, %s15_s22   ;;  %s2054_s21 = sphi %s2096_s21, %s3001_s21   ;;  %s2050_s20 = sphi %s2094_s20, %s3000_s20   ;;  %s2046_s19 = sphi %s2092_s19, %s2999_s19   ;;  %s2042_s18 = sphi %s2090_s18, %s2998_s18  }
   0x4   : > { %p25_p0 = scmp.ge.s32.totalorder %s24_s23, 2  ;;  %p1798_p1 = scmp.ge.s32.totalorder %s2058_s22, 1 }
   0x5   : > { %p226_p2 = scmp.lt.s32.totalorder %s2058_s22, 5 }
   0x6   : > { %s3003_s23 = smov (%p25_p0, %s24_s23), 0  ;;  %s3005_s24 = smov (!%p25_p0, %s27_s24), %s2054_s21 }
   0x7   : > { %p227_p3 = pnand %p1798_p1, %p226_p2  ;;  %p29_p4 = scmp.ge.s32.totalorder %s3005_s24, 2 }
   0x8   : > { %s1799_s6 = sshll.u32 (!%p227_p3), %s2042_s18, 6  ;;  %p273_p5 = scmp.lt.s32.totalorder (!%p227_p3), %s2046_s19, 1 }
   0x9   : > { %s3007_s24 = smov (%p29_p4, %s3005_s24), 0  ;;  %230 = sbr.rel (%p227_p3) target bundleno = 559 (0x22f), region = 40 }
   0xa   : > { %p2152_p6 = scmp.lt.s32.totalorder (!%p227_p3), %s1799_s6, 127 }
   0xe   : > { %v532_v0 = vld [vmem:[%s2994_s3 + $0x50] sm:$0x1]  ;;  %vm726_vm0 = vcmask 1040384   ;;  %v2130_v1 = vld [vmem:[%s2993_s2 + $0x78] sm:$0xff]  ;;  %v531_v3 = vld [vmem:[%s2994_s3 + $0x48] sm:$0xff]  ;;  %s3009_s19 = smov (!%p273_p5, %s2046_s19), 1 }
   0xf   : > { %v2135_v2 = vld [vmem:[%s2993_s2 + $0xd0] sm:$0xff]  ;;  %1809 = vmatpush.msk.msra.mxu0 %vm726_vm0, %v532_v0  ;;  %1940 = vmatpush.msk.msra.mxu3 %vm726_vm0, %v532_v0  ;;  %v2149_v5 = vld [vmem:[%s2993_s2 + $0xc8] sm:$0xff]  ;;  %v530_v6 = vld [vmem:[%s2994_s3 + $0x40] sm:$0xff]  ;;  %s3011_s6 = smov (!%p2152_p6, %s1799_s6), 127  ;;  %s1804_s16 = sshll.u32 %s3009_s19, 7  ;;  %vm533_vm1 = vcmask 662528  }
  0x10   : > { %v2144_v4 = vld [vmem:[%s2993_s2 + $0x70] sm:$0xff]  ;;  %1132 = vmatpush.msra.mxu1 %v2130_v1  ;;  %1346 = vmatpush.msra.mxu2 %v2135_v2  ;;  %v2164_v7 = vld [vmem:[%s2993_s2 + $0x68] sm:$0xff]  ;;  %v2169_v8 = vld [vmem:[%s2993_s2 + $0xc0] sm:$0xff]  ;;  %s1800_s27 = sshll.u32 %s3011_s6, 1  ;;  %s1801_s28 = sshll.u32 %s3009_s19, 8  ;;  %vm939_vm2 = vcmask 719872  }
  0x11   : > { %736 = vmatpush.msra.mxu0 %v531_v3  ;;  %1941 = vmatpush.msra.mxu3 %v531_v3  ;;  %v529_v9 = vld [vmem:[%s2994_s3 + $0x38] sm:$0xff]  ;;  %v2182_v10 = vld [vmem:[%s2993_s2 + $0x60] sm:$0xff]  ;;  %v528_v12 = vld [vmem:[%s2994_s3 + $0x30] sm:$0xff]  ;;  %s2242_s19 = sadd.s32 %s1804_s16, %s3011_s6  ;;  %s279_s13 = sadd.s32 %s1801_s28, %s1800_s27  ;;  %vm1618_vm3 = vcmask 64512  }
  0x12   : > { %1133 = vmatpush.msra.mxu1 %v2144_v4  ;;  %1347 = vmatpush.msra.mxu2 %v2149_v5  ;;  %v2187_v11 = vld [vmem:[%s2993_s2 + $0xb8] sm:$0xff]  ;;  %v2206_v14 = vld [vmem:[%s2993_s2 + $0xb0] sm:$0xff]  ;;  %v527_v15 = vld [vmem:[%s2994_s3 + $0x28] sm:$0xff]  ;;  %s1805_s25 = sshll.u32 %s2242_s19, 3  ;;  %s1802_s30 = sshll.u32 %s279_s13, 3 }
  0x13   : > { %737 = vmatpush.msra.mxu0 %v530_v6  ;;  %1942 = vmatpush.msra.mxu3 %v530_v6  ;;  %v2201_v13 = vld [vmem:[%s2993_s2 + $0x58] sm:$0xff]  ;;  %v2217_v16 = vld [vmem:[%s2993_s2 + $0x50] sm:$0xff]  ;;  %v2222_v17 = vld [vmem:[%s2993_s2 + $0xa8] sm:$0xff]  ;;  %s2295_s15 = scalar_lea.vmem %s2992_s1, %s1805_s25  ;;  %s2305_s26 = scalar_lea.vmem %s2991_s0, %s1802_s30 }
  0x14   : > { %1134 = vmatpush.msra.mxu1 %v2164_v7  ;;  %1348 = vmatpush.msra.mxu2 %v2169_v8  ;;  %v526_v18 = vld [vmem:[%s2994_s3 + $0x20] sm:$0xff]  ;;  %v2234_v19 = vld [vmem:[%s2993_s2 + $0x48] sm:$0xff]  ;;  %v525_v21 = vld [vmem:[%s2994_s3 + $0x18] sm:$0xff]  ;;  %s2488_s29 = scalar_lea.vmem %s2996_s5, %s1805_s25 }
  0x15   : > { %738 = vmatpush.msra.mxu0 %v529_v9  ;;  %1943 = vmatpush.msra.mxu3 %v529_v9  ;;  %v2239_v20 = vld [vmem:[%s2993_s2 + $0xa0] sm:$0xff]  ;;  %v2257_v23 = vld [vmem:[%s2993_s2 + $0x98] sm:$0xff]  ;;  %v524_v24 = vld [vmem:[%s2994_s3 + $0x10] sm:$0xff] }
  0x16   : > { %1135 = vmatpush.msra.mxu1 %v2182_v10  ;;  %1349 = vmatpush.msra.mxu2 %v2187_v11  ;;  %v2252_v22 = vld [vmem:[%s2993_s2 + $0x40] sm:$0xff]  ;;  %v2268_v25 = vld [vmem:[%s2993_s2 + $0x38] sm:$0xff]  ;;  %v2273_v26 = vld [vmem:[%s2993_s2 + $0x90] sm:$0xff] }
  0x17   : > { %739 = vmatpush.msra.mxu0 %v528_v12  ;;  %1944 = vmatpush.msra.mxu3 %v528_v12  ;;  %v523_v27 = vld [vmem:[%s2994_s3 + $0x8] sm:$0xff]  ;;  %v2283_v28 = vld [vmem:[%s2993_s2 + $0x30] sm:$0xff]  ;;  %v522_v30 = vld [vmem:[%s2994_s3] sm:$0xff] }
  0x18   : > { %1136 = vmatpush.msra.mxu1 %v2201_v13  ;;  %1350 = vmatpush.msra.mxu2 %v2206_v14  ;;  %v2288_v29 = vld [vmem:[%s2993_s2 + $0x88] sm:$0xff]  ;;  %v2313_v32 = vld [vmem:[%s2993_s2 + $0x80] sm:$0xff]  ;;  %v434_v37 = vld [vmem:[%s2993_s2 + $0x18] sm:$0xff] }
  0x19   : > { %740 = vmatpush.msra.mxu0 %v527_v15  ;;  %1945 = vmatpush.msra.mxu3 %v527_v15  ;;  %v436_v31 = vld [vmem:[%s2993_s2 + $0x28] sm:$0xff]  ;;  %v458_v33 = vld [vmem:[%s2295_s15] sm:$0xff]  ;;  %v433_v38 = vld [vmem:[%s2993_s2 + $0x10] sm:$0xff] }
  0x1a   : > { %1137 = vmatpush.msra.mxu1 %v2217_v16  ;;  %1351 = vmatpush.msra.mxu2 %v2222_v17  ;;  %v507_v34 = vld [vmem:[%s2295_s15 + $0x188] sm:$0xff]  ;;  %v435_v36 = vld [vmem:[%s2993_s2 + $0x20] sm:$0xff]  ;;  %v508_v41 = vld [vmem:[%s2295_s15 + $0x190] sm:$0xff] }
  0x1b   : > { %741 = vmatpush.msra.mxu0 %v526_v18  ;;  %1946 = vmatpush.msra.mxu3 %v526_v18  ;;  %v304_v35 = vld [vmem:[%s2305_s26 + $0x8] sm:$0xff]  ;;  %v306_v42 = vld [vmem:[%s2305_s26 + $0x18] sm:$0xff]  ;;  %v431_v43 = vld [vmem:[%s2993_s2] sm:$0xff] }
  0x1c   : > { %1138 = vmatpush.msra.mxu1 %v2234_v19  ;;  %1352 = vmatpush.msra.mxu2 %v2239_v20  ;;  %v432_v39 = vld [vmem:[%s2993_s2 + $0x8] sm:$0xff]  ;;  %v303_v44 = vld [vmem:[%s2305_s26] sm:$0xff]  ;;  %v460_v45 = vld [vmem:[%s2295_s15 + $0x10] sm:$0xff] }
  0x1d   : > { %742 = vmatpush.msra.mxu0 %v525_v21  ;;  %1947 = vmatpush.msra.mxu3 %v525_v21  ;;  %v459_v40 = vld [vmem:[%s2295_s15 + $0x8] sm:$0xff]  ;;  %v509_v46 = vld [vmem:[%s2295_s15 + $0x198] sm:$0xff]  ;;  %v305_v48 = vld [vmem:[%s2305_s26 + $0x10] sm:$0xff] }
  0x1e   : > { %1139 = vmatpush.msra.mxu1 %v2252_v22  ;;  %1353 = vmatpush.msra.mxu2 %v2257_v23  ;;  %v308_v47 = vld [vmem:[%s2305_s26 + $0x28] sm:$0xff]  ;;  %v461_v49 = vld [vmem:[%s2295_s15 + $0x18] sm:$0xff]  ;;  %v510_v50 = vld [vmem:[%s2295_s15 + $0x1a0] sm:$0xff] }
  0x1f   : > { %743 = vmatpush.msra.mxu0 %v524_v24  ;;  %1948 = vmatpush.msra.mxu3 %v524_v24  ;;  %v310_v51 = vld [vmem:[%s2305_s26 + $0x38] sm:$0xff]  ;;  %v307_v52 = vld [vmem:[%s2305_s26 + $0x20] sm:$0xff]  ;;  %v511_v54 = vld [vmem:[%s2295_s15 + $0x1a8] sm:$0xff] }
  0x20   : > { %1140 = vmatpush.msra.mxu1 %v2268_v25  ;;  %1354 = vmatpush.msra.mxu2 %v2273_v26  ;;  %v462_v53 = vld [vmem:[%s2295_s15 + $0x20] sm:$0xff]  ;;  %v312_v55 = vld [vmem:[%s2305_s26 + $0x48] sm:$0xff]  ;;  %v309_v56 = vld [vmem:[%s2305_s26 + $0x30] sm:$0xff] }
  0x21   : > { %744 = vmatpush.msra.mxu0 %v523_v27  ;;  %1949 = vmatpush.msra.mxu3 %v523_v27  ;;  %v463_v57 = vld [vmem:[%s2295_s15 + $0x28] sm:$0xff]  ;;  %v512_v58 = vld [vmem:[%s2295_s15 + $0x1b0] sm:$0xff]  ;;  %v314_v59 = vld [vmem:[%s2305_s26 + $0x58] sm:$0xff] }
  0x22   : > { %1141 = vmatpush.msra.mxu1 %v2283_v28  ;;  %1355 = vmatpush.msra.mxu2 %v2288_v29  ;;  %v311_v60 = vld [vmem:[%s2305_s26 + $0x40] sm:$0xff]  ;;  %v464_v61 = vld [vmem:[%s2295_s15 + $0x30] sm:$0xff]  ;;  %v513_v62 = vld [vmem:[%s2295_s15 + $0x1b8] sm:$0xff] }
  0x23   : > { %745 = vmatpush.msra.mxu0 %v522_v30  ;;  %1950 = vmatpush.msra.mxu3 %v522_v30  ;;  %v316_v63 = vld [vmem:[%s2305_s26 + $0x68] sm:$0xff]  ;;  %v313_v0 = vld [vmem:[%s2305_s26 + $0x50] sm:$0xff]  ;;  %v318_v3 = vld [vmem:[%s2305_s26 + $0x78] sm:$0xff] }
  0x24   : > { %1142 = vmatpush.msra.mxu1 %v436_v31  ;;  %1356 = vmatpush.msra.mxu2 %v2313_v32  ;;  %v515_v6 = vld [vmem:[%s2295_s15 + $0x1c8] sm:$0xff]  ;;  %v319_v12 = vld [vmem:[%s2305_s26 + $0x80] sm:$0xff]  ;;  %v325_v24 = vld [vmem:[%s2305_s26 + $0xb0] sm:$0xff] }
  0x25   : > { %1810 = vmatmul.msk.f32.vlgmr.msra.gmra.mxu0 %vm533_vm1, %v458_v33  ;;  %1859 = vmatmul.msk.f32.vlgmr.msra.gmra.mxu3 %vm533_vm1, %v507_v34  ;;  %v467_v9 = vld [vmem:[%s2295_s15 + $0x48] sm:$0xff]  ;;  %v518_v18 = vld [vmem:[%s2295_s15 + $0x1e0] sm:$0xff]  ;;  %v330_v27 = vld [vmem:[%s2305_s26 + $0xd8] sm:$0xff] }
  0x26   : > { %1874 = vmatmul.msk.f32.vlgmr.msra.gmra.mxu2 %vm939_vm2, %v304_v35  ;;  %1143 = vmatpush.msra.mxu1 %v435_v36  ;;  %v324_v15 = vld [vmem:[%s2305_s26 + $0xa8] sm:$0xff]  ;;  %v470_v21 = vld [vmem:[%s2295_s15 + $0x60] sm:$0xff]  ;;  %v521_v30 = vld [vmem:[%s2295_s15 + $0x1f8] sm:$0xff] }
  0x27   : > { %1951 = vmatpush.msrb.mxu3 %v2130_v1  ;;  %v465_v1 = vld [vmem:[%s2295_s15 + $0x38] sm:$0xff]  ;;  %v399_v34 = vld [vmem:[%s2305_s26 + $0x300] sm:$0xff] }
  0x28   : > { %1144 = vmatpush.msra.mxu1 %v434_v37  ;;  %v473_v33 = vld [vmem:[%s2295_s15 + $0x78] sm:$0xff] }
  0x29   : > { %1952 = vmatpush.msrb.mxu3 %v2144_v4  ;;  %v315_v4 = vld [vmem:[%s2305_s26 + $0x60] sm:$0xff]  ;;  %v334_v35 = vld [vmem:[%s2305_s26 + $0xf8] sm:$0xff] }
  0x2a   : > { %1145 = vmatpush.msra.mxu1 %v433_v38 }
  0x2b   : > { %1953 = vmatpush.msrb.mxu3 %v2164_v7  ;;  %v320_v7 = vld [vmem:[%s2305_s26 + $0x88] sm:$0xff] }
  0x2c   : > { %1146 = vmatpush.msra.mxu1 %v432_v39 }
  0x2d   : > { %1811 = vmatmul.msk.f32.gmra.mxu0 %vm533_vm1, %v459_v40  ;;  %1860 = vmatmul.msk.f32.gmra.mxu3 %vm533_vm1, %v508_v41  ;;  %v336_v40 = vld [vmem:[%s2305_s26 + $0x108] sm:$0xff]  ;;  %v333_v41 = vld [vmem:[%s2305_s26 + $0xf0] sm:$0xff] }
  0x2e   : > { %1875 = vmatmul.msk.f32.gmra.mxu2 %vm939_vm2, %v306_v42  ;;  %1147 = vmatpush.msra.mxu1 %v431_v43 }
  0x2f   : > { %1148 = vmatmul.f32.vlgmr.msra.gmra.mxu1 %v303_v44  ;;  %1954 = vmatpush.msrb.mxu3 %v2182_v10  ;;  %v516_v10 = vld [vmem:[%s2295_s15 + $0x1d0] sm:$0xff] }
  0x31   : > { %1955 = vmatpush.msrb.mxu3 %v2201_v13  ;;  %v468_v13 = vld [vmem:[%s2295_s15 + $0x50] sm:$0xff] }
  0x33   : > { %1956 = vmatpush.msrb.mxu3 %v2217_v16  ;;  %v321_v16 = vld [vmem:[%s2305_s26 + $0x90] sm:$0xff] }
  0x35   : > { %1812 = vmatmul.msk.f32.gmra.mxu0 %vm533_vm1, %v460_v45  ;;  %1861 = vmatmul.msk.f32.gmra.mxu3 %vm533_vm1, %v509_v46  ;;  %v475_v45 = vld [vmem:[%s2295_s15 + $0x88] sm:$0xff]  ;;  %v403_v46 = vld [vmem:[%s2305_s26 + $0x320] sm:$0xff] }
  0x36   : > { %1876 = vmatmul.msk.f32.gmra.mxu2 %vm939_vm2, %v308_v47  ;;  %1957 = vmatpush.msrb.mxu3 %v2234_v19  ;;  %v326_v19 = vld [vmem:[%s2305_s26 + $0xb8] sm:$0xff] }
  0x37   : > { %1151 = vmatmul.f32.gmra.mxu1 %v305_v48  ;;  %v338_v47 = vld [vmem:[%s2305_s26 + $0x118] sm:$0xff] }
  0x38   : > { %1958 = vmatpush.msrb.mxu3 %v2252_v22  ;;  %v519_v22 = vld [vmem:[%s2295_s15 + $0x1e8] sm:$0xff] }
  0x3a   : > { %1959 = vmatpush.msrb.mxu3 %v2268_v25  ;;  %v471_v25 = vld [vmem:[%s2295_s15 + $0x68] sm:$0xff] }
  0x3c   : > { %1960 = vmatpush.msrb.mxu3 %v2283_v28  ;;  %v327_v28 = vld [vmem:[%s2305_s26 + $0xc0] sm:$0xff] }
  0x3d   : > { %1813 = vmatmul.msk.f32.gmra.mxu0 %vm533_vm1, %v461_v49  ;;  %1862 = vmatmul.msk.f32.gmra.mxu3 %vm533_vm1, %v510_v50  ;;  %v335_v49 = vld [vmem:[%s2305_s26 + $0x100] sm:$0xff] }
  0x3e   : > { %1877 = vmatmul.msk.f32.gmra.mxu2 %vm939_vm2, %v310_v51  ;;  %1961 = vmatpush.msrb.mxu3 %v436_v31  ;;  %v332_v31 = vld [vmem:[%s2305_s26 + $0xe8] sm:$0xff]  ;;  %v2479_v51 = vld [vmem:[%s2995_s4] ss:$0 sm:$0xff] }
  0x3f   : > { %1154 = vmatmul.f32.gmra.mxu1 %v307_v52 }
  0x40   : > { %1962 = vmatpush.msrb.mxu3 %v435_v36  ;;  %v331_v36 = vld [vmem:[%s2305_s26 + $0xe0] sm:$0xff] }
  0x42   : > { %1963 = vmatpush.msrb.mxu3 %v434_v37 }
  0x44   : > { %1964 = vmatpush.msrb.mxu3 %v433_v38  ;;  %v474_v38 = vld [vmem:[%s2295_s15 + $0x80] sm:$0xff] }
  0x45   : > { %1814 = vmatmul.msk.f32.gmra.mxu0 %vm533_vm1, %v462_v53  ;;  %1863 = vmatmul.msk.f32.gmra.mxu3 %vm533_vm1, %v511_v54 }
  0x46   : > { %1878 = vmatmul.msk.f32.gmra.mxu2 %vm939_vm2, %v312_v55  ;;  %1965 = vmatpush.msrb.mxu3 %v432_v39  ;;  %v401_v39 = vld [vmem:[%s2305_s26 + $0x310] sm:$0xff] }
  0x47   : > { %1157 = vmatmul.f32.gmra.mxu1 %v309_v56 }
  0x48   : > { %1966 = vmatpush.msrb.mxu3 %v431_v43 }
  0x4a   : > { %1967 = vmatpush.msra.mxu3 %v2135_v2  ;;  %v514_v2 = vld [vmem:[%s2295_s15 + $0x1c0] sm:$0xff] }
  0x4c   : > { %1968 = vmatpush.msra.mxu3 %v2149_v5  ;;  %v466_v5 = vld [vmem:[%s2295_s15 + $0x40] sm:$0xff] }
  0x4d   : > { %1815 = vmatmul.msk.f32.gmra.mxu0 %vm533_vm1, %v463_v57  ;;  %1864 = vmatmul.msk.f32.gmra.mxu3 %vm533_vm1, %v512_v58  ;;  %v476_v57 = vld [vmem:[%s2295_s15 + $0x90] sm:$0xff] }
  0x4e   : > { %1879 = vmatmul.msk.f32.gmra.mxu2 %vm939_vm2, %v314_v59  ;;  %1969 = vmatpush.msra.mxu3 %v2169_v8  ;;  %v317_v8 = vld [vmem:[%s2305_s26 + $0x70] sm:$0xff]  ;;  %v340_v59 = vld [vmem:[%s2305_s26 + $0x128] sm:$0xff] }
  0x4f   : > { %1160 = vmatmul.f32.gmra.mxu1 %v311_v60  ;;  %v405_v58 = vld [vmem:[%s2305_s26 + $0x330] sm:$0xff] }
  0x50   : > { %1970 = vmatpush.msra.mxu3 %v2187_v11  ;;  %v322_v11 = vld [vmem:[%s2305_s26 + $0x98] sm:$0xff] }
  0x52   : > { %1971 = vmatpush.msra.mxu3 %v2206_v14  ;;  %v517_v14 = vld [vmem:[%s2295_s15 + $0x1d8] sm:$0xff] }
  0x54   : > { %1972 = vmatpush.msra.mxu3 %v2222_v17  ;;  %v469_v17 = vld [vmem:[%s2295_s15 + $0x58] sm:$0xff] }
  0x55   : > { %1816 = vmatmul.msk.f32.gmra.mxu0 %vm533_vm1, %v464_v61  ;;  %1865 = vmatmul.msk.f32.gmra.mxu3 %vm533_vm1, %v513_v62  ;;  %v337_v61 = vld [vmem:[%s2305_s26 + $0x110] sm:$0xff] }
  0x56   : > { %1880 = vmatmul.msk.f32.gmra.mxu2 %vm939_vm2, %v316_v63  ;;  %1973 = vmatpush.msra.mxu3 %v2239_v20  ;;  %v323_v20 = vld [vmem:[%s2305_s26 + $0xa0] sm:$0xff] }
  0x57   : > { %1163 = vmatmul.f32.gmra.mxu1 %v313_v0 }
  0x58   : > { %1974 = vmatpush.msra.mxu3 %v2257_v23  ;;  %v328_v23 = vld [vmem:[%s2305_s26 + $0xc8] sm:$0xff] }
  0x5a   : > { %1975 = vmatpush.msra.mxu3 %v2273_v26  ;;  %v520_v26 = vld [vmem:[%s2295_s15 + $0x1f0] sm:$0xff] }
  0x5c   : > { %1976 = vmatpush.msra.mxu3 %v2288_v29  ;;  %v472_v29 = vld [vmem:[%s2295_s15 + $0x70] sm:$0xff] }
  0x5d   : > { %1817 = vmatmul.msk.f32.gmra.mxu0 %vm533_vm1, %v465_v1  ;;  %1866 = vmatmul.msk.f32.gmra.mxu3 %vm533_vm1, %v514_v2 }
  0x5e   : > { %1881 = vmatmul.msk.f32.gmra.mxu2 %vm939_vm2, %v318_v3  ;;  %1977 = vmatpush.msra.mxu3 %v2313_v32  ;;  %v329_v32 = vld [vmem:[%s2305_s26 + $0xd0] sm:$0xff] }
  0x5f   : > { %1166 = vmatmul.f32.gmra.mxu1 %v315_v4  ;;  %v477_v4 = vld [vmem:[%s2295_s15 + $0x98] sm:$0xff] }
  0x65   : > { %1818 = vmatmul.msk.f32.gmra.mxu0 %vm533_vm1, %v466_v5  ;;  %1867 = vmatmul.msk.f32.gmra.mxu3 %vm533_vm1, %v515_v6  ;;  %v407_v5 = vld [vmem:[%s2305_s26 + $0x340] sm:$0xff]  ;;  %v342_v6 = vld [vmem:[%s2305_s26 + $0x138] sm:$0xff] }
  0x66   : > { %1882 = vmatmul.msk.f32.gmra.mxu2 %vm939_vm2, %v320_v7 }
  0x67   : > { %1169 = vmatmul.f32.gmra.mxu1 %v317_v8  ;;  %v339_v8 = vld [vmem:[%s2305_s26 + $0x120] sm:$0xff] }
  0x6d   : > { %1819 = vmatmul.msk.f32.gmra.mxu0 %vm533_vm1, %v467_v9  ;;  %1868 = vmatmul.msk.f32.gmra.mxu3 %vm533_vm1, %v516_v10 }
  0x6e   : > { %1883 = vmatmul.msk.f32.gmra.mxu2 %vm939_vm2, %v322_v11 }
  0x6f   : > { %1172 = vmatmul.f32.gmra.mxu1 %v319_v12 }
  0x75   : > { %1820 = vmatmul.msk.f32.gmra.mxu0 %vm533_vm1, %v468_v13  ;;  %1869 = vmatmul.msk.f32.gmra.mxu3 %vm533_vm1, %v517_v14 }
  0x76   : > { %1884 = vmatmul.msk.f32.gmra.mxu2 %vm939_vm2, %v324_v15  ;;  %v478_v15 = vld [vmem:[%s2295_s15 + $0xa0] sm:$0xff] }
  0x77   : > { %1175 = vmatmul.f32.gmra.mxu1 %v321_v16  ;;  %v409_v16 = vld [vmem:[%s2305_s26 + $0x350] sm:$0xff] }
  0x7d   : > { %1821 = vmatmul.msk.f32.gmra.mxu0 %vm533_vm1, %v469_v17  ;;  %1870 = vmatmul.msk.f32.gmra.mxu3 %vm533_vm1, %v518_v18  ;;  %v344_v17 = vld [vmem:[%s2305_s26 + $0x148] sm:$0xff] }
  0x7e   : > { %1885 = vmatmul.msk.f32.gmra.mxu2 %vm939_vm2, %v326_v19  ;;  %v341_v19 = vld [vmem:[%s2305_s26 + $0x130] sm:$0xff] }
  0x7f   : > { %1178 = vmatmul.f32.gmra.mxu1 %v323_v20 }
  0x85   : > { %1822 = vmatmul.msk.f32.gmra.mxu0 %vm533_vm1, %v470_v21  ;;  %1871 = vmatmul.msk.f32.gmra.mxu3 %vm533_vm1, %v519_v22 }
  0x86   : > { %1886 = vmatmul.msk.f32.gmra.mxu2 %vm939_vm2, %v328_v23 }
  0x87   : > { %1181 = vmatmul.f32.gmra.mxu1 %v325_v24 }
  0x8d   : > { %1823 = vmatmul.msk.f32.gmra.mxu0 %vm533_vm1, %v471_v25  ;;  %1872 = vmatmul.msk.f32.gmra.mxu3 %vm533_vm1, %v520_v26  ;;  %v479_v26 = vld [vmem:[%s2295_s15 + $0xa8] sm:$0xff] }
  0x8e   : > { %1887 = vmatmul.msk.f32.gmra.mxu2 %vm939_vm2, %v330_v27  ;;  %v411_v27 = vld [vmem:[%s2305_s26 + $0x360] sm:$0xff] }
  0x8f   : > { %1184 = vmatmul.f32.gmra.mxu1 %v327_v28  ;;  %v346_v28 = vld [vmem:[%s2305_s26 + $0x158] sm:$0xff] }
  0x95   : > { %1824 = vmatmul.msk.f32.gmra.mxu0 %vm533_vm1, %v472_v29  ;;  %1873 = vmatmul.msk.f32.gmra.mxu3 %vm533_vm1, %v521_v30  ;;  %v343_v30 = vld [vmem:[%s2305_s26 + $0x140] sm:$0xff] }
  0x96   : > { %1888 = vmatmul.msk.f32.gmra.mxu2 %vm939_vm2, %v332_v31 }
  0x97   : > { %1187 = vmatmul.f32.gmra.mxu1 %v329_v32 }
  0x9d   : > { %1825 = vmatmul.msk.f32.gmra.mxu0 %vm533_vm1, %v473_v33  ;;  %1292 = vmatmul.f32.vlgmr.msrb.gmra.mxu3 %v399_v34 }
  0x9e   : > { %1889 = vmatmul.msk.f32.gmra.mxu2 %vm939_vm2, %v334_v35 }
  0x9f   : > { %1190 = vmatmul.f32.gmra.mxu1 %v331_v36 }
  0xa2   : > { %v747_v37 = vpop.f32.mrf.mxu0 }
  0xa5   : > { %1826 = vmatmul.msk.f32.gmra.mxu0 %vm533_vm1, %v474_v38  ;;  %1295 = vmatmul.f32.gmra.mxu3 %v401_v39  ;;  %v413_v38 = vld [vmem:[%s2305_s26 + $0x370] sm:$0xff]  ;;  %v348_v39 = vld [vmem:[%s2305_s26 + $0x168] sm:$0xff] }
  0xa6   : > { %1890 = vmatmul.msk.f32.gmra.mxu2 %vm939_vm2, %v336_v40 }
  0xa7   : > { %1193 = vmatmul.f32.gmra.mxu1 %v333_v41  ;;  %v345_v41 = vld [vmem:[%s2305_s26 + $0x150] sm:$0xff] }
  0xa8   : > { %v2470_v42 = vpop.f32.mrf.mxu3 }
  0xa9   : > { %v1358_v43 = vpop.f32.mrf.mxu2 }
  0xaa   : > { %v750_v44 = vpop.f32.mrf.mxu0 }
  0xac   : > { %v1149_v48 = vpop.f32.mrf.mxu1 }
  0xad   : > { %v1150_v50 = vadd.f32 %v1149_v48, %v747_v37  ;;  %1827 = vmatmul.msk.f32.gmra.mxu0 %vm533_vm1, %v475_v45  ;;  %1298 = vmatmul.f32.gmra.mxu3 %v403_v46  ;;  %v480_v37 = vld [vmem:[%s2295_s15 + $0xb0] sm:$0xff] }
  0xae   : > { %1891 = vmatmul.msk.f32.gmra.mxu2 %vm939_vm2, %v338_v47 }
  0xaf   : > { %v1359_v52 = vadd.f32 %v1358_v43, %v1150_v50  ;;  %1196 = vmatmul.f32.gmra.mxu1 %v335_v49  ;;  %v481_v49 = vld [vmem:[%s2295_s15 + $0xb8] sm:$0xff]  ;;  %v415_v50 = vld [vmem:[%s2305_s26 + $0x380] sm:$0xff] }
  0xb0   : > { %v2490_v53 = vpop.f32.mrf.mxu3 }
  0xb1   : > { %v1554_v54 = vadd.f32 %v2479_v51, %v1359_v52  ;;  %v1361_v55 = vpop.f32.mrf.mxu2  ;;  %v350_v52 = vld [vmem:[%s2305_s26 + $0x178] sm:$0xff] }
  0xb2   : > { %v753_v56 = vpop.f32.mrf.mxu0 }
  0xb3   : > { %1619 = vst.msk [vmem:[%s2488_s29] sm:$0xff] %vm1618_vm3, %v1554_v54 }
  0xb4   : > { %v1152_v60 = vpop.f32.mrf.mxu1 }
  0xb5   : > { %v1153_v62 = vadd.f32 %v1152_v60, %v750_v44  ;;  %1828 = vmatmul.msk.f32.gmra.mxu0 %vm533_vm1, %v476_v57  ;;  %1301 = vmatmul.f32.gmra.mxu3 %v405_v58 }
  0xb6   : > { %1892 = vmatmul.msk.f32.gmra.mxu2 %vm939_vm2, %v340_v59 }
  0xb7   : > { %v1362_v63 = vadd.f32 %v1361_v55, %v1153_v62  ;;  %1199 = vmatmul.f32.gmra.mxu1 %v337_v61  ;;  %v347_v55 = vld [vmem:[%s2305_s26 + $0x160] sm:$0xff] }
  0xb8   : > { %v2501_v0 = vpop.f32.mrf.mxu3  ;;  %v482_v62 = vld [vmem:[%s2295_s15 + $0xc0] sm:$0xff] }
  0xb9   : > { %v1555_v1 = vadd.f32 %v2479_v51, %v1362_v63  ;;  %v1364_v2 = vpop.f32.mrf.mxu2  ;;  %v417_v63 = vld [vmem:[%s2305_s26 + $0x390] sm:$0xff] }
  0xba   : > { %v756_v3 = vpop.f32.mrf.mxu0 }
  0xbb   : > { %1620 = vst.msk [vmem:[%s2488_s29 + $0x8] sm:$0xff] %vm1618_vm3, %v1555_v1  ;;  %v352_v1 = vld [vmem:[%s2305_s26 + $0x188] sm:$0xff] }
  0xbc   : > { %v1155_v7 = vpop.f32.mrf.mxu1 }
  0xbd   : > { %v1156_v9 = vadd.f32 %v1155_v7, %v753_v56  ;;  %1829 = vmatmul.msk.f32.gmra.mxu0 %vm533_vm1, %v477_v4  ;;  %1304 = vmatmul.f32.gmra.mxu3 %v407_v5 }
  0xbe   : > { %1893 = vmatmul.msk.f32.gmra.mxu2 %vm939_vm2, %v342_v6 }
  0xbf   : > { %v1365_v10 = vadd.f32 %v1364_v2, %v1156_v9  ;;  %1202 = vmatmul.f32.gmra.mxu1 %v339_v8 }
  0xc0   : > { %v2512_v11 = vpop.f32.mrf.mxu3 }
  0xc1   : > { %v1556_v12 = vadd.f32 %v2479_v51, %v1365_v10  ;;  %v1367_v13 = vpop.f32.mrf.mxu2  ;;  %v483_v10 = vld [vmem:[%s2295_s15 + $0xc8] sm:$0xff] }
  0xc2   : > { %v759_v14 = vpop.f32.mrf.mxu0 }
  0xc3   : > { %1621 = vst.msk [vmem:[%s2488_s29 + $0x10] sm:$0xff] %vm1618_vm3, %v1556_v12  ;;  %v419_v12 = vld [vmem:[%s2305_s26 + $0x3a0] sm:$0xff] }
  0xc4   : > { %v1158_v18 = vpop.f32.mrf.mxu1 }
  0xc5   : > { %v1159_v20 = vadd.f32 %v1158_v18, %v756_v3  ;;  %1830 = vmatmul.msk.f32.gmra.mxu0 %vm533_vm1, %v478_v15  ;;  %1307 = vmatmul.f32.gmra.mxu3 %v409_v16  ;;  %v349_v3 = vld [vmem:[%s2305_s26 + $0x170] sm:$0xff]  ;;  %v351_v15 = vld [vmem:[%s2305_s26 + $0x180] sm:$0xff] }
  0xc6   : > { %1894 = vmatmul.msk.f32.gmra.mxu2 %vm939_vm2, %v344_v17 }
  0xc7   : > { %v1368_v21 = vadd.f32 %v1367_v13, %v1159_v20  ;;  %1205 = vmatmul.f32.gmra.mxu1 %v341_v19  ;;  %v354_v13 = vld [vmem:[%s2305_s26 + $0x198] sm:$0xff] }
  0xc8   : > { %v2523_v22 = vpop.f32.mrf.mxu3 }
  0xc9   : > { %v1557_v23 = vadd.f32 %v2479_v51, %v1368_v21  ;;  %v1370_v24 = vpop.f32.mrf.mxu2 }
  0xca   : > { %v762_v25 = vpop.f32.mrf.mxu0 }
  0xcb   : > { %1622 = vst.msk [vmem:[%s2488_s29 + $0x18] sm:$0xff] %vm1618_vm3, %v1557_v23  ;;  %v484_v23 = vld [vmem:[%s2295_s15 + $0xd0] sm:$0xff] }
  0xcc   : > { %v1161_v29 = vpop.f32.mrf.mxu1 }
  0xcd   : > { %v1162_v31 = vadd.f32 %v1161_v29, %v759_v14  ;;  %1831 = vmatmul.msk.f32.gmra.mxu0 %vm533_vm1, %v479_v26  ;;  %1310 = vmatmul.f32.gmra.mxu3 %v411_v27  ;;  %v353_v27 = vld [vmem:[%s2305_s26 + $0x190] sm:$0xff] }
  0xce   : > { %1895 = vmatmul.msk.f32.gmra.mxu2 %vm939_vm2, %v346_v28 }
  0xcf   : > { %v1371_v32 = vadd.f32 %v1370_v24, %v1162_v31  ;;  %1208 = vmatmul.f32.gmra.mxu1 %v343_v30  ;;  %v421_v24 = vld [vmem:[%s2305_s26 + $0x3b0] sm:$0xff] }
  0xd0   : > { %v2534_v33 = vpop.f32.mrf.mxu3 }
  0xd1   : > { %v1558_v34 = vadd.f32 %v2479_v51, %v1371_v32  ;;  %v1373_v35 = vpop.f32.mrf.mxu2 }
  0xd2   : > { %v765_v36 = vpop.f32.mrf.mxu0 }
  0xd3   : > { %1623 = vst.msk [vmem:[%s2488_s29 + $0x20] sm:$0xff] %vm1618_vm3, %v1558_v34 }
  0xd4   : > { %v1164_v40 = vpop.f32.mrf.mxu1 }
  0xd5   : > { %v1165_v43 = vadd.f32 %v1164_v40, %v762_v25  ;;  %1832 = vmatmul.msk.f32.gmra.mxu0 %vm533_vm1, %v480_v37  ;;  %1313 = vmatmul.f32.gmra.mxu3 %v413_v38  ;;  %v356_v25 = vld [vmem:[%s2305_s26 + $0x1a8] sm:$0xff]  ;;  %v358_v37 = vld [vmem:[%s2305_s26 + $0x1b8] sm:$0xff] }
  0xd6   : > { %1896 = vmatmul.msk.f32.gmra.mxu2 %vm939_vm2, %v348_v39  ;;  %v355_v39 = vld [vmem:[%s2305_s26 + $0x1a0] sm:$0xff] }
  0xd7   : > { %v1374_v44 = vadd.f32 %v1373_v35, %v1165_v43  ;;  %1211 = vmatmul.f32.gmra.mxu1 %v345_v41  ;;  %v485_v35 = vld [vmem:[%s2295_s15 + $0xd8] sm:$0xff] }
  0xd8   : > { %v2545_v45 = vpop.f32.mrf.mxu3 }
  0xd9   : > { %v1559_v46 = vadd.f32 %v2479_v51, %v1374_v44  ;;  %v1376_v47 = vpop.f32.mrf.mxu2 }
  0xda   : > { %v768_v48 = vpop.f32.mrf.mxu0 }
  0xdb   : > { %1624 = vst.msk [vmem:[%s2488_s29 + $0x28] sm:$0xff] %vm1618_vm3, %v1559_v46 }
  0xdc   : > { %v1167_v54 = vpop.f32.mrf.mxu1 }
  0xdd   : > { %v1168_v56 = vadd.f32 %v1167_v54, %v765_v36  ;;  %1833 = vmatmul.msk.f32.gmra.mxu0 %vm533_vm1, %v481_v49  ;;  %1316 = vmatmul.f32.gmra.mxu3 %v415_v50  ;;  %v423_v36 = vld [vmem:[%s2305_s26 + $0x3c0] sm:$0xff]  ;;  %v425_v49 = vld [vmem:[%s2305_s26 + $0x3d0] sm:$0xff]  ;;  %v360_v50 = vld [vmem:[%s2305_s26 + $0x1c8] sm:$0xff] }
  0xde   : > { %1897 = vmatmul.msk.f32.gmra.mxu2 %vm939_vm2, %v350_v52  ;;  %v357_v54 = vld [vmem:[%s2305_s26 + $0x1b0] sm:$0xff] }
  0xdf   : > { %v1377_v57 = vadd.f32 %v1376_v47, %v1168_v56  ;;  %1214 = vmatmul.f32.gmra.mxu1 %v347_v55 }
  0xe0   : > { %v2556_v58 = vpop.f32.mrf.mxu3 }
  0xe1   : > { %v1560_v59 = vadd.f32 %v2479_v51, %v1377_v57  ;;  %v1379_v60 = vpop.f32.mrf.mxu2 }
  0xe2   : > { %v771_v61 = vpop.f32.mrf.mxu0 }
  0xe3   : > { %1625 = vst.msk [vmem:[%s2488_s29 + $0x30] sm:$0xff] %vm1618_vm3, %v1560_v59 }
  0xe4   : > { %v1170_v2 = vpop.f32.mrf.mxu1 }
  0xe5   : > { %v1171_v4 = vadd.f32 %v1170_v2, %v768_v48  ;;  %1834 = vmatmul.msk.f32.gmra.mxu0 %vm533_vm1, %v482_v62  ;;  %1319 = vmatmul.f32.gmra.mxu3 %v417_v63  ;;  %v486_v48 = vld [vmem:[%s2295_s15 + $0xe0] sm:$0xff]  ;;  %v487_v62 = vld [vmem:[%s2295_s15 + $0xe8] sm:$0xff] }
  0xe6   : > { %1898 = vmatmul.msk.f32.gmra.mxu2 %vm939_vm2, %v352_v1  ;;  %v427_v63 = vld [vmem:[%s2305_s26 + $0x3e0] sm:$0xff]  ;;  %v362_v1 = vld [vmem:[%s2305_s26 + $0x1d8] sm:$0xff] }
  0xe7   : > { %v1380_v5 = vadd.f32 %v1379_v60, %v1171_v4  ;;  %1217 = vmatmul.f32.gmra.mxu1 %v349_v3  ;;  %v359_v3 = vld [vmem:[%s2305_s26 + $0x1c0] sm:$0xff] }
  0xe8   : > { %v2567_v6 = vpop.f32.mrf.mxu3 }
  0xe9   : > { %v1561_v7 = vadd.f32 %v2479_v51, %v1380_v5  ;;  %v1382_v8 = vpop.f32.mrf.mxu2 }
  0xea   : > { %v774_v9 = vpop.f32.mrf.mxu0 }
  0xeb   : > { %1626 = vst.msk [vmem:[%s2488_s29 + $0x38] sm:$0xff] %vm1618_vm3, %v1561_v7 }
  0xec   : > { %v1173_v14 = vpop.f32.mrf.mxu1 }
  0xed   : > { %v1174_v16 = vadd.f32 %v1173_v14, %v771_v61  ;;  %1835 = vmatmul.msk.f32.gmra.mxu0 %vm533_vm1, %v483_v10  ;;  %1322 = vmatmul.f32.gmra.mxu3 %v419_v12  ;;  %v488_v12 = vld [vmem:[%s2295_s15 + $0xf0] sm:$0xff]  ;;  %v364_v14 = vld [vmem:[%s2305_s26 + $0x1e8] sm:$0xff] }
  0xee   : > { %1899 = vmatmul.msk.f32.gmra.mxu2 %vm939_vm2, %v354_v13  ;;  %v429_v13 = vld [vmem:[%s2305_s26 + $0x3f0] sm:$0xff] }
  0xef   : > { %v1383_v17 = vadd.f32 %v1382_v8, %v1174_v16  ;;  %1220 = vmatmul.f32.gmra.mxu1 %v351_v15  ;;  %v361_v16 = vld [vmem:[%s2305_s26 + $0x1d0] sm:$0xff] }
  0xf0   : > { %v2578_v18 = vpop.f32.mrf.mxu3 }
  0xf1   : > { %v1562_v19 = vadd.f32 %v2479_v51, %v1383_v17  ;;  %v1385_v20 = vpop.f32.mrf.mxu2 }
  0xf2   : > { %v777_v21 = vpop.f32.mrf.mxu0 }
  0xf3   : > { %1627 = vst.msk [vmem:[%s2488_s29 + $0x40] sm:$0xff] %vm1618_vm3, %v1562_v19 }
  0xf4   : > { %v1176_v26 = vpop.f32.mrf.mxu1 }
  0xf5   : > { %v1177_v28 = vadd.f32 %v1176_v26, %v774_v9  ;;  %1836 = vmatmul.msk.f32.gmra.mxu0 %vm533_vm1, %v484_v23  ;;  %1325 = vmatmul.f32.gmra.mxu3 %v421_v24  ;;  %v402_v26 = vld [vmem:[%s2305_s26 + $0x318] sm:$0xff] }
  0xf6   : > { %1900 = vmatmul.msk.f32.gmra.mxu2 %vm939_vm2, %v356_v25  ;;  %v489_v25 = vld [vmem:[%s2295_s15 + $0xf8] sm:$0xff] }
  0xf7   : > { %v1386_v29 = vadd.f32 %v1385_v20, %v1177_v28  ;;  %1223 = vmatmul.f32.gmra.mxu1 %v353_v27  ;;  %v366_v27 = vld [vmem:[%s2305_s26 + $0x1f8] sm:$0xff] }
  0xf8   : > { %v2589_v30 = vpop.f32.mrf.mxu3 }
  0xf9   : > { %v1563_v31 = vadd.f32 %v2479_v51, %v1386_v29  ;;  %v1388_v32 = vpop.f32.mrf.mxu2  ;;  %v363_v29 = vld [vmem:[%s2305_s26 + $0x1e0] sm:$0xff] }
  0xfa   : > { %v780_v34 = vpop.f32.mrf.mxu0 }
  0xfb   : > { %1628 = vst.msk [vmem:[%s2488_s29 + $0x48] sm:$0xff] %vm1618_vm3, %v1563_v31 }
  0xfc   : > { %v1179_v38 = vpop.f32.mrf.mxu1 }
  0xfd   : > { %v1180_v40 = vadd.f32 %v1179_v38, %v777_v21  ;;  %1837 = vmatmul.msk.f32.gmra.mxu0 %vm533_vm1, %v485_v35  ;;  %1328 = vmatmul.f32.gmra.mxu3 %v423_v36  ;;  %v490_v38 = vld [vmem:[%s2295_s15 + $0x100] sm:$0xff] }
  0xfe   : > { %1901 = vmatmul.msk.f32.gmra.mxu2 %vm939_vm2, %v358_v37 }
  0xff   : > { %v1389_v41 = vadd.f32 %v1388_v32, %v1180_v40  ;;  %1226 = vmatmul.f32.gmra.mxu1 %v355_v39  ;;  %v404_v39 = vld [vmem:[%s2305_s26 + $0x328] sm:$0xff] }
 0x100   : > { %v2600_v43 = vpop.f32.mrf.mxu3  ;;  %v368_v40 = vld [vmem:[%s2305_s26 + $0x208] sm:$0xff] }
 0x101   : > { %v1564_v44 = vadd.f32 %v2479_v51, %v1389_v41  ;;  %v1391_v46 = vpop.f32.mrf.mxu2 }
 0x102   : > { %v783_v47 = vpop.f32.mrf.mxu0 }
 0x103   : > { %1629 = vst.msk [vmem:[%s2488_s29 + $0x50] sm:$0xff] %vm1618_vm3, %v1564_v44  ;;  %v365_v44 = vld [vmem:[%s2305_s26 + $0x1f0] sm:$0xff] }
 0x104   : > { %v1182_v52 = vpop.f32.mrf.mxu1 }
 0x105   : > { %v1183_v55 = vadd.f32 %v1182_v52, %v780_v34  ;;  %1838 = vmatmul.msk.f32.gmra.mxu0 %vm533_vm1, %v486_v48  ;;  %1331 = vmatmul.f32.gmra.mxu3 %v425_v49 }
 0x106   : > { %1902 = vmatmul.msk.f32.gmra.mxu2 %vm939_vm2, %v360_v50 }
 0x107   : > { %v1392_v56 = vadd.f32 %v1391_v46, %v1183_v55  ;;  %1229 = vmatmul.f32.gmra.mxu1 %v357_v54  ;;  %v491_v54 = vld [vmem:[%s2295_s15 + $0x108] sm:$0xff]  ;;  %v406_v55 = vld [vmem:[%s2305_s26 + $0x338] sm:$0xff] }
 0x108   : > { %v2611_v57 = vpop.f32.mrf.mxu3 }
 0x109   : > { %v1565_v59 = vadd.f32 %v2479_v51, %v1392_v56  ;;  %v1394_v60 = vpop.f32.mrf.mxu2  ;;  %v370_v56 = vld [vmem:[%s2305_s26 + $0x218] sm:$0xff] }
 0x10a   : > { %v786_v61 = vpop.f32.mrf.mxu0 }
 0x10b   : > { %1630 = vst.msk [vmem:[%s2488_s29 + $0x58] sm:$0xff] %vm1618_vm3, %v1565_v59 }
 0x10c   : > { %v1185_v2 = vpop.f32.mrf.mxu1 }
 0x10d   : > { %v1186_v4 = vadd.f32 %v1185_v2, %v783_v47  ;;  %1839 = vmatmul.msk.f32.gmra.mxu0 %vm533_vm1, %v487_v62  ;;  %1334 = vmatmul.f32.gmra.mxu3 %v427_v63 }
 0x10e   : > { %1903 = vmatmul.msk.f32.gmra.mxu2 %vm939_vm2, %v362_v1 }
 0x10f   : > { %v1395_v5 = vadd.f32 %v1394_v60, %v1186_v4  ;;  %1232 = vmatmul.f32.gmra.mxu1 %v359_v3  ;;  %v367_v60 = vld [vmem:[%s2305_s26 + $0x200] sm:$0xff]  ;;  %v492_v4 = vld [vmem:[%s2295_s15 + $0x110] sm:$0xff] }
 0x110   : > { %v2622_v7 = vpop.f32.mrf.mxu3 }
 0x111   : > { %v1566_v8 = vadd.f32 %v2479_v51, %v1395_v5  ;;  %v1397_v9 = vpop.f32.mrf.mxu2  ;;  %v408_v5 = vld [vmem:[%s2305_s26 + $0x348] sm:$0xff] }
 0x112   : > { %v789_v10 = vpop.f32.mrf.mxu0 }
 0x113   : > { %1631 = vst.msk [vmem:[%s2488_s29 + $0x60] sm:$0xff] %vm1618_vm3, %v1566_v8  ;;  %v372_v8 = vld [vmem:[%s2305_s26 + $0x228] sm:$0xff] }
 0x114   : > { %v1188_v15 = vpop.f32.mrf.mxu1 }
 0x115   : > { %v1189_v17 = vadd.f32 %v1188_v15, %v786_v61  ;;  %1840 = vmatmul.msk.f32.gmra.mxu0 %vm533_vm1, %v488_v12  ;;  %1337 = vmatmul.f32.gmra.mxu3 %v429_v13 }
 0x116   : > { %1904 = vmatmul.msk.f32.gmra.mxu2 %vm939_vm2, %v364_v14 }
 0x117   : > { %v1398_v19 = vadd.f32 %v1397_v9, %v1189_v17  ;;  %1235 = vmatmul.f32.gmra.mxu1 %v361_v16 }
 0x118   : > { %v2633_v20 = vpop.f32.mrf.mxu3 }
 0x119   : > { %v1567_v21 = vadd.f32 %v2479_v51, %v1398_v19  ;;  %v1400_v23 = vpop.f32.mrf.mxu2  ;;  %v493_v19 = vld [vmem:[%s2295_s15 + $0x118] sm:$0xff] }
 0x11a   : > { %v792_v24 = vpop.f32.mrf.mxu0 }
 0x11b   : > { %1632 = vst.msk [vmem:[%s2488_s29 + $0x68] sm:$0xff] %vm1618_vm3, %v1567_v21  ;;  %v410_v21 = vld [vmem:[%s2305_s26 + $0x358] sm:$0xff] }
 0x11c   : > { %v1191_v28 = vpop.f32.mrf.mxu1 }
 0x11d   : > { %v1192_v31 = vadd.f32 %v1191_v28, %v789_v10  ;;  %1841 = vmatmul.msk.f32.gmra.mxu0 %vm533_vm1, %v489_v25  ;;  %1923 = vmatmul.msk.f32.vlgmr.msra.gmra.mxu3 %vm939_vm2, %v402_v26  ;;  %v369_v10 = vld [vmem:[%s2305_s26 + $0x210] sm:$0xff]  ;;  %v371_v25 = vld [vmem:[%s2305_s26 + $0x220] sm:$0xff] }
 0x11e   : > { %1905 = vmatmul.msk.f32.gmra.mxu2 %vm939_vm2, %v366_v27 }
 0x11f   : > { %v1401_v32 = vadd.f32 %v1400_v23, %v1192_v31  ;;  %1238 = vmatmul.f32.gmra.mxu1 %v363_v29  ;;  %v374_v23 = vld [vmem:[%s2305_s26 + $0x238] sm:$0xff] }
 0x120   : > { %v2645_v34 = vpop.f32.mrf.mxu3 }
 0x121   : > { %v1568_v35 = vadd.f32 %v2479_v51, %v1401_v32  ;;  %v1403_v36 = vpop.f32.mrf.mxu2 }
 0x122   : > { %v795_v37 = vpop.f32.mrf.mxu0 }
 0x123   : > { %1633 = vst.msk [vmem:[%s2488_s29 + $0x70] sm:$0xff] %vm1618_vm3, %v1568_v35  ;;  %v494_v35 = vld [vmem:[%s2295_s15 + $0x120] sm:$0xff] }
 0x124   : > { %v1194_v41 = vpop.f32.mrf.mxu1 }
 0x125   : > { %v1195_v46 = vadd.f32 %v1194_v41, %v792_v24  ;;  %1842 = vmatmul.msk.f32.gmra.mxu0 %vm533_vm1, %v490_v38  ;;  %1924 = vmatmul.msk.f32.gmra.mxu3 %vm939_vm2, %v404_v39  ;;  %v373_v39 = vld [vmem:[%s2305_s26 + $0x230] sm:$0xff] }
 0x126   : > { %1906 = vmatmul.msk.f32.gmra.mxu2 %vm939_vm2, %v368_v40 }
 0x127   : > { %v1404_v47 = vadd.f32 %v1403_v36, %v1195_v46  ;;  %1241 = vmatmul.f32.gmra.mxu1 %v365_v44  ;;  %v412_v36 = vld [vmem:[%s2305_s26 + $0x368] sm:$0xff] }
 0x128   : > { %v2657_v48 = vpop.f32.mrf.mxu3 }
 0x129   : > { %v1569_v49 = vadd.f32 %v2479_v51, %v1404_v47  ;;  %v1406_v50 = vpop.f32.mrf.mxu2 }
 0x12a   : > { %v798_v52 = vpop.f32.mrf.mxu0 }
 0x12b   : > { %1634 = vst.msk [vmem:[%s2488_s29 + $0x78] sm:$0xff] %vm1618_vm3, %v1569_v49 }
 0x12c   : > { %v1197_v59 = vpop.f32.mrf.mxu1 }
 0x12d   : > { %v1198_v61 = vadd.f32 %v1197_v59, %v795_v37  ;;  %1843 = vmatmul.msk.f32.gmra.mxu0 %vm533_vm1, %v491_v54  ;;  %1925 = vmatmul.msk.f32.gmra.mxu3 %vm939_vm2, %v406_v55  ;;  %v376_v37 = vld [vmem:[%s2305_s26 + $0x248] sm:$0xff]  ;;  %v378_v54 = vld [vmem:[%s2305_s26 + $0x258] sm:$0xff] }
 0x12e   : > { %1907 = vmatmul.msk.f32.gmra.mxu2 %vm939_vm2, %v370_v56  ;;  %v375_v56 = vld [vmem:[%s2305_s26 + $0x240] sm:$0xff] }
 0x12f   : > { %v1407_v62 = vadd.f32 %v1406_v50, %v1198_v61  ;;  %1244 = vmatmul.f32.gmra.mxu1 %v367_v60  ;;  %v495_v50 = vld [vmem:[%s2295_s15 + $0x128] sm:$0xff] }
 0x130   : > { %v2669_v63 = vpop.f32.mrf.mxu3 }
 0x131   : > { %v1570_v1 = vadd.f32 %v2479_v51, %v1407_v62  ;;  %v1409_v2 = vpop.f32.mrf.mxu2 }
 0x132   : > { %v801_v3 = vpop.f32.mrf.mxu0 }
 0x133   : > { %1635 = vst.msk [vmem:[%s2488_s29 + $0x80] sm:$0xff] %vm1618_vm3, %v1570_v1 }
 0x134   : > { %v1200_v9 = vpop.f32.mrf.mxu1 }
 0x135   : > { %v1201_v12 = vadd.f32 %v1200_v9, %v798_v52  ;;  %1844 = vmatmul.msk.f32.gmra.mxu0 %vm533_vm1, %v492_v4  ;;  %1926 = vmatmul.msk.f32.gmra.mxu3 %vm939_vm2, %v408_v5  ;;  %v414_v52 = vld [vmem:[%s2305_s26 + $0x378] sm:$0xff]  ;;  %v416_v4 = vld [vmem:[%s2305_s26 + $0x388] sm:$0xff]  ;;  %v377_v9 = vld [vmem:[%s2305_s26 + $0x250] sm:$0xff] }
 0x136   : > { %1908 = vmatmul.msk.f32.gmra.mxu2 %vm939_vm2, %v372_v8  ;;  %v380_v5 = vld [vmem:[%s2305_s26 + $0x268] sm:$0xff] }
 0x137   : > { %v1410_v13 = vadd.f32 %v1409_v2, %v1201_v12  ;;  %1247 = vmatmul.f32.gmra.mxu1 %v369_v10 }
 0x138   : > { %v2681_v14 = vpop.f32.mrf.mxu3 }
 0x139   : > { %v1571_v15 = vadd.f32 %v2479_v51, %v1410_v13  ;;  %v1412_v16 = vpop.f32.mrf.mxu2 }
 0x13a   : > { %v804_v17 = vpop.f32.mrf.mxu0 }
 0x13b   : > { %1636 = vst.msk [vmem:[%s2488_s29 + $0x88] sm:$0xff] %vm1618_vm3, %v1571_v15 }
 0x13c   : > { %v1203_v24 = vpop.f32.mrf.mxu1 }
 0x13d   : > { %v1204_v26 = vadd.f32 %v1203_v24, %v801_v3  ;;  %1845 = vmatmul.msk.f32.gmra.mxu0 %vm533_vm1, %v493_v19  ;;  %1927 = vmatmul.msk.f32.gmra.mxu3 %vm939_vm2, %v410_v21  ;;  %v496_v3 = vld [vmem:[%s2295_s15 + $0x130] sm:$0xff]  ;;  %v497_v19 = vld [vmem:[%s2295_s15 + $0x138] sm:$0xff] }
 0x13e   : > { %1909 = vmatmul.msk.f32.gmra.mxu2 %vm939_vm2, %v374_v23  ;;  %v418_v21 = vld [vmem:[%s2305_s26 + $0x398] sm:$0xff] }
 0x13f   : > { %v1413_v27 = vadd.f32 %v1412_v16, %v1204_v26  ;;  %1250 = vmatmul.f32.gmra.mxu1 %v371_v25  ;;  %v382_v23 = vld [vmem:[%s2305_s26 + $0x278] sm:$0xff]  ;;  %v379_v25 = vld [vmem:[%s2305_s26 + $0x260] sm:$0xff] }
 0x140   : > { %v2693_v28 = vpop.f32.mrf.mxu3 }
 0x141   : > { %v1572_v29 = vadd.f32 %v2479_v51, %v1413_v27  ;;  %v1415_v31 = vpop.f32.mrf.mxu2 }
 0x142   : > { %v807_v32 = vpop.f32.mrf.mxu0 }
 0x143   : > { %1637 = vst.msk [vmem:[%s2488_s29 + $0x90] sm:$0xff] %vm1618_vm3, %v1572_v29 }
 0x144   : > { %v1206_v38 = vpop.f32.mrf.mxu1 }
 0x145   : > { %v1207_v40 = vadd.f32 %v1206_v38, %v804_v17  ;;  %1846 = vmatmul.msk.f32.gmra.mxu0 %vm533_vm1, %v494_v35  ;;  %1928 = vmatmul.msk.f32.gmra.mxu3 %vm939_vm2, %v412_v36  ;;  %v498_v36 = vld [vmem:[%s2295_s15 + $0x140] sm:$0xff]  ;;  %v384_v38 = vld [vmem:[%s2305_s26 + $0x288] sm:$0xff] }
 0x146   : > { %1910 = vmatmul.msk.f32.gmra.mxu2 %vm939_vm2, %v376_v37  ;;  %v420_v37 = vld [vmem:[%s2305_s26 + $0x3a8] sm:$0xff] }
 0x147   : > { %v1416_v41 = vadd.f32 %v1415_v31, %v1207_v40  ;;  %1253 = vmatmul.f32.gmra.mxu1 %v373_v39  ;;  %v381_v40 = vld [vmem:[%s2305_s26 + $0x270] sm:$0xff] }
 0x148   : > { %v2705_v44 = vpop.f32.mrf.mxu3 }
 0x149   : > { %v1573_v46 = vadd.f32 %v2479_v51, %v1416_v41  ;;  %v1418_v47 = vpop.f32.mrf.mxu2 }
 0x14a   : > { %v810_v49 = vpop.f32.mrf.mxu0 }
 0x14b   : > { %1638 = vst.msk [vmem:[%s2488_s29 + $0x98] sm:$0xff] %vm1618_vm3, %v1573_v46 }
 0x14c   : > { %v1209_v55 = vpop.f32.mrf.mxu1 }
 0x14d   : > { %v1210_v59 = vadd.f32 %v1209_v55, %v807_v32  ;;  %1847 = vmatmul.msk.f32.gmra.mxu0 %vm533_vm1, %v495_v50  ;;  %1929 = vmatmul.msk.f32.gmra.mxu3 %vm939_vm2, %v414_v52  ;;  %v422_v55 = vld [vmem:[%s2305_s26 + $0x3b8] sm:$0xff] }
 0x14e   : > { %1911 = vmatmul.msk.f32.gmra.mxu2 %vm939_vm2, %v378_v54  ;;  %v499_v54 = vld [vmem:[%s2295_s15 + $0x148] sm:$0xff] }
 0x14f   : > { %v1419_v60 = vadd.f32 %v1418_v47, %v1210_v59  ;;  %1256 = vmatmul.f32.gmra.mxu1 %v375_v56  ;;  %v386_v56 = vld [vmem:[%s2305_s26 + $0x298] sm:$0xff] }
 0x150   : > { %v2717_v61 = vpop.f32.mrf.mxu3 }
 0x151   : > { %v1574_v62 = vadd.f32 %v2479_v51, %v1419_v60  ;;  %v1421_v1 = vpop.f32.mrf.mxu2  ;;  %v383_v60 = vld [vmem:[%s2305_s26 + $0x280] sm:$0xff] }
 0x152   : > { %v813_v2 = vpop.f32.mrf.mxu0 }
 0x153   : > { %1639 = vst.msk [vmem:[%s2488_s29 + $0xa0] sm:$0xff] %vm1618_vm3, %v1574_v62 }
 0x154   : > { %v1212_v8 = vpop.f32.mrf.mxu1 }
 0x155   : > { %v1213_v10 = vadd.f32 %v1212_v8, %v810_v49  ;;  %1848 = vmatmul.msk.f32.gmra.mxu0 %vm533_vm1, %v496_v3  ;;  %1930 = vmatmul.msk.f32.gmra.mxu3 %vm939_vm2, %v416_v4  ;;  %v500_v8 = vld [vmem:[%s2295_s15 + $0x150] sm:$0xff] }
 0x156   : > { %1912 = vmatmul.msk.f32.gmra.mxu2 %vm939_vm2, %v380_v5 }
 0x157   : > { %v1422_v12 = vadd.f32 %v1421_v1, %v1213_v10  ;;  %1259 = vmatmul.f32.gmra.mxu1 %v377_v9  ;;  %v424_v9 = vld [vmem:[%s2305_s26 + $0x3c8] sm:$0xff] }
 0x158   : > { %v2729_v13 = vpop.f32.mrf.mxu3  ;;  %v388_v10 = vld [vmem:[%s2305_s26 + $0x2a8] sm:$0xff] }
 0x159   : > { %v1575_v15 = vadd.f32 %v2479_v51, %v1422_v12  ;;  %v1424_v16 = vpop.f32.mrf.mxu2 }
 0x15a   : > { %v816_v17 = vpop.f32.mrf.mxu0 }
 0x15b   : > { %1640 = vst.msk [vmem:[%s2488_s29 + $0xa8] sm:$0xff] %vm1618_vm3, %v1575_v15  ;;  %v385_v15 = vld [vmem:[%s2305_s26 + $0x290] sm:$0xff] }
 0x15c   : > { %v1215_v24 = vpop.f32.mrf.mxu1 }
 0x15d   : > { %v1216_v26 = vadd.f32 %v1215_v24, %v813_v2  ;;  %1849 = vmatmul.msk.f32.gmra.mxu0 %vm533_vm1, %v497_v19  ;;  %1931 = vmatmul.msk.f32.gmra.mxu3 %vm939_vm2, %v418_v21 }
 0x15e   : > { %1913 = vmatmul.msk.f32.gmra.mxu2 %vm939_vm2, %v382_v23 }
 0x15f   : > { %v1425_v27 = vadd.f32 %v1424_v16, %v1216_v26  ;;  %1262 = vmatmul.f32.gmra.mxu1 %v379_v25  ;;  %v501_v25 = vld [vmem:[%s2295_s15 + $0x158] sm:$0xff] }
 0x160   : > { %v2741_v29 = vpop.f32.mrf.mxu3  ;;  %v426_v26 = vld [vmem:[%s2305_s26 + $0x3d8] sm:$0xff] }
 0x161   : > { %v1576_v31 = vadd.f32 %v2479_v51, %v1425_v27  ;;  %v1427_v32 = vpop.f32.mrf.mxu2  ;;  %v390_v27 = vld [vmem:[%s2305_s26 + $0x2b8] sm:$0xff] }
 0x162   : > { %v819_v35 = vpop.f32.mrf.mxu0 }
 0x163   : > { %1641 = vst.msk [vmem:[%s2488_s29 + $0xb0] sm:$0xff] %vm1618_vm3, %v1576_v31 }
 0x164   : > { %v1218_v39 = vpop.f32.mrf.mxu1 }
 0x165   : > { %v1219_v41 = vadd.f32 %v1218_v39, %v816_v17  ;;  %1850 = vmatmul.msk.f32.gmra.mxu0 %vm533_vm1, %v498_v36  ;;  %1932 = vmatmul.msk.f32.gmra.mxu3 %vm939_vm2, %v420_v37 }
 0x166   : > { %1914 = vmatmul.msk.f32.gmra.mxu2 %vm939_vm2, %v384_v38 }
 0x167   : > { %v1428_v46 = vadd.f32 %v1427_v32, %v1219_v41  ;;  %1265 = vmatmul.f32.gmra.mxu1 %v381_v40  ;;  %v387_v32 = vld [vmem:[%s2305_s26 + $0x2a0] sm:$0xff] }
 0x168   : > { %v2753_v47 = vpop.f32.mrf.mxu3  ;;  %v502_v41 = vld [vmem:[%s2295_s15 + $0x160] sm:$0xff] }
 0x169   : > { %v1577_v49 = vadd.f32 %v2479_v51, %v1428_v46  ;;  %v1430_v50 = vpop.f32.mrf.mxu2  ;;  %v428_v46 = vld [vmem:[%s2305_s26 + $0x3e8] sm:$0xff] }
 0x16a   : > { %v822_v52 = vpop.f32.mrf.mxu0 }
 0x16b   : > { %1642 = vst.msk [vmem:[%s2488_s29 + $0xb8] sm:$0xff] %vm1618_vm3, %v1577_v49  ;;  %v392_v49 = vld [vmem:[%s2305_s26 + $0x2c8] sm:$0xff] }
 0x16c   : > { %v1221_v59 = vpop.f32.mrf.mxu1 }
 0x16d   : > { %v1222_v62 = vadd.f32 %v1221_v59, %v819_v35  ;;  %1851 = vmatmul.msk.f32.gmra.mxu0 %vm533_vm1, %v499_v54  ;;  %1933 = vmatmul.msk.f32.gmra.mxu3 %vm939_vm2, %v422_v55 }
 0x16e   : > { %1915 = vmatmul.msk.f32.gmra.mxu2 %vm939_vm2, %v386_v56 }
 0x16f   : > { %v1431_v1 = vadd.f32 %v1430_v50, %v1222_v62  ;;  %1268 = vmatmul.f32.gmra.mxu1 %v383_v60 }
 0x170   : > { %v2765_v2 = vpop.f32.mrf.mxu3 }
 0x171   : > { %v1578_v3 = vadd.f32 %v2479_v51, %v1431_v1  ;;  %v1433_v4 = vpop.f32.mrf.mxu2  ;;  %v503_v1 = vld [vmem:[%s2295_s15 + $0x168] sm:$0xff] }
 0x172   : > { %v825_v5 = vpop.f32.mrf.mxu0 }
 0x173   : > { %1643 = vst.msk [vmem:[%s2488_s29 + $0xc0] sm:$0xff] %vm1618_vm3, %v1578_v3  ;;  %v430_v3 = vld [vmem:[%s2305_s26 + $0x3f8] sm:$0xff] }
 0x174   : > { %v1224_v12 = vpop.f32.mrf.mxu1 }
 0x175   : > { %v1225_v16 = vadd.f32 %v1224_v12, %v822_v52  ;;  %1852 = vmatmul.msk.f32.gmra.mxu0 %vm533_vm1, %v500_v8  ;;  %1934 = vmatmul.msk.f32.gmra.mxu3 %vm939_vm2, %v424_v9  ;;  %v389_v52 = vld [vmem:[%s2305_s26 + $0x2b0] sm:$0xff]  ;;  %v391_v8 = vld [vmem:[%s2305_s26 + $0x2c0] sm:$0xff] }
 0x176   : > { %1916 = vmatmul.msk.f32.gmra.mxu2 %vm939_vm2, %v388_v10 }
 0x177   : > { %v1434_v17 = vadd.f32 %v1433_v4, %v1225_v16  ;;  %1271 = vmatmul.f32.gmra.mxu1 %v385_v15  ;;  %v394_v4 = vld [vmem:[%s2305_s26 + $0x2d8] sm:$0xff] }
 0x178   : > { %v2777_v19 = vpop.f32.mrf.mxu3 }
 0x179   : > { %v1579_v21 = vadd.f32 %v2479_v51, %v1434_v17  ;;  %v1436_v23 = vpop.f32.mrf.mxu2 }
 0x17a   : > { %v828_v24 = vpop.f32.mrf.mxu0 }
 0x17b   : > { %1644 = vst.msk [vmem:[%s2488_s29 + $0xc8] sm:$0xff] %vm1618_vm3, %v1579_v21  ;;  %v504_v21 = vld [vmem:[%s2295_s15 + $0x170] sm:$0xff] }
 0x17c   : > { %v1227_v31 = vpop.f32.mrf.mxu1 }
 0x17d   : > { %v1228_v35 = vadd.f32 %v1227_v31, %v825_v5  ;;  %1853 = vmatmul.msk.f32.gmra.mxu0 %vm533_vm1, %v501_v25  ;;  %1935 = vmatmul.msk.f32.gmra.mxu3 %vm939_vm2, %v426_v26  ;;  %v393_v25 = vld [vmem:[%s2305_s26 + $0x2d0] sm:$0xff] }
 0x17e   : > { %1917 = vmatmul.msk.f32.gmra.mxu2 %vm939_vm2, %v390_v27 }
 0x17f   : > { %v1437_v36 = vadd.f32 %v1436_v23, %v1228_v35  ;;  %1274 = vmatmul.f32.gmra.mxu1 %v387_v32  ;;  %v396_v23 = vld [vmem:[%s2305_s26 + $0x2e8] sm:$0xff] }
 0x180   : > { %v2789_v37 = vpop.f32.mrf.mxu3 }
 0x181   : > { %v1580_v38 = vadd.f32 %v2479_v51, %v1437_v36  ;;  %v1439_v39 = vpop.f32.mrf.mxu2 }
 0x182   : > { %v831_v40 = vpop.f32.mrf.mxu0 }
 0x183   : > { %1645 = vst.msk [vmem:[%s2488_s29 + $0xd0] sm:$0xff] %vm1618_vm3, %v1580_v38  ;;  %v505_v38 = vld [vmem:[%s2295_s15 + $0x178] sm:$0xff] }
 0x184   : > { %v1230_v50 = vpop.f32.mrf.mxu1 }
 0x185   : > { %v1231_v54 = vadd.f32 %v1230_v50, %v828_v24  ;;  %1854 = vmatmul.msk.f32.gmra.mxu0 %vm533_vm1, %v502_v41  ;;  %1936 = vmatmul.msk.f32.gmra.mxu3 %vm939_vm2, %v428_v46  ;;  %v395_v41 = vld [vmem:[%s2305_s26 + $0x2e0] sm:$0xff] }
 0x186   : > { %1918 = vmatmul.msk.f32.gmra.mxu2 %vm939_vm2, %v392_v49  ;;  %v1297_v49 = vadd.f32 %v2657_v48, %v2470_v42  ;;  %v1300_v48 = vadd.f32 %v2669_v63, %v2490_v53  ;;  %v1303_v53 = vadd.f32 %v2681_v14, %v2501_v0  ;;  %v1306_v14 = vadd.f32 %v2693_v28, %v2512_v11 }
 0x187   : > { %v1440_v55 = vadd.f32 %v1439_v39, %v1231_v54  ;;  %1277 = vmatmul.f32.gmra.mxu1 %v389_v52  ;;  %v398_v39 = vld [vmem:[%s2305_s26 + $0x2f8] sm:$0xff]  ;;  %v1309_v11 = vadd.f32 %v2705_v44, %v2523_v22  ;;  %v1312_v22 = vadd.f32 %v2717_v61, %v2534_v33  ;;  %v1315_v33 = vadd.f32 %v2729_v13, %v2545_v45 }
 0x188   : > { %v2801_v56 = vpop.f32.mrf.mxu3  ;;  %v1318_v45 = vadd.f32 %v2741_v29, %v2556_v58  ;;  %v1321_v58 = vadd.f32 %v2753_v47, %v2567_v6  ;;  %v1324_v6 = vadd.f32 %v2765_v2, %v2578_v18  ;;  %v1327_v18 = vadd.f32 %v2777_v19, %v2589_v30 }
 0x189   : > { %v1581_v59 = vadd.f32 %v2479_v51, %v1440_v55  ;;  %v1442_v60 = vpop.f32.mrf.mxu2  ;;  %v1330_v30 = vadd.f32 %v2789_v37, %v2600_v43  ;;  %v1333_v43 = vadd.f32 %v2801_v56, %v2611_v57 }
 0x18a   : > { %v834_v62 = vpop.f32.mrf.mxu0 }
 0x18b   : > { %1646 = vst.msk [vmem:[%s2488_s29 + $0xd8] sm:$0xff] %vm1618_vm3, %v1581_v59 }
 0x18c   : > { %v1233_v5 = vpop.f32.mrf.mxu1 }
 0x18d   : > { %v1234_v9 = vadd.f32 %v1233_v5, %v831_v40  ;;  %1855 = vmatmul.msk.f32.gmra.mxu0 %vm533_vm1, %v503_v1  ;;  %1937 = vmatmul.msk.f32.gmra.mxu3 %vm939_vm2, %v430_v3  ;;  %v400_v3 = vld [vmem:[%s2305_s26 + $0x308] sm:$0xff]  ;;  %v397_v5 = vld [vmem:[%s2305_s26 + $0x2f0] sm:$0xff] }
 0x18e   : > { %1919 = vmatmul.msk.f32.gmra.mxu2 %vm939_vm2, %v394_v4 }
 0x18f   : > { %v1443_v10 = vadd.f32 %v1442_v60, %v1234_v9  ;;  %1280 = vmatmul.f32.gmra.mxu1 %v391_v8 }
 0x190   : > { %v2813_v12 = vpop.f32.mrf.mxu3 }
 0x191   : > { %v1582_v15 = vadd.f32 %v2479_v51, %v1443_v10  ;;  %v1445_v16 = vpop.f32.mrf.mxu2  ;;  %v1336_v57 = vadd.f32 %v2813_v12, %v2622_v7 }
 0x192   : > { %v837_v17 = vpop.f32.mrf.mxu0 }
 0x193   : > { %1647 = vst.msk [vmem:[%s2488_s29 + $0xe0] sm:$0xff] %vm1618_vm3, %v1582_v15 }
 0x194   : > { %v1236_v24 = vpop.f32.mrf.mxu1 }
 0x195   : > { %v1237_v26 = vadd.f32 %v1236_v24, %v834_v62  ;;  %1856 = vmatmul.msk.f32.gmra.mxu0 %vm533_vm1, %v504_v21  ;;  %v506_v62 = vld [vmem:[%s2295_s15 + $0x180] sm:$0xff] }
 0x196   : > { %1920 = vmatmul.msk.f32.gmra.mxu2 %vm939_vm2, %v396_v23 }
 0x197   : > { %v1446_v27 = vadd.f32 %v1445_v16, %v1237_v26  ;;  %1283 = vmatmul.f32.gmra.mxu1 %v393_v25  ;;  %v2859_v26 = vld [vmem:[%s2995_s4] ss:$0 sm:$0xff] }
 0x198   : > { %v2823_v31 = vpop.f32.mrf.mxu3 }
 0x199   : > { %v1583_v32 = vadd.f32 %v2479_v51, %v1446_v27  ;;  %v1448_v35 = vpop.f32.mrf.mxu2  ;;  %v1339_v7 = vadd.f32 %v2823_v31, %v2633_v20 }
 0x19a   : > { %v840_v36 = vpop.f32.mrf.mxu0 }
 0x19b   : > { %1648 = vst.msk [vmem:[%s2488_s29 + $0xe8] sm:$0xff] %vm1618_vm3, %v1583_v32 }
 0x19c   : > { %v1239_v40 = vpop.f32.mrf.mxu1 }
 0x19d   : > { %v1240_v46 = vadd.f32 %v1239_v40, %v837_v17  ;;  %1857 = vmatmul.msk.f32.gmra.mxu0 %vm533_vm1, %v505_v38 }
 0x19e   : > { %1921 = vmatmul.msk.f32.gmra.mxu2 %vm939_vm2, %v398_v39 }
 0x19f   : > { %v1449_v50 = vadd.f32 %v1448_v35, %v1240_v46  ;;  %1286 = vmatmul.f32.gmra.mxu1 %v395_v41 }
 0x1a0   : > { %v1505_v52 = vpop.f32.mrf.mxu3 }
 0x1a1   : > { %v1584_v54 = vadd.f32 %v2479_v51, %v1449_v50  ;;  %v1451_v55 = vpop.f32.mrf.mxu2  ;;  %v1506_v59 = vadd.f32 %v1505_v52, %v1297_v49 }
 0x1a2   : > { %v843_v60 = vpop.f32.mrf.mxu0 }
 0x1a3   : > { %1649 = vst.msk [vmem:[%s2488_s29 + $0xf0] sm:$0xff] %vm1618_vm3, %v1584_v54  ;;  %v1603_v1 = vadd.f32 %v2479_v51, %v1506_v59 }
 0x1a4   : > { %v1242_v4 = vpop.f32.mrf.mxu1 }
 0x1a5   : > { %1668 = vst.msk [vmem:[%s2488_s29 + $0x188] sm:$0xff] %vm1618_vm3, %v1603_v1  ;;  %v1243_v42 = vadd.f32 %v1242_v4, %v840_v36  ;;  %1858 = vmatmul.msk.f32.gmra.mxu0 %vm533_vm1, %v506_v62 }
 0x1a6   : > { %1922 = vmatmul.msk.f32.gmra.mxu2 %vm939_vm2, %v400_v3 }
 0x1a7   : > { %v1452_v8 = vadd.f32 %v1451_v55, %v1243_v42  ;;  %1289 = vmatmul.f32.gmra.mxu1 %v397_v5 }
 0x1a8   : > { %v1508_v9 = vpop.f32.mrf.mxu3 }
 0x1a9   : > { %v1585_v10 = vadd.f32 %v2479_v51, %v1452_v8  ;;  %v1454_v15 = vpop.f32.mrf.mxu2  ;;  %v1509_v16 = vadd.f32 %v1508_v9, %v1300_v48 }
 0x1aa   : > { %v846_v17 = vpop.f32.mrf.mxu0 }
 0x1ab   : > { %1650 = vst.msk [vmem:[%s2488_s29 + $0xf8] sm:$0xff] %vm1618_vm3, %v1585_v10  ;;  %v1604_v21 = vadd.f32 %v2479_v51, %v1509_v16 }
 0x1ac   : > { %v1245_v23 = vpop.f32.mrf.mxu1 }
 0x1ad   : > { %1669 = vst.msk [vmem:[%s2488_s29 + $0x190] sm:$0xff] %vm1618_vm3, %v1604_v21  ;;  %v1246_v24 = vadd.f32 %v1245_v23, %v843_v60 }
 0x1af   : > { %v1455_v63 = vadd.f32 %v1454_v15, %v1246_v24 }
 0x1b0   : > { %v1511_v25 = vpop.f32.mrf.mxu3 }
 0x1b1   : > { %v1586_v27 = vadd.f32 %v2859_v26, %v1455_v63  ;;  %v1457_v32 = vpop.f32.mrf.mxu2  ;;  %v1512_v35 = vadd.f32 %v1511_v25, %v1303_v53 }
 0x1b2   : > { %v849_v51 = vpop.f32.mrf.mxu0 }
 0x1b3   : > { %1651 = vst.msk [vmem:[%s2488_s29 + $0x100] sm:$0xff] %vm1618_vm3, %v1586_v27  ;;  %v1605_v36 = vadd.f32 %v2859_v26, %v1512_v35 }
 0x1b4   : > { %v1248_v38 = vpop.f32.mrf.mxu1 }
 0x1b5   : > { %1670 = vst.msk [vmem:[%s2488_s29 + $0x198] sm:$0xff] %vm1618_vm3, %v1605_v36  ;;  %v1249_v0 = vadd.f32 %v1248_v38, %v846_v17 }
 0x1b7   : > { %v1458_v39 = vadd.f32 %v1457_v32, %v1249_v0 }
 0x1b8   : > { %v1514_v40 = vpop.f32.mrf.mxu3 }
 0x1b9   : > { %v1587_v41 = vadd.f32 %v2859_v26, %v1458_v39  ;;  %v1460_v46 = vpop.f32.mrf.mxu2  ;;  %v1515_v49 = vadd.f32 %v1514_v40, %v1306_v14 }
 0x1ba   : > { %v852_v50 = vpop.f32.mrf.mxu0 }
 0x1bb   : > { %1652 = vst.msk [vmem:[%s2488_s29 + $0x108] sm:$0xff] %vm1618_vm3, %v1587_v41  ;;  %v1606_v52 = vadd.f32 %v2859_v26, %v1515_v49 }
 0x1bc   : > { %v1251_v54 = vpop.f32.mrf.mxu1 }
 0x1bd   : > { %1671 = vst.msk [vmem:[%s2488_s29 + $0x1a0] sm:$0xff] %vm1618_vm3, %v1606_v52  ;;  %v1252_v55 = vadd.f32 %v1251_v54, %v849_v51 }
 0x1bf   : > { %v1461_v28 = vadd.f32 %v1460_v46, %v1252_v55 }
 0x1c0   : > { %v1517_v59 = vpop.f32.mrf.mxu3 }
 0x1c1   : > { %v1588_v60 = vadd.f32 %v2859_v26, %v1461_v28  ;;  %v1463_v62 = vpop.f32.mrf.mxu2  ;;  %v1518_v1 = vadd.f32 %v1517_v59, %v1309_v11 }
 0x1c2   : > { %v855_v3 = vpop.f32.mrf.mxu0 }
 0x1c3   : > { %1653 = vst.msk [vmem:[%s2488_s29 + $0x110] sm:$0xff] %vm1618_vm3, %v1588_v60  ;;  %v1607_v4 = vadd.f32 %v2859_v26, %v1518_v1 }
 0x1c4   : > { %v1254_v5 = vpop.f32.mrf.mxu1 }
 0x1c5   : > { %1672 = vst.msk [vmem:[%s2488_s29 + $0x1a8] sm:$0xff] %vm1618_vm3, %v1607_v4  ;;  %v1255_v42 = vadd.f32 %v1254_v5, %v852_v50 }
 0x1c7   : > { %v1464_v44 = vadd.f32 %v1463_v62, %v1255_v42 }
 0x1c8   : > { %v1520_v48 = vpop.f32.mrf.mxu3 }
 0x1c9   : > { %v1589_v8 = vadd.f32 %v2859_v26, %v1464_v44  ;;  %v1466_v9 = vpop.f32.mrf.mxu2  ;;  %v1521_v10 = vadd.f32 %v1520_v48, %v1312_v22 }
 0x1ca   : > { %v858_v15 = vpop.f32.mrf.mxu0 }
 0x1cb   : > { %1654 = vst.msk [vmem:[%s2488_s29 + $0x118] sm:$0xff] %vm1618_vm3, %v1589_v8  ;;  %v1608_v16 = vadd.f32 %v2859_v26, %v1521_v10 }
 0x1cc   : > { %v1257_v17 = vpop.f32.mrf.mxu1 }
 0x1cd   : > { %1673 = vst.msk [vmem:[%s2488_s29 + $0x1b0] sm:$0xff] %vm1618_vm3, %v1608_v16  ;;  %v1258_v21 = vadd.f32 %v1257_v17, %v855_v3 }
 0x1cf   : > { %v1467_v61 = vadd.f32 %v1466_v9, %v1258_v21 }
 0x1d0   : > { %v1523_v23 = vpop.f32.mrf.mxu3 }
 0x1d1   : > { %v1590_v24 = vadd.f32 %v2859_v26, %v1467_v61  ;;  %v1469_v53 = vpop.f32.mrf.mxu2  ;;  %v1524_v63 = vadd.f32 %v1523_v23, %v1315_v33 }
 0x1d2   : > { %v861_v25 = vpop.f32.mrf.mxu0 }
 0x1d3   : > { %1655 = vst.msk [vmem:[%s2488_s29 + $0x120] sm:$0xff] %vm1618_vm3, %v1590_v24  ;;  %v1609_v27 = vadd.f32 %v2859_v26, %v1524_v63 }
 0x1d4   : > { %v1260_v32 = vpop.f32.mrf.mxu1 }
 0x1d5   : > { %1674 = vst.msk [vmem:[%s2488_s29 + $0x1b8] sm:$0xff] %vm1618_vm3, %v1609_v27  ;;  %v1261_v35 = vadd.f32 %v1260_v32, %v858_v15 }
 0x1d7   : > { %v1470_v13 = vadd.f32 %v1469_v53, %v1261_v35 }
 0x1d8   : > { %v1526_v51 = vpop.f32.mrf.mxu3 }
 0x1d9   : > { %v1591_v36 = vadd.f32 %v2859_v26, %v1470_v13  ;;  %v1472_v38 = vpop.f32.mrf.mxu2  ;;  %v1527_v0 = vadd.f32 %v1526_v51, %v1318_v45 }
 0x1da   : > { %v864_v14 = vpop.f32.mrf.mxu0 }
 0x1db   : > { %1656 = vst.msk [vmem:[%s2488_s29 + $0x128] sm:$0xff] %vm1618_vm3, %v1591_v36  ;;  %v1610_v39 = vadd.f32 %v2859_v26, %v1527_v0 }
 0x1dc   : > { %v1263_v40 = vpop.f32.mrf.mxu1 }
 0x1dd   : > { %1675 = vst.msk [vmem:[%s2488_s29 + $0x1c0] sm:$0xff] %vm1618_vm3, %v1610_v39  ;;  %v1264_v41 = vadd.f32 %v1263_v40, %v861_v25 }
 0x1df   : > { %v1473_v29 = vadd.f32 %v1472_v38, %v1264_v41 }
 0x1e0   : > { %v1529_v46 = vpop.f32.mrf.mxu3 }
 0x1e1   : > { %v1592_v49 = vadd.f32 %v2859_v26, %v1473_v29  ;;  %v1475_v50 = vpop.f32.mrf.mxu2  ;;  %v1530_v52 = vadd.f32 %v1529_v46, %v1321_v58 }
 0x1e2   : > { %v867_v54 = vpop.f32.mrf.mxu0 }
 0x1e3   : > { %1657 = vst.msk [vmem:[%s2488_s29 + $0x130] sm:$0xff] %vm1618_vm3, %v1592_v49  ;;  %v1611_v55 = vadd.f32 %v2859_v26, %v1530_v52 }
 0x1e4   : > { %v1266_v11 = vpop.f32.mrf.mxu1 }
 0x1e5   : > { %1676 = vst.msk [vmem:[%s2488_s29 + $0x1c8] sm:$0xff] %vm1618_vm3, %v1611_v55  ;;  %v1267_v28 = vadd.f32 %v1266_v11, %v864_v14 }
 0x1e7   : > { %v1476_v47 = vadd.f32 %v1475_v50, %v1267_v28 }
 0x1e8   : > { %v1532_v59 = vpop.f32.mrf.mxu3 }
 0x1e9   : > { %v1593_v60 = vadd.f32 %v2859_v26, %v1476_v47  ;;  %v1478_v62 = vpop.f32.mrf.mxu2  ;;  %v1533_v1 = vadd.f32 %v1532_v59, %v1324_v6 }
 0x1ea   : > { %v870_v3 = vpop.f32.mrf.mxu0 }
 0x1eb   : > { %1658 = vst.msk [vmem:[%s2488_s29 + $0x138] sm:$0xff] %vm1618_vm3, %v1593_v60  ;;  %v1612_v4 = vadd.f32 %v2859_v26, %v1533_v1 }
 0x1ec   : > { %v1269_v5 = vpop.f32.mrf.mxu1 }
 0x1ed   : > { %1677 = vst.msk [vmem:[%s2488_s29 + $0x1d0] sm:$0xff] %vm1618_vm3, %v1612_v4  ;;  %v1270_v42 = vadd.f32 %v1269_v5, %v867_v54 }
 0x1ef   : > { %v1479_v2 = vadd.f32 %v1478_v62, %v1270_v42 }
 0x1f0   : > { %v1535_v22 = vpop.f32.mrf.mxu3 }
 0x1f1   : > { %v1594_v44 = vadd.f32 %v2859_v26, %v1479_v2  ;;  %v1481_v48 = vpop.f32.mrf.mxu2  ;;  %v1536_v8 = vadd.f32 %v1535_v22, %v1327_v18 }
 0x1f2   : > { %v873_v9 = vpop.f32.mrf.mxu0 }
 0x1f3   : > { %1659 = vst.msk [vmem:[%s2488_s29 + $0x140] sm:$0xff] %vm1618_vm3, %v1594_v44  ;;  %v1613_v10 = vadd.f32 %v2859_v26, %v1536_v8 }
 0x1f4   : > { %v1272_v15 = vpop.f32.mrf.mxu1 }
 0x1f5   : > { %1678 = vst.msk [vmem:[%s2488_s29 + $0x1d8] sm:$0xff] %vm1618_vm3, %v1613_v10  ;;  %v1273_v16 = vadd.f32 %v1272_v15, %v870_v3 }
 0x1f7   : > { %v1482_v19 = vadd.f32 %v1481_v48, %v1273_v16 }
 0x1f8   : > { %v1538_v17 = vpop.f32.mrf.mxu3 }
 0x1f9   : > { %v1595_v21 = vadd.f32 %v2859_v26, %v1482_v19  ;;  %v1484_v33 = vpop.f32.mrf.mxu2  ;;  %v1539_v61 = vadd.f32 %v1538_v17, %v1330_v30 }
 0x1fa   : > { %v876_v23 = vpop.f32.mrf.mxu0 }
 0x1fb   : > { %1660 = vst.msk [vmem:[%s2488_s29 + $0x148] sm:$0xff] %vm1618_vm3, %v1595_v21  ;;  %v1614_v24 = vadd.f32 %v2859_v26, %v1539_v61 }
 0x1fc   : > { %v1275_v53 = vpop.f32.mrf.mxu1 }
 0x1fd   : > { %1679 = vst.msk [vmem:[%s2488_s29 + $0x1e0] sm:$0xff] %vm1618_vm3, %v1614_v24  ;;  %v1276_v63 = vadd.f32 %v1275_v53, %v873_v9 }
 0x1ff   : > { %v1485_v37 = vadd.f32 %v1484_v33, %v1276_v63 }
 0x200   : > { %v1541_v25 = vpop.f32.mrf.mxu3 }
 0x201   : > { %v1596_v27 = vadd.f32 %v2859_v26, %v1485_v37  ;;  %v1487_v32 = vpop.f32.mrf.mxu2  ;;  %v1542_v35 = vadd.f32 %v1541_v25, %v1333_v43 }
 0x202   : > { %v879_v45 = vpop.f32.mrf.mxu0 }
 0x203   : > { %1661 = vst.msk [vmem:[%s2488_s29 + $0x150] sm:$0xff] %vm1618_vm3, %v1596_v27  ;;  %v1615_v13 = vadd.f32 %v2859_v26, %v1542_v35 }
 0x204   : > { %v1278_v51 = vpop.f32.mrf.mxu1 }
 0x205   : > { %1680 = vst.msk [vmem:[%s2488_s29 + $0x1e8] sm:$0xff] %vm1618_vm3, %v1615_v13  ;;  %v1279_v36 = vadd.f32 %v1278_v51, %v876_v23 }
 0x207   : > { %v1488_v56 = vadd.f32 %v1487_v32, %v1279_v36 }
 0x208   : > { %v1544_v38 = vpop.f32.mrf.mxu3 }
 0x209   : > { %v1597_v0 = vadd.f32 %v2859_v26, %v1488_v56  ;;  %v1490_v14 = vpop.f32.mrf.mxu2  ;;  %v1545_v39 = vadd.f32 %v1544_v38, %v1336_v57 }
 0x20a   : > { %v882_v40 = vpop.f32.mrf.mxu0 }
 0x20b   : > { %1662 = vst.msk [vmem:[%s2488_s29 + $0x158] sm:$0xff] %vm1618_vm3, %v1597_v0  ;;  %v1616_v41 = vadd.f32 %v2859_v26, %v1545_v39 }
 0x20c   : > { %v1281_v58 = vpop.f32.mrf.mxu1 }
 0x20d   : > { %1681 = vst.msk [vmem:[%s2488_s29 + $0x1f0] sm:$0xff] %vm1618_vm3, %v1616_v41  ;;  %v1282_v29 = vadd.f32 %v1281_v58, %v879_v45 }
 0x20f   : > { %v1491_v12 = vadd.f32 %v1490_v14, %v1282_v29 }
 0x210   : > { %v1547_v46 = vpop.f32.mrf.mxu3 }
 0x211   : > { %v1598_v49 = vadd.f32 %v2859_v26, %v1491_v12  ;;  %v1493_v50 = vpop.f32.mrf.mxu2  ;;  %v1548_v52 = vadd.f32 %v1547_v46, %v1339_v7 }
 0x212   : > { %v885_v54 = vpop.f32.mrf.mxu0 }
 0x213   : > { %1663 = vst.msk [vmem:[%s2488_s29 + $0x160] sm:$0xff] %vm1618_vm3, %v1598_v49  ;;  %v1617_v55 = vadd.f32 %v2859_v26, %v1548_v52 }
 0x214   : > { %v1284_v11 = vpop.f32.mrf.mxu1 }
 0x215   : > { %1682 = vst.msk [vmem:[%s2488_s29 + $0x1f8] sm:$0xff] %vm1618_vm3, %v1617_v55  ;;  %v1285_v28 = vadd.f32 %v1284_v11, %v882_v40 }
 0x217   : > { %v1494_v6 = vadd.f32 %v1493_v50, %v1285_v28 }
 0x219   : > { %v1599_v47 = vadd.f32 %v2859_v26, %v1494_v6  ;;  %v1496_v20 = vpop.f32.mrf.mxu2 }
 0x21a   : > { %v888_v31 = vpop.f32.mrf.mxu0 }
 0x21b   : > { %1664 = vst.msk [vmem:[%s2488_s29 + $0x168] sm:$0xff] %vm1618_vm3, %v1599_v47 }
 0x21c   : > { %v1287_v59 = vpop.f32.mrf.mxu1 }
 0x21d   : > { %v1288_v60 = vadd.f32 %v1287_v59, %v885_v54 }
 0x21f   : > { %v1497_v62 = vadd.f32 %v1496_v20, %v1288_v60 }
 0x221   : > { %v1600_v1 = vadd.f32 %v2859_v26, %v1497_v62  ;;  %v1499_v3 = vpop.f32.mrf.mxu2 }
 0x222   : > { %v891_v5 = vpop.f32.mrf.mxu0 }
 0x223   : > { %1665 = vst.msk [vmem:[%s2488_s29 + $0x170] sm:$0xff] %vm1618_vm3, %v1600_v1  ;;  %v1294_v2 = vadd.f32 %v2645_v34, %v891_v5 }
 0x224   : > { %v1290_v4 = vpop.f32.mrf.mxu1 }
 0x225   : > { %v1291_v42 = vadd.f32 %v1290_v4, %v888_v31 }
 0x227   : > { %v1500_v18 = vadd.f32 %v1499_v3, %v1291_v42 }
 0x229   : > { %v1601_v22 = vadd.f32 %v2859_v26, %v1500_v18  ;;  %v1502_v44 = vpop.f32.mrf.mxu2 }
 0x22a   : > { %v1503_v48 = vadd.f32 %v1502_v44, %v1294_v2 }
 0x22b   : > { %1666 = vst.msk [vmem:[%s2488_s29 + $0x178] sm:$0xff] %vm1618_vm3, %v1601_v22 }
 0x22c   : > { %v1602_v8 = vadd.f32 %v2859_v26, %v1503_v48 }
 0x22e   : > { %1667 = vst.msk [vmem:[%s2488_s29 + $0x180] sm:$0xff] %vm1618_vm3, %v1602_v8 }
 0x22f PF: > { %s15_s22 = sadd.s32 1, %s2058_s22   ;;  %s2998_s18 = smov %s2050_s20 }
 0x230   : > { %p12_p7 = scmp.ge.s32.totalorder %s15_s22, 6   ;;  %s2999_s19 = smov %s2054_s21 }
 0x231   : > { %s3000_s20 = smov %s3003_s23  ;;  %s3001_s21 = smov %s3007_s24 }
 0x232   :  { %14 = sbr.rel (!%p12_p7) target bundleno = 3 (0x3), region = 73 }

</bundles_post_ra>
